<compile_context>
chip_gen: v7x
topology: tpu7x:2x2x1
jax: 0.10.0
libtpu: 0.0.40
codegen_flags: <defaults>
</compile_context>

<pallas_src>
import numpy as np

import jax
import jax.numpy as jnp
from jax.experimental import pallas as pl
from jax.experimental.pallas import tpu as pltpu

_EPS = 1e-5


# ----------------------------------------------------------------------------
# Pallas kernel: whole forward pass, activations resident in VMEM.
# ----------------------------------------------------------------------------

def _conv_block(a, s_ref, m_ref, b_ref, relu, residual=None):
    """out = act( sum_i (S_i @ a) @ M_i + bias [+ residual] )."""
    kh = s_ref.shape[0]
    acc = None
    for i in range(kh):                       # kh <= 3, fully unrolled
        rows = jnp.dot(s_ref[i], a, preferred_element_type=jnp.float32)
        part = jnp.dot(rows, m_ref[i], preferred_element_type=jnp.float32)
        acc = part if acc is None else acc + part
    acc = acc + b_ref[...]
    if residual is not None:
        acc = acc + residual
    if relu:
        acc = jnp.maximum(acc, 0.0)
    return acc


def _fused_resnet_kernel(
        x_ref,
        stem_s, stem_m, stem_b,
        l1a_s, l1a_m, l1a_b,
        l1b_s, l1b_m, l1b_b,
        l2a_s, l2a_m, l2a_b,
        l2d_s, l2d_m, l2d_b,
        l2b_s, l2b_m, l2b_b,
        pool_s, fc_m, fc_b,
        out_ref):
    x = x_ref[...]                                           # (N*H, W*Cin)

    # stem: conv3x3 s1 + BN + ReLU
    a0 = _conv_block(x, stem_s, stem_m, stem_b, relu=True)

    # layer1 BasicBlock (identity shortcut)
    h = _conv_block(a0, l1a_s, l1a_m, l1a_b, relu=True)
    a1 = _conv_block(h, l1b_s, l1b_m, l1b_b, relu=True, residual=a0)

    # layer2 BasicBlock (stride-2, 1x1 downsample shortcut)
    ds = _conv_block(a1, l2d_s, l2d_m, l2d_b, relu=False)
    h2 = _conv_block(a1, l2a_s, l2a_m, l2a_b, relu=True)
    a2 = _conv_block(h2, l2b_s, l2b_m, l2b_b, relu=True, residual=ds)

    # global average pool + FC, folded into two matmuls
    pooled = jnp.dot(pool_s[...], a2, preferred_element_type=jnp.float32)
    out_ref[...] = (jnp.dot(pooled, fc_m[...],
                            preferred_element_type=jnp.float32) + fc_b[...])


@jax.jit
def model_forward(x_nchw, packs):
    n, c, h, w = x_nchw.shape
    # NCHW -> NHWC -> (N*H, W*C): lane-dense "row matrix" layout.
    x = jnp.transpose(x_nchw, (0, 2, 3, 1)).reshape(n * h, w * c)

    args = [x]
    for name in ("stem", "l1a", "l1b", "l2a", "l2d", "l2b", "head"):
        args.extend(packs[name])

    num_classes = packs["head"][1].shape[1]
    vmem = pl.BlockSpec(memory_space=pltpu.MemorySpace.VMEM)
    return pl.pallas_call(
        _fused_resnet_kernel,
        out_shape=jax.ShapeDtypeStruct((n, num_classes), jnp.float32),
        in_specs=[vmem] * len(args),
        out_specs=vmem,
    )(*args)


# ----------------------------------------------------------------------------
# Parameter preparation (done once, outside the jitted forward):
# BN folding + construction of the constant S / M matrices.
# ----------------------------------------------------------------------------

def _bn_fold(gamma, beta, mean=0.0, var=1.0, eps=_EPS):
    scale = np.asarray(gamma, np.float32) / np.sqrt(np.float32(var) + eps)
    shift = np.asarray(beta, np.float32) - np.float32(mean) * scale
    return scale, shift


def _h_select(n, h_in, h_out, kh, stride, pad):
    """(kh, n*Ho, n*Hin) 0/1 matrices: h-tap + H padding + H stride."""
    s = np.zeros((kh, n * h_out, n * h_in), np.float32)
    for i in range(kh):
        for b in range(n):
            for ho in range(h_out):
                hi = ho * stride + i - pad
                if 0 <= hi < h_in:
                    s[i, b * h_out + ho, b * h_in + hi] = 1.0
    return s


def _w_mix(w_oihw, w_in, w_out, stride, pad, scale):
    """(kh, Win*Cin, Wout*Cout) block-banded weights: w-taps + BN scale."""
    w = (np.asarray(w_oihw, np.float32)
         * np.asarray(scale, np.float32)[:, None, None, None])
    co, ci, kh, kw = w.shape
    m = np.zeros((kh, w_in * ci, w_out * co), np.float32)
    for i in range(kh):
        for wo in range(w_out):
            for j in range(kw):
                wi = wo * stride + j - pad
                if 0 <= wi < w_in:
                    m[i, wi * ci:(wi + 1) * ci, wo * co:(wo + 1) * co] = \
                        w[:, :, i, j].T
    return m


def prepare_params(p, n=2, h=16, w=16):
    def conv_pack(w_oihw, bn_params, h_in, w_in, stride, pad):
        co, ci, kh, kw = w_oihw.shape
        h_out = (h_in + 2 * pad - kh) // stride + 1
        w_out = (w_in + 2 * pad - kw) // stride + 1
        scale, shift = _bn_fold(*bn_params)
        s = _h_select(n, h_in, h_out, kh, stride, pad)
        m = _w_mix(w_oihw, w_in, w_out, stride, pad, scale)
        bias = np.tile(shift, w_out)[None, :]                # (1, Wout*Cout)
        return ((jnp.asarray(s), jnp.asarray(m), jnp.asarray(bias)),
                (h_out, w_out, co))

    packs = {}
    packs["stem"], (h1, w1, _) = conv_pack(
        np.asarray(p["stem_w"]), p["stem_bn"], h, w, 1, 1)
    packs["l1a"], _ = conv_pack(np.asarray(p["l1_w1"]), p["l1_bn1"], h1, w1, 1, 1)
    packs["l1b"], _ = conv_pack(np.asarray(p["l1_w2"]), p["l1_bn2"], h1, w1, 1, 1)
    packs["l2a"], (h2, w2, c2) = conv_pack(
        np.asarray(p["l2_w1"]), p["l2_bn1"], h1, w1, 2, 1)
    packs["l2d"], _ = conv_pack(np.asarray(p["l2_ds"]), p["l2_dsbn"], h1, w1, 2, 0)
    packs["l2b"], _ = conv_pack(np.asarray(p["l2_w2"]), p["l2_bn2"], h2, w2, 1, 1)

    # global-average-pool + FC folded into constant matrices
    s_pool = np.zeros((n, n * h2), np.float32)
    for b in range(n):
        s_pool[b, b * h2:(b + 1) * h2] = 1.0
    fc_w = np.asarray(p["fc_w"], np.float32)                 # (C2, num_classes)
    m_fc = np.tile(fc_w, (w2, 1)) / float(h2 * w2)           # (W2*C2, classes)
    fc_b = np.asarray(p["fc_b"], np.float32)[None, :]
    packs["head"] = (jnp.asarray(s_pool), jnp.asarray(m_fc), jnp.asarray(fc_b))
    return packs


# ----------------------------------------------------------------------------
# Model params (stem + layers=[1,1] BasicBlocks + fc), same init as before.
# ----------------------------------------------------------------------------

def init_params(key, cin=3, c1=16, c2=32, num_classes=10):
    ks = jax.random.split(key, 8)

    def conv_w(k, cout, cin_, kh, kw):
        fan_in = cin_ * kh * kw
        return (jax.random.normal(k, (cout, cin_, kh, kw), jnp.float32)
                * (2.0 / fan_in) ** 0.5)

    def bn(c):
        return (jnp.linspace(0.9, 1.1, c, dtype=jnp.float32),
                jnp.linspace(-0.05, 0.05, c, dtype=jnp.float32))

    p = {}
    p["stem_w"] = conv_w(ks[0], c1, cin, 3, 3); p["stem_bn"] = bn(c1)
    p["l1_w1"] = conv_w(ks[1], c1, c1, 3, 3);   p["l1_bn1"] = bn(c1)
    p["l1_w2"] = conv_w(ks[2], c1, c1, 3, 3);   p["l1_bn2"] = bn(c1)
    p["l2_w1"] = conv_w(ks[3], c2, c1, 3, 3);   p["l2_bn1"] = bn(c2)
    p["l2_w2"] = conv_w(ks[4], c2, c2, 3, 3);   p["l2_bn2"] = bn(c2)
    p["l2_ds"] = conv_w(ks[5], c2, c1, 1, 1);   p["l2_dsbn"] = bn(c2)
    p["fc_w"] = (jax.random.normal(ks[6], (c2, num_classes), jnp.float32)
                 * (1.0 / c2) ** 0.5)
    p["fc_b"] = jnp.linspace(-0.1, 0.1, num_classes, dtype=jnp.float32)
    return p


# Pure-JAX reference (standard convs) for a correctness sanity check.
def reference_forward(x_nchw, p, eps=_EPS):
    def conv(x, w_oihw, stride, pad):
        return jax.lax.conv_general_dilated(
            x, jnp.transpose(w_oihw, (2, 3, 1, 0)),
            window_strides=(stride, stride),
            padding=[(pad, pad), (pad, pad)],
            dimension_numbers=("NHWC", "HWIO", "NHWC"),
            precision=jax.lax.Precision.HIGHEST)

    def bn(x, gb):
        gamma, beta = gb
        return x * (gamma / jnp.sqrt(1.0 + eps)) + beta

    x = jnp.transpose(x_nchw, (0, 2, 3, 1))
    a0 = jax.nn.relu(bn(conv(x, p["stem_w"], 1, 1), p["stem_bn"]))
    h = jax.nn.relu(bn(conv(a0, p["l1_w1"], 1, 1), p["l1_bn1"]))
    a1 = jax.nn.relu(bn(conv(h, p["l1_w2"], 1, 1), p["l1_bn2"]) + a0)
    ds = bn(conv(a1, p["l2_ds"], 2, 0), p["l2_dsbn"])
    h2 = jax.nn.relu(bn(conv(a1, p["l2_w1"], 2, 1), p["l2_bn1"]))
    a2 = jax.nn.relu(bn(conv(h2, p["l2_w2"], 1, 1), p["l2_bn2"]) + ds)
    pooled = jnp.mean(a2, axis=(1, 2))
    return pooled @ p["fc_w"] + p["fc_b"]


if __name__ == "__main__":
    key = jax.random.PRNGKey(0)
    k_x, k_p = jax.random.split(key)
    x = jax.random.normal(k_x, (2, 3, 16, 16), jnp.float32)   # NCHW input
    params = init_params(k_p, cin=3, c1=16, c2=32, num_classes=10)
    packs = prepare_params(params, n=2, h=16, w=16)           # fold once

    out = model_forward(x, packs)
    out = jax.block_until_ready(out)
    assert out.shape == (2, 10) and out.dtype == jnp.float32
    assert bool(jnp.all(jnp.isfinite(out)))

    ref = reference_forward(x, params)
    err = float(jnp.max(jnp.abs(out - ref)))
    ref_scale = float(jnp.max(jnp.abs(ref)))
    assert err <= 5e-2 * max(1.0, ref_scale), f"mismatch {err} vs {ref_scale}"
    print("KERNEL_OK")
</pallas_src>

<mosaic_0001>
module attributes {stable_mosaic.version = 11 : i64} {
  func.func @_fused_resnet_kernel(%arg0: memref<32x48xf32, #tpu.memory_space<vmem>>, %arg1: memref<3x32x32xf32, #tpu.memory_space<vmem>>, %arg2: memref<3x48x256xf32, #tpu.memory_space<vmem>>, %arg3: memref<1x256xf32, #tpu.memory_space<vmem>>, %arg4: memref<3x32x32xf32, #tpu.memory_space<vmem>>, %arg5: memref<3x256x256xf32, #tpu.memory_space<vmem>>, %arg6: memref<1x256xf32, #tpu.memory_space<vmem>>, %arg7: memref<3x32x32xf32, #tpu.memory_space<vmem>>, %arg8: memref<3x256x256xf32, #tpu.memory_space<vmem>>, %arg9: memref<1x256xf32, #tpu.memory_space<vmem>>, %arg10: memref<3x16x32xf32, #tpu.memory_space<vmem>>, %arg11: memref<3x256x256xf32, #tpu.memory_space<vmem>>, %arg12: memref<1x256xf32, #tpu.memory_space<vmem>>, %arg13: memref<1x16x32xf32, #tpu.memory_space<vmem>>, %arg14: memref<1x256x256xf32, #tpu.memory_space<vmem>>, %arg15: memref<1x256xf32, #tpu.memory_space<vmem>>, %arg16: memref<3x16x16xf32, #tpu.memory_space<vmem>>, %arg17: memref<3x256x256xf32, #tpu.memory_space<vmem>>, %arg18: memref<1x256xf32, #tpu.memory_space<vmem>>, %arg19: memref<2x16xf32, #tpu.memory_space<vmem>>, %arg20: memref<256x10xf32, #tpu.memory_space<vmem>>, %arg21: memref<1x10xf32, #tpu.memory_space<vmem>>, %arg22: memref<2x10xf32, #tpu.memory_space<vmem>>) attributes {dimension_semantics = [], scalar_prefetch = 0 : i64, scratch_operands = 0 : i64, tpu.core_type = #tpu.core_type<tc>} {
    %c0 = arith.constant 0 : index
    %c0_0 = arith.constant 0 : index
    %0 = vector.load %arg0[%c0, %c0_0] : memref<32x48xf32, #tpu.memory_space<vmem>>, vector<32x48xf32>
    %c0_1 = arith.constant 0 : index
    %c0_2 = arith.constant 0 : index
    %c0_3 = arith.constant 0 : index
    %1 = vector.load %arg1[%c0_1, %c0_2, %c0_3] : memref<3x32x32xf32, #tpu.memory_space<vmem>>, vector<1x32x32xf32>
    %2 = vector.shape_cast %1 : vector<1x32x32xf32> to vector<32x32xf32>
    %cst = arith.constant dense<0.000000e+00> : vector<32x48xf32>
    %3 = tpu.matmul %2, %0, %cst {dimension_numbers = #tpu.dot_dimension_numbers<[1], [0], [0], [1], [0, 0, 1, 1], [], []>} : vector<32x32xf32>, vector<32x48xf32>, vector<32x48xf32> -> vector<32x48xf32>
    %c0_4 = arith.constant 0 : index
    %c0_5 = arith.constant 0 : index
    %c0_6 = arith.constant 0 : index
    %4 = vector.load %arg2[%c0_4, %c0_5, %c0_6] : memref<3x48x256xf32, #tpu.memory_space<vmem>>, vector<1x48x256xf32>
    %5 = vector.shape_cast %4 : vector<1x48x256xf32> to vector<48x256xf32>
    %cst_7 = arith.constant dense<0.000000e+00> : vector<32x256xf32>
    %6 = tpu.matmul %3, %5, %cst_7 {dimension_numbers = #tpu.dot_dimension_numbers<[1], [0], [0], [1], [0, 0, 1, 1], [], []>} : vector<32x48xf32>, vector<48x256xf32>, vector<32x256xf32> -> vector<32x256xf32>
    %c1 = arith.constant 1 : index
    %c0_8 = arith.constant 0 : index
    %c0_9 = arith.constant 0 : index
    %7 = vector.load %arg1[%c1, %c0_8, %c0_9] : memref<3x32x32xf32, #tpu.memory_space<vmem>>, vector<1x32x32xf32>
    %8 = vector.shape_cast %7 : vector<1x32x32xf32> to vector<32x32xf32>
    %cst_10 = arith.constant dense<0.000000e+00> : vector<32x48xf32>
    %9 = tpu.matmul %8, %0, %cst_10 {dimension_numbers = #tpu.dot_dimension_numbers<[1], [0], [0], [1], [0, 0, 1, 1], [], []>} : vector<32x32xf32>, vector<32x48xf32>, vector<32x48xf32> -> vector<32x48xf32>
    %c1_11 = arith.constant 1 : index
    %c0_12 = arith.constant 0 : index
    %c0_13 = arith.constant 0 : index
    %10 = vector.load %arg2[%c1_11, %c0_12, %c0_13] : memref<3x48x256xf32, #tpu.memory_space<vmem>>, vector<1x48x256xf32>
    %11 = vector.shape_cast %10 : vector<1x48x256xf32> to vector<48x256xf32>
    %cst_14 = arith.constant dense<0.000000e+00> : vector<32x256xf32>
    %12 = tpu.matmul %9, %11, %cst_14 {dimension_numbers = #tpu.dot_dimension_numbers<[1], [0], [0], [1], [0, 0, 1, 1], [], []>} : vector<32x48xf32>, vector<48x256xf32>, vector<32x256xf32> -> vector<32x256xf32>
    %13 = arith.addf %6, %12 : vector<32x256xf32>
    %c2 = arith.constant 2 : index
    %c0_15 = arith.constant 0 : index
    %c0_16 = arith.constant 0 : index
    %14 = vector.load %arg1[%c2, %c0_15, %c0_16] : memref<3x32x32xf32, #tpu.memory_space<vmem>>, vector<1x32x32xf32>
    %15 = vector.shape_cast %14 : vector<1x32x32xf32> to vector<32x32xf32>
    %cst_17 = arith.constant dense<0.000000e+00> : vector<32x48xf32>
    %16 = tpu.matmul %15, %0, %cst_17 {dimension_numbers = #tpu.dot_dimension_numbers<[1], [0], [0], [1], [0, 0, 1, 1], [], []>} : vector<32x32xf32>, vector<32x48xf32>, vector<32x48xf32> -> vector<32x48xf32>
    %c2_18 = arith.constant 2 : index
    %c0_19 = arith.constant 0 : index
    %c0_20 = arith.constant 0 : index
    %17 = vector.load %arg2[%c2_18, %c0_19, %c0_20] : memref<3x48x256xf32, #tpu.memory_space<vmem>>, vector<1x48x256xf32>
    %18 = vector.shape_cast %17 : vector<1x48x256xf32> to vector<48x256xf32>
    %cst_21 = arith.constant dense<0.000000e+00> : vector<32x256xf32>
    %19 = tpu.matmul %16, %18, %cst_21 {dimension_numbers = #tpu.dot_dimension_numbers<[1], [0], [0], [1], [0, 0, 1, 1], [], []>} : vector<32x48xf32>, vector<48x256xf32>, vector<32x256xf32> -> vector<32x256xf32>
    %20 = arith.addf %13, %19 : vector<32x256xf32>
    %c0_22 = arith.constant 0 : index
    %c0_23 = arith.constant 0 : index
    %21 = vector.load %arg3[%c0_22, %c0_23] : memref<1x256xf32, #tpu.memory_space<vmem>>, vector<1x256xf32>
    %22 = vector.broadcast %21 : vector<1x256xf32> to vector<32x256xf32>
    %23 = arith.addf %20, %22 : vector<32x256xf32>
    %cst_24 = arith.constant 0.000000e+00 : f32
    %24 = vector.broadcast %cst_24 : f32 to vector<32x256xf32>
    %25 = arith.maximumf %23, %24 : vector<32x256xf32>
    %c0_25 = arith.constant 0 : index
    %c0_26 = arith.constant 0 : index
    %c0_27 = arith.constant 0 : index
    %26 = vector.load %arg4[%c0_25, %c0_26, %c0_27] : memref<3x32x32xf32, #tpu.memory_space<vmem>>, vector<1x32x32xf32>
    %27 = vector.shape_cast %26 : vector<1x32x32xf32> to vector<32x32xf32>
    %cst_28 = arith.constant dense<0.000000e+00> : vector<32x256xf32>
    %28 = tpu.matmul %27, %25, %cst_28 {dimension_numbers = #tpu.dot_dimension_numbers<[1], [0], [0], [1], [0, 0, 1, 1], [], []>} : vector<32x32xf32>, vector<32x256xf32>, vector<32x256xf32> -> vector<32x256xf32>
    %c0_29 = arith.constant 0 : index
    %c0_30 = arith.constant 0 : index
    %c0_31 = arith.constant 0 : index
    %29 = vector.load %arg5[%c0_29, %c0_30, %c0_31] : memref<3x256x256xf32, #tpu.memory_space<vmem>>, vector<1x256x256xf32>
    %30 = vector.shape_cast %29 : vector<1x256x256xf32> to vector<256x256xf32>
    %cst_32 = arith.constant dense<0.000000e+00> : vector<32x256xf32>
    %31 = tpu.matmul %28, %30, %cst_32 {dimension_numbers = #tpu.dot_dimension_numbers<[1], [0], [0], [1], [0, 0, 1, 1], [], []>} : vector<32x256xf32>, vector<256x256xf32>, vector<32x256xf32> -> vector<32x256xf32>
    %c1_33 = arith.constant 1 : index
    %c0_34 = arith.constant 0 : index
    %c0_35 = arith.constant 0 : index
    %32 = vector.load %arg4[%c1_33, %c0_34, %c0_35] : memref<3x32x32xf32, #tpu.memory_space<vmem>>, vector<1x32x32xf32>
    %33 = vector.shape_cast %32 : vector<1x32x32xf32> to vector<32x32xf32>
    %cst_36 = arith.constant dense<0.000000e+00> : vector<32x256xf32>
    %34 = tpu.matmul %33, %25, %cst_36 {dimension_numbers = #tpu.dot_dimension_numbers<[1], [0], [0], [1], [0, 0, 1, 1], [], []>} : vector<32x32xf32>, vector<32x256xf32>, vector<32x256xf32> -> vector<32x256xf32>
    %c1_37 = arith.constant 1 : index
    %c0_38 = arith.constant 0 : index
    %c0_39 = arith.constant 0 : index
    %35 = vector.load %arg5[%c1_37, %c0_38, %c0_39] : memref<3x256x256xf32, #tpu.memory_space<vmem>>, vector<1x256x256xf32>
    %36 = vector.shape_cast %35 : vector<1x256x256xf32> to vector<256x256xf32>
    %cst_40 = arith.constant dense<0.000000e+00> : vector<32x256xf32>
    %37 = tpu.matmul %34, %36, %cst_40 {dimension_numbers = #tpu.dot_dimension_numbers<[1], [0], [0], [1], [0, 0, 1, 1], [], []>} : vector<32x256xf32>, vector<256x256xf32>, vector<32x256xf32> -> vector<32x256xf32>
    %38 = arith.addf %31, %37 : vector<32x256xf32>
    %c2_41 = arith.constant 2 : index
    %c0_42 = arith.constant 0 : index
    %c0_43 = arith.constant 0 : index
    %39 = vector.load %arg4[%c2_41, %c0_42, %c0_43] : memref<3x32x32xf32, #tpu.memory_space<vmem>>, vector<1x32x32xf32>
    %40 = vector.shape_cast %39 : vector<1x32x32xf32> to vector<32x32xf32>
    %cst_44 = arith.constant dense<0.000000e+00> : vector<32x256xf32>
    %41 = tpu.matmul %40, %25, %cst_44 {dimension_numbers = #tpu.dot_dimension_numbers<[1], [0], [0], [1], [0, 0, 1, 1], [], []>} : vector<32x32xf32>, vector<32x256xf32>, vector<32x256xf32> -> vector<32x256xf32>
    %c2_45 = arith.constant 2 : index
    %c0_46 = arith.constant 0 : index
    %c0_47 = arith.constant 0 : index
    %42 = vector.load %arg5[%c2_45, %c0_46, %c0_47] : memref<3x256x256xf32, #tpu.memory_space<vmem>>, vector<1x256x256xf32>
    %43 = vector.shape_cast %42 : vector<1x256x256xf32> to vector<256x256xf32>
    %cst_48 = arith.constant dense<0.000000e+00> : vector<32x256xf32>
    %44 = tpu.matmul %41, %43, %cst_48 {dimension_numbers = #tpu.dot_dimension_numbers<[1], [0], [0], [1], [0, 0, 1, 1], [], []>} : vector<32x256xf32>, vector<256x256xf32>, vector<32x256xf32> -> vector<32x256xf32>
    %45 = arith.addf %38, %44 : vector<32x256xf32>
    %c0_49 = arith.constant 0 : index
    %c0_50 = arith.constant 0 : index
    %46 = vector.load %arg6[%c0_49, %c0_50] : memref<1x256xf32, #tpu.memory_space<vmem>>, vector<1x256xf32>
    %47 = vector.broadcast %46 : vector<1x256xf32> to vector<32x256xf32>
    %48 = arith.addf %45, %47 : vector<32x256xf32>
    %cst_51 = arith.constant 0.000000e+00 : f32
    %49 = vector.broadcast %cst_51 : f32 to vector<32x256xf32>
    %50 = arith.maximumf %48, %49 : vector<32x256xf32>
    %c0_52 = arith.constant 0 : index
    %c0_53 = arith.constant 0 : index
    %c0_54 = arith.constant 0 : index
    %51 = vector.load %arg7[%c0_52, %c0_53, %c0_54] : memref<3x32x32xf32, #tpu.memory_space<vmem>>, vector<1x32x32xf32>
    %52 = vector.shape_cast %51 : vector<1x32x32xf32> to vector<32x32xf32>
    %cst_55 = arith.constant dense<0.000000e+00> : vector<32x256xf32>
    %53 = tpu.matmul %52, %50, %cst_55 {dimension_numbers = #tpu.dot_dimension_numbers<[1], [0], [0], [1], [0, 0, 1, 1], [], []>} : vector<32x32xf32>, vector<32x256xf32>, vector<32x256xf32> -> vector<32x256xf32>
    %c0_56 = arith.constant 0 : index
    %c0_57 = arith.constant 0 : index
    %c0_58 = arith.constant 0 : index
    %54 = vector.load %arg8[%c0_56, %c0_57, %c0_58] : memref<3x256x256xf32, #tpu.memory_space<vmem>>, vector<1x256x256xf32>
    %55 = vector.shape_cast %54 : vector<1x256x256xf32> to vector<256x256xf32>
    %cst_59 = arith.constant dense<0.000000e+00> : vector<32x256xf32>
    %56 = tpu.matmul %53, %55, %cst_59 {dimension_numbers = #tpu.dot_dimension_numbers<[1], [0], [0], [1], [0, 0, 1, 1], [], []>} : vector<32x256xf32>, vector<256x256xf32>, vector<32x256xf32> -> vector<32x256xf32>
    %c1_60 = arith.constant 1 : index
    %c0_61 = arith.constant 0 : index
    %c0_62 = arith.constant 0 : index
    %57 = vector.load %arg7[%c1_60, %c0_61, %c0_62] : memref<3x32x32xf32, #tpu.memory_space<vmem>>, vector<1x32x32xf32>
    %58 = vector.shape_cast %57 : vector<1x32x32xf32> to vector<32x32xf32>
    %cst_63 = arith.constant dense<0.000000e+00> : vector<32x256xf32>
    %59 = tpu.matmul %58, %50, %cst_63 {dimension_numbers = #tpu.dot_dimension_numbers<[1], [0], [0], [1], [0, 0, 1, 1], [], []>} : vector<32x32xf32>, vector<32x256xf32>, vector<32x256xf32> -> vector<32x256xf32>
    %c1_64 = arith.constant 1 : index
    %c0_65 = arith.constant 0 : index
    %c0_66 = arith.constant 0 : index
    %60 = vector.load %arg8[%c1_64, %c0_65, %c0_66] : memref<3x256x256xf32, #tpu.memory_space<vmem>>, vector<1x256x256xf32>
    %61 = vector.shape_cast %60 : vector<1x256x256xf32> to vector<256x256xf32>
    %cst_67 = arith.constant dense<0.000000e+00> : vector<32x256xf32>
    %62 = tpu.matmul %59, %61, %cst_67 {dimension_numbers = #tpu.dot_dimension_numbers<[1], [0], [0], [1], [0, 0, 1, 1], [], []>} : vector<32x256xf32>, vector<256x256xf32>, vector<32x256xf32> -> vector<32x256xf32>
    %63 = arith.addf %56, %62 : vector<32x256xf32>
    %c2_68 = arith.constant 2 : index
    %c0_69 = arith.constant 0 : index
    %c0_70 = arith.constant 0 : index
    %64 = vector.load %arg7[%c2_68, %c0_69, %c0_70] : memref<3x32x32xf32, #tpu.memory_space<vmem>>, vector<1x32x32xf32>
    %65 = vector.shape_cast %64 : vector<1x32x32xf32> to vector<32x32xf32>
    %cst_71 = arith.constant dense<0.000000e+00> : vector<32x256xf32>
    %66 = tpu.matmul %65, %50, %cst_71 {dimension_numbers = #tpu.dot_dimension_numbers<[1], [0], [0], [1], [0, 0, 1, 1], [], []>} : vector<32x32xf32>, vector<32x256xf32>, vector<32x256xf32> -> vector<32x256xf32>
    %c2_72 = arith.constant 2 : index
    %c0_73 = arith.constant 0 : index
    %c0_74 = arith.constant 0 : index
    %67 = vector.load %arg8[%c2_72, %c0_73, %c0_74] : memref<3x256x256xf32, #tpu.memory_space<vmem>>, vector<1x256x256xf32>
    %68 = vector.shape_cast %67 : vector<1x256x256xf32> to vector<256x256xf32>
    %cst_75 = arith.constant dense<0.000000e+00> : vector<32x256xf32>
    %69 = tpu.matmul %66, %68, %cst_75 {dimension_numbers = #tpu.dot_dimension_numbers<[1], [0], [0], [1], [0, 0, 1, 1], [], []>} : vector<32x256xf32>, vector<256x256xf32>, vector<32x256xf32> -> vector<32x256xf32>
    %70 = arith.addf %63, %69 : vector<32x256xf32>
    %c0_76 = arith.constant 0 : index
    %c0_77 = arith.constant 0 : index
    %71 = vector.load %arg9[%c0_76, %c0_77] : memref<1x256xf32, #tpu.memory_space<vmem>>, vector<1x256xf32>
    %72 = vector.broadcast %71 : vector<1x256xf32> to vector<32x256xf32>
    %73 = arith.addf %70, %72 : vector<32x256xf32>
    %74 = arith.addf %73, %25 : vector<32x256xf32>
    %cst_78 = arith.constant 0.000000e+00 : f32
    %75 = vector.broadcast %cst_78 : f32 to vector<32x256xf32>
    %76 = arith.maximumf %74, %75 : vector<32x256xf32>
    %c0_79 = arith.constant 0 : index
    %c0_80 = arith.constant 0 : index
    %c0_81 = arith.constant 0 : index
    %77 = vector.load %arg13[%c0_79, %c0_80, %c0_81] : memref<1x16x32xf32, #tpu.memory_space<vmem>>, vector<1x16x32xf32>
    %78 = vector.shape_cast %77 : vector<1x16x32xf32> to vector<16x32xf32>
    %cst_82 = arith.constant dense<0.000000e+00> : vector<16x256xf32>
    %79 = tpu.matmul %78, %76, %cst_82 {dimension_numbers = #tpu.dot_dimension_numbers<[1], [0], [0], [1], [0, 0, 1, 1], [], []>} : vector<16x32xf32>, vector<32x256xf32>, vector<16x256xf32> -> vector<16x256xf32>
    %c0_83 = arith.constant 0 : index
    %c0_84 = arith.constant 0 : index
    %c0_85 = arith.constant 0 : index
    %80 = vector.load %arg14[%c0_83, %c0_84, %c0_85] : memref<1x256x256xf32, #tpu.memory_space<vmem>>, vector<1x256x256xf32>
    %81 = vector.shape_cast %80 : vector<1x256x256xf32> to vector<256x256xf32>
    %cst_86 = arith.constant dense<0.000000e+00> : vector<16x256xf32>
    %82 = tpu.matmul %79, %81, %cst_86 {dimension_numbers = #tpu.dot_dimension_numbers<[1], [0], [0], [1], [0, 0, 1, 1], [], []>} : vector<16x256xf32>, vector<256x256xf32>, vector<16x256xf32> -> vector<16x256xf32>
    %c0_87 = arith.constant 0 : index
    %c0_88 = arith.constant 0 : index
    %83 = vector.load %arg15[%c0_87, %c0_88] : memref<1x256xf32, #tpu.memory_space<vmem>>, vector<1x256xf32>
    %84 = vector.broadcast %83 : vector<1x256xf32> to vector<16x256xf32>
    %85 = arith.addf %82, %84 : vector<16x256xf32>
    %c0_89 = arith.constant 0 : index
    %c0_90 = arith.constant 0 : index
    %c0_91 = arith.constant 0 : index
    %86 = vector.load %arg10[%c0_89, %c0_90, %c0_91] : memref<3x16x32xf32, #tpu.memory_space<vmem>>, vector<1x16x32xf32>
    %87 = vector.shape_cast %86 : vector<1x16x32xf32> to vector<16x32xf32>
    %cst_92 = arith.constant dense<0.000000e+00> : vector<16x256xf32>
    %88 = tpu.matmul %87, %76, %cst_92 {dimension_numbers = #tpu.dot_dimension_numbers<[1], [0], [0], [1], [0, 0, 1, 1], [], []>} : vector<16x32xf32>, vector<32x256xf32>, vector<16x256xf32> -> vector<16x256xf32>
    %c0_93 = arith.constant 0 : index
    %c0_94 = arith.constant 0 : index
    %c0_95 = arith.constant 0 : index
    %89 = vector.load %arg11[%c0_93, %c0_94, %c0_95] : memref<3x256x256xf32, #tpu.memory_space<vmem>>, vector<1x256x256xf32>
    %90 = vector.shape_cast %89 : vector<1x256x256xf32> to vector<256x256xf32>
    %cst_96 = arith.constant dense<0.000000e+00> : vector<16x256xf32>
    %91 = tpu.matmul %88, %90, %cst_96 {dimension_numbers = #tpu.dot_dimension_numbers<[1], [0], [0], [1], [0, 0, 1, 1], [], []>} : vector<16x256xf32>, vector<256x256xf32>, vector<16x256xf32> -> vector<16x256xf32>
    %c1_97 = arith.constant 1 : index
    %c0_98 = arith.constant 0 : index
    %c0_99 = arith.constant 0 : index
    %92 = vector.load %arg10[%c1_97, %c0_98, %c0_99] : memref<3x16x32xf32, #tpu.memory_space<vmem>>, vector<1x16x32xf32>
    %93 = vector.shape_cast %92 : vector<1x16x32xf32> to vector<16x32xf32>
    %cst_100 = arith.constant dense<0.000000e+00> : vector<16x256xf32>
    %94 = tpu.matmul %93, %76, %cst_100 {dimension_numbers = #tpu.dot_dimension_numbers<[1], [0], [0], [1], [0, 0, 1, 1], [], []>} : vector<16x32xf32>, vector<32x256xf32>, vector<16x256xf32> -> vector<16x256xf32>
    %c1_101 = arith.constant 1 : index
    %c0_102 = arith.constant 0 : index
    %c0_103 = arith.constant 0 : index
    %95 = vector.load %arg11[%c1_101, %c0_102, %c0_103] : memref<3x256x256xf32, #tpu.memory_space<vmem>>, vector<1x256x256xf32>
    %96 = vector.shape_cast %95 : vector<1x256x256xf32> to vector<256x256xf32>
    %cst_104 = arith.constant dense<0.000000e+00> : vector<16x256xf32>
    %97 = tpu.matmul %94, %96, %cst_104 {dimension_numbers = #tpu.dot_dimension_numbers<[1], [0], [0], [1], [0, 0, 1, 1], [], []>} : vector<16x256xf32>, vector<256x256xf32>, vector<16x256xf32> -> vector<16x256xf32>
    %98 = arith.addf %91, %97 : vector<16x256xf32>
    %c2_105 = arith.constant 2 : index
    %c0_106 = arith.constant 0 : index
    %c0_107 = arith.constant 0 : index
    %99 = vector.load %arg10[%c2_105, %c0_106, %c0_107] : memref<3x16x32xf32, #tpu.memory_space<vmem>>, vector<1x16x32xf32>
    %100 = vector.shape_cast %99 : vector<1x16x32xf32> to vector<16x32xf32>
    %cst_108 = arith.constant dense<0.000000e+00> : vector<16x256xf32>
    %101 = tpu.matmul %100, %76, %cst_108 {dimension_numbers = #tpu.dot_dimension_numbers<[1], [0], [0], [1], [0, 0, 1, 1], [], []>} : vector<16x32xf32>, vector<32x256xf32>, vector<16x256xf32> -> vector<16x256xf32>
    %c2_109 = arith.constant 2 : index
    %c0_110 = arith.constant 0 : index
    %c0_111 = arith.constant 0 : index
    %102 = vector.load %arg11[%c2_109, %c0_110, %c0_111] : memref<3x256x256xf32, #tpu.memory_space<vmem>>, vector<1x256x256xf32>
    %103 = vector.shape_cast %102 : vector<1x256x256xf32> to vector<256x256xf32>
    %cst_112 = arith.constant dense<0.000000e+00> : vector<16x256xf32>
    %104 = tpu.matmul %101, %103, %cst_112 {dimension_numbers = #tpu.dot_dimension_numbers<[1], [0], [0], [1], [0, 0, 1, 1], [], []>} : vector<16x256xf32>, vector<256x256xf32>, vector<16x256xf32> -> vector<16x256xf32>
    %105 = arith.addf %98, %104 : vector<16x256xf32>
    %c0_113 = arith.constant 0 : index
    %c0_114 = arith.constant 0 : index
    %106 = vector.load %arg12[%c0_113, %c0_114] : memref<1x256xf32, #tpu.memory_space<vmem>>, vector<1x256xf32>
    %107 = vector.broadcast %106 : vector<1x256xf32> to vector<16x256xf32>
    %108 = arith.addf %105, %107 : vector<16x256xf32>
    %cst_115 = arith.constant 0.000000e+00 : f32
    %109 = vector.broadcast %cst_115 : f32 to vector<16x256xf32>
    %110 = arith.maximumf %108, %109 : vector<16x256xf32>
    %c0_116 = arith.constant 0 : index
    %c0_117 = arith.constant 0 : index
    %c0_118 = arith.constant 0 : index
    %111 = vector.load %arg16[%c0_116, %c0_117, %c0_118] : memref<3x16x16xf32, #tpu.memory_space<vmem>>, vector<1x16x16xf32>
    %112 = vector.shape_cast %111 : vector<1x16x16xf32> to vector<16x16xf32>
    %cst_119 = arith.constant dense<0.000000e+00> : vector<16x256xf32>
    %113 = tpu.matmul %112, %110, %cst_119 {dimension_numbers = #tpu.dot_dimension_numbers<[1], [0], [0], [1], [0, 0, 1, 1], [], []>} : vector<16x16xf32>, vector<16x256xf32>, vector<16x256xf32> -> vector<16x256xf32>
    %c0_120 = arith.constant 0 : index
    %c0_121 = arith.constant 0 : index
    %c0_122 = arith.constant 0 : index
    %114 = vector.load %arg17[%c0_120, %c0_121, %c0_122] : memref<3x256x256xf32, #tpu.memory_space<vmem>>, vector<1x256x256xf32>
    %115 = vector.shape_cast %114 : vector<1x256x256xf32> to vector<256x256xf32>
    %cst_123 = arith.constant dense<0.000000e+00> : vector<16x256xf32>
    %116 = tpu.matmul %113, %115, %cst_123 {dimension_numbers = #tpu.dot_dimension_numbers<[1], [0], [0], [1], [0, 0, 1, 1], [], []>} : vector<16x256xf32>, vector<256x256xf32>, vector<16x256xf32> -> vector<16x256xf32>
    %c1_124 = arith.constant 1 : index
    %c0_125 = arith.constant 0 : index
    %c0_126 = arith.constant 0 : index
    %117 = vector.load %arg16[%c1_124, %c0_125, %c0_126] : memref<3x16x16xf32, #tpu.memory_space<vmem>>, vector<1x16x16xf32>
    %118 = vector.shape_cast %117 : vector<1x16x16xf32> to vector<16x16xf32>
    %cst_127 = arith.constant dense<0.000000e+00> : vector<16x256xf32>
    %119 = tpu.matmul %118, %110, %cst_127 {dimension_numbers = #tpu.dot_dimension_numbers<[1], [0], [0], [1], [0, 0, 1, 1], [], []>} : vector<16x16xf32>, vector<16x256xf32>, vector<16x256xf32> -> vector<16x256xf32>
    %c1_128 = arith.constant 1 : index
    %c0_129 = arith.constant 0 : index
    %c0_130 = arith.constant 0 : index
    %120 = vector.load %arg17[%c1_128, %c0_129, %c0_130] : memref<3x256x256xf32, #tpu.memory_space<vmem>>, vector<1x256x256xf32>
    %121 = vector.shape_cast %120 : vector<1x256x256xf32> to vector<256x256xf32>
    %cst_131 = arith.constant dense<0.000000e+00> : vector<16x256xf32>
    %122 = tpu.matmul %119, %121, %cst_131 {dimension_numbers = #tpu.dot_dimension_numbers<[1], [0], [0], [1], [0, 0, 1, 1], [], []>} : vector<16x256xf32>, vector<256x256xf32>, vector<16x256xf32> -> vector<16x256xf32>
    %123 = arith.addf %116, %122 : vector<16x256xf32>
    %c2_132 = arith.constant 2 : index
    %c0_133 = arith.constant 0 : index
    %c0_134 = arith.constant 0 : index
    %124 = vector.load %arg16[%c2_132, %c0_133, %c0_134] : memref<3x16x16xf32, #tpu.memory_space<vmem>>, vector<1x16x16xf32>
    %125 = vector.shape_cast %124 : vector<1x16x16xf32> to vector<16x16xf32>
    %cst_135 = arith.constant dense<0.000000e+00> : vector<16x256xf32>
    %126 = tpu.matmul %125, %110, %cst_135 {dimension_numbers = #tpu.dot_dimension_numbers<[1], [0], [0], [1], [0, 0, 1, 1], [], []>} : vector<16x16xf32>, vector<16x256xf32>, vector<16x256xf32> -> vector<16x256xf32>
    %c2_136 = arith.constant 2 : index
    %c0_137 = arith.constant 0 : index
    %c0_138 = arith.constant 0 : index
    %127 = vector.load %arg17[%c2_136, %c0_137, %c0_138] : memref<3x256x256xf32, #tpu.memory_space<vmem>>, vector<1x256x256xf32>
    %128 = vector.shape_cast %127 : vector<1x256x256xf32> to vector<256x256xf32>
    %cst_139 = arith.constant dense<0.000000e+00> : vector<16x256xf32>
    %129 = tpu.matmul %126, %128, %cst_139 {dimension_numbers = #tpu.dot_dimension_numbers<[1], [0], [0], [1], [0, 0, 1, 1], [], []>} : vector<16x256xf32>, vector<256x256xf32>, vector<16x256xf32> -> vector<16x256xf32>
    %130 = arith.addf %123, %129 : vector<16x256xf32>
    %c0_140 = arith.constant 0 : index
    %c0_141 = arith.constant 0 : index
    %131 = vector.load %arg18[%c0_140, %c0_141] : memref<1x256xf32, #tpu.memory_space<vmem>>, vector<1x256xf32>
    %132 = vector.broadcast %131 : vector<1x256xf32> to vector<16x256xf32>
    %133 = arith.addf %130, %132 : vector<16x256xf32>
    %134 = arith.addf %133, %85 : vector<16x256xf32>
    %cst_142 = arith.constant 0.000000e+00 : f32
    %135 = vector.broadcast %cst_142 : f32 to vector<16x256xf32>
    %136 = arith.maximumf %134, %135 : vector<16x256xf32>
    %c0_143 = arith.constant 0 : index
    %c0_144 = arith.constant 0 : index
    %137 = vector.load %arg19[%c0_143, %c0_144] : memref<2x16xf32, #tpu.memory_space<vmem>>, vector<2x16xf32>
    %cst_145 = arith.constant dense<0.000000e+00> : vector<2x256xf32>
    %138 = tpu.matmul %137, %136, %cst_145 {dimension_numbers = #tpu.dot_dimension_numbers<[1], [0], [0], [1], [0, 0, 1, 1], [], []>} : vector<2x16xf32>, vector<16x256xf32>, vector<2x256xf32> -> vector<2x256xf32>
    %c0_146 = arith.constant 0 : index
    %c0_147 = arith.constant 0 : index
    %139 = vector.load %arg20[%c0_146, %c0_147] : memref<256x10xf32, #tpu.memory_space<vmem>>, vector<256x10xf32>
    %cst_148 = arith.constant dense<0.000000e+00> : vector<2x10xf32>
    %140 = tpu.matmul %138, %139, %cst_148 {dimension_numbers = #tpu.dot_dimension_numbers<[1], [0], [0], [1], [0, 0, 1, 1], [], []>} : vector<2x256xf32>, vector<256x10xf32>, vector<2x10xf32> -> vector<2x10xf32>
    %c0_149 = arith.constant 0 : index
    %c0_150 = arith.constant 0 : index
    %141 = vector.load %arg21[%c0_149, %c0_150] : memref<1x10xf32, #tpu.memory_space<vmem>>, vector<1x10xf32>
    %142 = vector.broadcast %141 : vector<1x10xf32> to vector<2x10xf32>
    %143 = arith.addf %140, %142 : vector<2x10xf32>
    %c0_151 = arith.constant 0 : index
    %c0_152 = arith.constant 0 : index
    %144 = vector.load %arg22[%c0_151, %c0_152] : memref<2x10xf32, #tpu.memory_space<vmem>>, vector<2x10xf32>
    tpu.vector_store %arg22[%c0_151, %c0_152], %143 {strides = array<i32>} : memref<2x10xf32, #tpu.memory_space<vmem>>, vector<2x10xf32>,
    return
  }
}

</mosaic_0001>

<bundles_post_ra>
// kernel: model_forward.1
= control target key start
LH: loop header
LB: loop body
LE: loop exit
PB: predicated region body
PF: predicated region fallthrough
CT: control target
= control target key end

     0   :  { %s7089_s0 = inlined_call_operand.vmem [shape: f32[32,48], index: 0, kind: input, shape index: {}]   ;;  %s7090_s1 = inlined_call_operand.vmem [shape: f32[3,32,32], index: 1, kind: input, shape index: {}]   ;;  %s7091_s2 = inlined_call_operand.hbm [shape: f32[3,48,256], index: 2, kind: input, shape index: {}]   ;;  %s7092_s3 = inlined_call_operand.vmem [shape: f32[1,256], index: 3, kind: input, shape index: {}]   ;;  %s7093_s4 = inlined_call_operand.vmem [shape: f32[3,32,32], index: 4, kind: input, shape index: {}]   ;;  %s7094_s5 = inlined_call_operand.hbm [shape: f32[3,256,256], index: 5, kind: input, shape index: {}]   ;;  %s7095_s6 = inlined_call_operand.vmem [shape: f32[1,256], index: 6, kind: input, shape index: {}]   ;;  %s7096_s7 = inlined_call_operand.hbm [shape: f32[3,32,32], index: 7, kind: input, shape index: {}]   ;;  %s7097_s8 = inlined_call_operand.hbm [shape: f32[3,256,256], index: 8, kind: input, shape index: {}]   ;;  %s7098_s9 = inlined_call_operand.hbm [shape: f32[1,256], index: 9, kind: input, shape index: {}]   ;;  %s7099_s10 = inlined_call_operand.vmem [shape: f32[3,16,32], index: 10, kind: input, shape index: {}]   ;;  %s7100_s11 = inlined_call_operand.hbm [shape: f32[3,256,256], index: 11, kind: input, shape index: {}]   ;;  %s7101_s12 = inlined_call_operand.hbm [shape: f32[1,256], index: 12, kind: input, shape index: {}]   ;;  %s7102_s13 = inlined_call_operand.vmem [shape: f32[1,16,32], index: 13, kind: input, shape index: {}]   ;;  %s7103_s14 = inlined_call_operand.vmem [shape: f32[1,256,256], index: 14, kind: input, shape index: {}]   ;;  %s7104_s15 = inlined_call_operand.hbm [shape: f32[1,256], index: 15, kind: input, shape index: {}]   ;;  %s7105_s16 = inlined_call_operand.hbm [shape: f32[3,16,16], index: 16, kind: input, shape index: {}]   ;;  %s7106_s17 = inlined_call_operand.hbm [shape: f32[3,256,256], index: 17, kind: input, shape index: {}]   ;;  %s7107_s18 = inlined_call_operand.hbm [shape: f32[1,256], index: 18, kind: input, shape index: {}]   ;;  %s7108_s19 = inlined_call_operand.hbm [shape: f32[2,16], index: 19, kind: input, shape index: {}]   ;;  %s7109_s20 = inlined_call_operand.vmem [shape: f32[256,10], index: 20, kind: input, shape index: {}]   ;;  %s7110_s21 = inlined_call_operand.hbm [shape: f32[1,10], index: 21, kind: input, shape index: {}]   ;;  %s7111_s22 = inlined_call_operand.hbm [shape: f32[2,10], index: 22, kind: output, shape index: {}]  }
   0x1   :  { %7118 = sst [smem:[#allocation32_spill]] %s7089_s0 }
   0x2   :  { %7119 = sst [smem:[#allocation33_spill]] %s7090_s1 }
   0x3   :  { %7120 = sst [smem:[#allocation34_spill]] %s7091_s2 }
   0x4   :  { %7121 = sst [smem:[#allocation35_spill]] %s7092_s3 }
   0x5   :  { %7122 = sst [smem:[#allocation36_spill]] %s7093_s4 }
   0x6   :  { %7123 = sst [smem:[#allocation37_spill]] %s7094_s5 }
   0x7   :  { %7124 = sst [smem:[#allocation38_spill]] %s7095_s6 }
   0x8   :  { %7125 = sst [smem:[#allocation39_spill]] %s7111_s22 }
   0x9   :  { %27 = vsyncpa [#allocation3], 0 }
   0xa   :  { %28 = vsyncpa [#allocation6], 0 }
   0xb   :  { %29 = vsyncpa [#allocation9], 0 }
   0xc   :  { %30 = vsyncpa [#allocation12], 0 }
   0xd   :  { %31 = vsyncpa [#allocation15], 0 }
   0xe   :  { %32 = vsyncpa [#allocation18], 0 }
   0xf   :  { %33 = vsyncpa [#allocation21], 0 }
  0x10   :  { %34 = vsyncpa [#allocation4], 0  ;;  %s6046_s3 = smov [#allocation5]   ;;  %s6047_s29 = smov [#allocation8]  }
  0x11   :  { %s60_s28 = sshll.u32 %s6046_s3, 4  ;;  %s86_s30 = sshll.u32 %s6047_s29, 4  ;;  %s61_s28 = int_to_ptr.vmem [resolvable:$true] %s60_s28  ;;  %s6180_s30 = int_to_ptr.vmem [resolvable:$true] %s86_s30 }
  0x12   :  { %s7126_s23 = sld [smem:[#allocation37_spill]] }
  0x18   :  { %s5722_s1 = scalar_lea.hbm %s7126_s23, 24576 }
  0x19   :  { %p5723_p0 = scmp.ne.s32.totalorder %s7126_s23, %s5722_s1  ;;  %p5726_p1 = scmp.lt.u32.totalorder %s5722_s1, %s7126_s23 }
  0x1b   :  { %p5728_p2 = pnand %p5726_p1, %p5723_p0 }
  0x1d   :  { %5731 = shalt.err (!%p5728_p2)
}
  0x1e   :  { %s5732_s26 = scalar_lea.vmem %s61_s28, 24576  ;;  %p5737_p4 = scmp.lt.s32.totalorder %s61_s28, %s61_s28 }
  0x1f   :  { %p5733_p3 = scmp.ne.s32.totalorder %s61_s28, %s5732_s26  ;;  %p5738_p5 = scmp.lt.s32.totalorder %s5732_s26, %s5732_s26 }
  0x21   :  { %p5739_p6 = por %p5738_p5, %p5737_p4 }
  0x23   :  { %p5740_p7 = pnand %p5739_p6, %p5733_p3 }
  0x25   :  { %5743 = shalt.err (!%p5740_p7)
}
  0x26   :  { %s6048_s2 = smov 256   ;;  %s6049_s27 = smov 16  }
  0x27   :  { %66 = dma.hbm_to_vmem [thread:$0]  %s7126_s23, 24576, %s61_s28, [#allocation6], %s6048_s2, %s6048_s2, %s6049_s27  }
  0x28   :  { %s5744_s1 = scalar_lea.hbm %s7097_s8, 24576 }
  0x29   :  { %p5745_p8 = scmp.ne.s32.totalorder %s7097_s8, %s5744_s1  ;;  %p5748_p9 = scmp.lt.u32.totalorder %s5744_s1, %s7097_s8 }
  0x2b   :  { %p5750_p10 = pnand %p5748_p9, %p5745_p8 }
  0x2d   :  { %5753 = shalt.err (!%p5750_p10)
}
  0x2e   :  { %s5754_s26 = scalar_lea.vmem %s6180_s30, 24576  ;;  %p5759_p12 = scmp.lt.s32.totalorder %s6180_s30, %s6180_s30 }
  0x2f   :  { %p5755_p11 = scmp.ne.s32.totalorder %s6180_s30, %s5754_s26  ;;  %p5760_p13 = scmp.lt.s32.totalorder %s5754_s26, %s5754_s26 }
  0x31   :  { %p5761_p0 = por %p5760_p13, %p5759_p12 }
  0x33   :  { %p5762_p1 = pnand %p5761_p0, %p5755_p11 }
  0x35   :  { %5765 = shalt.err (!%p5762_p1)
}
  0x36   :  { %92 = dma.hbm_to_vmem [thread:$0]  %s7097_s8, 24576, %s6180_s30, [#allocation9], %s6048_s2, %s6048_s2, %s6049_s27  }
  0x37   :  { %s6050_s3 = smov [#allocation11]   ;;  %s6051_s4 = smov [#allocation14]  }
  0x38   :  { %s110_s29 = sshll.u32 %s6050_s3, 4  ;;  %s137_s0 = sshll.u32 %s6051_s4, 4  ;;  %s111_s29 = int_to_ptr.vmem [resolvable:$true] %s110_s29  ;;  %s138_s0 = int_to_ptr.vmem [resolvable:$true] %s137_s0 }
  0x39   :  { %s5766_s24 = scalar_lea.hbm %s7100_s11, 24576 }
  0x3a   :  { %p5767_p2 = scmp.ne.s32.totalorder %s7100_s11, %s5766_s24  ;;  %p5770_p3 = scmp.lt.u32.totalorder %s5766_s24, %s7100_s11 }
  0x3c   :  { %p5772_p4 = pnand %p5770_p3, %p5767_p2 }
  0x3e   :  { %5775 = shalt.err (!%p5772_p4)
}
  0x3f   :  { %s5776_s8 = scalar_lea.vmem %s111_s29, 24576  ;;  %p5781_p6 = scmp.lt.s32.totalorder %s111_s29, %s111_s29 }
  0x40   :  { %p5777_p5 = scmp.ne.s32.totalorder %s111_s29, %s5776_s8  ;;  %p5782_p7 = scmp.lt.s32.totalorder %s5776_s8, %s5776_s8 }
  0x42   :  { %p5783_p8 = por %p5782_p7, %p5781_p6 }
  0x44   :  { %p5784_p9 = pnand %p5783_p8, %p5777_p5 }
  0x46   :  { %5787 = shalt.err (!%p5784_p9)
}
  0x47   :  { %116 = dma.hbm_to_vmem [thread:$0]  %s7100_s11, 24576, %s111_s29, [#allocation12], %s6048_s2, %s6048_s2, %s6049_s27  }
  0x48   :  { %s5788_s22 = scalar_lea.hbm %s7104_s15, 32 }
  0x49   :  { %p5789_p10 = scmp.ne.s32.totalorder %s7104_s15, %s5788_s22  ;;  %p5792_p11 = scmp.lt.u32.totalorder %s5788_s22, %s7104_s15 }
  0x4b   :  { %p5794_p12 = pnand %p5792_p11, %p5789_p10 }
  0x4d   :  { %5797 = shalt.err (!%p5794_p12)
}
  0x4e   :  { %s5798_s6 = scalar_lea.vmem %s138_s0, 32  ;;  %p5803_p0 = scmp.lt.s32.totalorder %s138_s0, %s138_s0 }
  0x4f   :  { %p5799_p13 = scmp.ne.s32.totalorder %s138_s0, %s5798_s6  ;;  %p5804_p1 = scmp.lt.s32.totalorder %s5798_s6, %s5798_s6 }
  0x51   :  { %p5805_p2 = por %p5804_p1, %p5803_p0 }
  0x53   :  { %p5806_p3 = pnand %p5805_p2, %p5799_p13 }
  0x55   :  { %5809 = shalt.err (!%p5806_p3)
}
  0x56   :  { %140 = dma.hbm_to_vmem [thread:$0]  %s7104_s15, 32, %s138_s0, [#allocation15]  }
  0x57   :  { %s6052_s25 = smov [#allocation17]   ;;  %s6053_s8 = smov [#allocation20]  }
  0x58   :  { %s158_s26 = sshll.u32 %s6052_s25, 4  ;;  %s181_s30 = sshll.u32 %s6053_s8, 4  ;;  %s159_s26 = int_to_ptr.vmem [resolvable:$true] %s158_s26  ;;  %s182_s30 = int_to_ptr.vmem [resolvable:$true] %s181_s30 }
  0x59   :  { %s5810_s3 = scalar_lea.hbm %s7106_s17, 24576 }
  0x5a   :  { %p5811_p4 = scmp.ne.s32.totalorder %s7106_s17, %s5810_s3  ;;  %p5814_p5 = scmp.lt.u32.totalorder %s5810_s3, %s7106_s17 }
  0x5c   :  { %p5816_p6 = pnand %p5814_p5, %p5811_p4 }
  0x5e   :  { %5819 = shalt.err (!%p5816_p6)
}
  0x5f   :  { %s5820_s15 = scalar_lea.vmem %s159_s26, 24576  ;;  %p5825_p8 = scmp.lt.s32.totalorder %s159_s26, %s159_s26 }
  0x60   :  { %p5821_p7 = scmp.ne.s32.totalorder %s159_s26, %s5820_s15  ;;  %p5826_p9 = scmp.lt.s32.totalorder %s5820_s15, %s5820_s15 }
  0x62   :  { %p5827_p10 = por %p5826_p9, %p5825_p8 }
  0x64   :  { %p5828_p11 = pnand %p5827_p10, %p5821_p7 }
  0x66   :  { %5831 = shalt.err (!%p5828_p11)
}
  0x67   :  { %164 = dma.hbm_to_vmem [thread:$0]  %s7106_s17, 24576, %s159_s26, [#allocation18], %s6048_s2, %s6048_s2, %s6049_s27  }
  0x68   :  { %s5832_s29 = scalar_lea.hbm %s7108_s19, 32 }
  0x69   :  { %p5833_p12 = scmp.ne.s32.totalorder %s7108_s19, %s5832_s29  ;;  %p5836_p13 = scmp.lt.u32.totalorder %s5832_s29, %s7108_s19 }
  0x6b   :  { %p5838_p0 = pnand %p5836_p13, %p5833_p12 }
  0x6d   :  { %5841 = shalt.err (!%p5838_p0)
}
  0x6e   :  { %s5842_s3 = scalar_lea.vmem %s182_s30, 32  ;;  %p5847_p2 = scmp.lt.s32.totalorder %s182_s30, %s182_s30 }
  0x6f   :  { %p5843_p1 = scmp.ne.s32.totalorder %s182_s30, %s5842_s3  ;;  %p5848_p3 = scmp.lt.s32.totalorder %s5842_s3, %s5842_s3 }
  0x71   :  { %p5849_p4 = por %p5848_p3, %p5847_p2 }
  0x73   :  { %p5850_p5 = pnand %p5849_p4, %p5843_p1 }
  0x75   :  { %5853 = shalt.err (!%p5850_p5)
}
  0x76   :  { %184 = dma.hbm_to_vmem [thread:$0]  %s7108_s19, 32, %s182_s30, [#allocation21]  }
  0x77   :  { %s6054_s22 = smov [#allocation2]   ;;  %s6055_s1 = smov [#allocation7]  }
  0x78   :  { %s44_s4 = sshll.u32 %s6054_s22, 4  ;;  %s74_s5 = sshll.u32 %s6055_s1, 4  ;;  %s45_s4 = int_to_ptr.vmem [resolvable:$true] %s44_s4  ;;  %s6271_s5 = int_to_ptr.vmem [resolvable:$true] %s74_s5 }
  0x79   :  { %s7127_s24 = sld [smem:[#allocation34_spill]] }
  0x7f   :  { %s5854_s6 = scalar_lea.hbm %s7127_s24, 4608 }
  0x80   :  { %p5855_p6 = scmp.ne.s32.totalorder %s7127_s24, %s5854_s6  ;;  %p5858_p7 = scmp.lt.u32.totalorder %s5854_s6, %s7127_s24 }
  0x82   :  { %p5860_p8 = pnand %p5858_p7, %p5855_p6 }
  0x84   :  { %5863 = shalt.err (!%p5860_p8)
}
  0x85   :  { %s5864_s19 = scalar_lea.vmem %s45_s4, 4608  ;;  %p5869_p10 = scmp.lt.s32.totalorder %s45_s4, %s45_s4 }
  0x86   :  { %p5865_p9 = scmp.ne.s32.totalorder %s45_s4, %s5864_s19  ;;  %p5870_p11 = scmp.lt.s32.totalorder %s5864_s19, %s5864_s19 }
  0x88   :  { %p5871_p12 = por %p5870_p11, %p5869_p10 }
  0x8a   :  { %p5872_p13 = pnand %p5871_p12, %p5865_p9 }
  0x8c   :  { %5875 = shalt.err (!%p5872_p13)
}
  0x8d   :  { %50 = dma.hbm_to_vmem [thread:$0]  %s7127_s24, 4608, %s45_s4, [#allocation3], %s6048_s2, %s6048_s2, %s6049_s27  }
  0x8e   :  { %s5876_s17 = scalar_lea.hbm %s7096_s7, 1536 }
  0x8f   :  { %p5877_p0 = scmp.ne.s32.totalorder %s7096_s7, %s5876_s17  ;;  %p5880_p1 = scmp.lt.u32.totalorder %s5876_s17, %s7096_s7 }
  0x91   :  { %p5882_p2 = pnand %p5880_p1, %p5877_p0 }
  0x93   :  { %5885 = shalt.err (!%p5882_p2)
}
  0x94   :  { %s5886_s0 = scalar_lea.vmem %s6271_s5, 1536  ;;  %p5891_p4 = scmp.lt.s32.totalorder %s6271_s5, %s6271_s5 }
  0x95   :  { %p5887_p3 = scmp.ne.s32.totalorder %s6271_s5, %s5886_s0  ;;  %p5892_p5 = scmp.lt.s32.totalorder %s5886_s0, %s5886_s0 }
  0x97   :  { %p5893_p6 = por %p5892_p5, %p5891_p4 }
  0x99   :  { %p5894_p7 = pnand %p5893_p6, %p5887_p3 }
  0x9b   :  { %5897 = shalt.err (!%p5894_p7)
}
  0x9c   :  { %s6056_s2 = smov 128   ;;  %s6057_s27 = smov 8  }
  0x9d   :  { %80 = dma.hbm_to_vmem [thread:$0]  %s7096_s7, 1536, %s6271_s5, [#allocation6], %s6056_s2, %s6056_s2, %s6057_s27  }
  0x9e   :  { %s6058_s6 = smov [#allocation10]   ;;  %s6059_s29 = smov [#allocation13]  }
  0x9f   :  { %s99_s11 = sshll.u32 %s6058_s6, 4  ;;  %s123_s25 = sshll.u32 %s6059_s29, 4  ;;  %s100_s11 = int_to_ptr.vmem [resolvable:$true] %s99_s11  ;;  %s124_s25 = int_to_ptr.vmem [resolvable:$true] %s123_s25 }
  0xa0   :  { %s5898_s30 = scalar_lea.hbm %s7098_s9, 32 }
  0xa1   :  { %p5899_p8 = scmp.ne.s32.totalorder %s7098_s9, %s5898_s30  ;;  %p5902_p9 = scmp.lt.u32.totalorder %s5898_s30, %s7098_s9 }
  0xa3   :  { %p5904_p10 = pnand %p5902_p9, %p5899_p8 }
  0xa5   :  { %5907 = shalt.err (!%p5904_p10)
}
  0xa6   :  { %s5908_s7 = scalar_lea.vmem %s100_s11, 32  ;;  %p5913_p12 = scmp.lt.s32.totalorder %s100_s11, %s100_s11 }
  0xa7   :  { %p5909_p11 = scmp.ne.s32.totalorder %s100_s11, %s5908_s7  ;;  %p5914_p13 = scmp.lt.s32.totalorder %s5908_s7, %s5908_s7 }
  0xa9   :  { %p5915_p0 = por %p5914_p13, %p5913_p12 }
  0xab   :  { %p5916_p1 = pnand %p5915_p0, %p5909_p11 }
  0xad   :  { %5919 = shalt.err (!%p5916_p1)
}
  0xae   :  { %102 = dma.hbm_to_vmem [thread:$0]  %s7098_s9, 32, %s100_s11, [#allocation9]  }
  0xaf   :  { %s5920_s15 = scalar_lea.hbm %s7101_s12, 32 }
  0xb0   :  { %p5921_p2 = scmp.ne.s32.totalorder %s7101_s12, %s5920_s15  ;;  %p5924_p3 = scmp.lt.u32.totalorder %s5920_s15, %s7101_s12 }
  0xb2   :  { %p5926_p4 = pnand %p5924_p3, %p5921_p2 }
  0xb4   :  { %5929 = shalt.err (!%p5926_p4)
}
  0xb5   :  { %s5930_s29 = scalar_lea.vmem %s124_s25, 32  ;;  %p5935_p6 = scmp.lt.s32.totalorder %s124_s25, %s124_s25 }
  0xb6   :  { %p5931_p5 = scmp.ne.s32.totalorder %s124_s25, %s5930_s29  ;;  %p5936_p7 = scmp.lt.s32.totalorder %s5930_s29, %s5930_s29 }
  0xb8   :  { %p5937_p8 = por %p5936_p7, %p5935_p6 }
  0xba   :  { %p5938_p9 = pnand %p5937_p8, %p5931_p5 }
  0xbc   :  { %5941 = shalt.err (!%p5938_p9)
}
  0xbd   :  { %126 = dma.hbm_to_vmem [thread:$0]  %s7101_s12, 32, %s124_s25, [#allocation12]  }
  0xbe   :  { %s6060_s8 = smov [#allocation16]   ;;  %s6061_s30 = smov [#allocation19]  }
  0xbf   :  { %s146_s19 = sshll.u32 %s6060_s8, 4  ;;  %s171_s28 = sshll.u32 %s6061_s30, 4  ;;  %s147_s19 = int_to_ptr.vmem [resolvable:$true] %s146_s19  ;;  %s172_s28 = int_to_ptr.vmem [resolvable:$true] %s171_s28 }
  0xc0   :  { %s5942_s17 = scalar_lea.hbm %s7105_s16, 768 }
  0xc1   :  { %p5943_p10 = scmp.ne.s32.totalorder %s7105_s16, %s5942_s17  ;;  %p5946_p11 = scmp.lt.u32.totalorder %s5942_s17, %s7105_s16 }
  0xc3   :  { %p5948_p12 = pnand %p5946_p11, %p5943_p10 }
  0xc5   :  { %5951 = shalt.err (!%p5948_p12)
}
  0xc6   :  { %s5952_s12 = scalar_lea.vmem %s147_s19, 768  ;;  %p5957_p0 = scmp.lt.s32.totalorder %s147_s19, %s147_s19 }
  0xc7   :  { %p5953_p13 = scmp.ne.s32.totalorder %s147_s19, %s5952_s12  ;;  %p5958_p1 = scmp.lt.s32.totalorder %s5952_s12, %s5952_s12 }
  0xc9   :  { %p5959_p2 = por %p5958_p1, %p5957_p0 }
  0xcb   :  { %p5960_p3 = pnand %p5959_p2, %p5953_p13 }
  0xcd   :  { %5963 = shalt.err (!%p5960_p3)
}
  0xce   :  { %152 = dma.hbm_to_vmem [thread:$0]  %s7105_s16, 768, %s147_s19, [#allocation15], %s6056_s2, %s6056_s2, %s6057_s27  }
  0xcf   :  { %s5964_s4 = scalar_lea.hbm %s7107_s18, 32 }
  0xd0   :  { %p5965_p4 = scmp.ne.s32.totalorder %s7107_s18, %s5964_s4  ;;  %p5968_p5 = scmp.lt.u32.totalorder %s5964_s4, %s7107_s18 }
  0xd2   :  { %p5970_p6 = pnand %p5968_p5, %p5965_p4 }
  0xd4   :  { %5973 = shalt.err (!%p5970_p6)
}
  0xd5   :  { %s5974_s11 = scalar_lea.vmem %s172_s28, 32  ;;  %p5979_p8 = scmp.lt.s32.totalorder %s172_s28, %s172_s28 }
  0xd6   :  { %p5975_p7 = scmp.ne.s32.totalorder %s172_s28, %s5974_s11  ;;  %p5980_p9 = scmp.lt.s32.totalorder %s5974_s11, %s5974_s11 }
  0xd8   :  { %p5981_p10 = por %p5980_p9, %p5979_p8 }
  0xda   :  { %p5982_p11 = pnand %p5981_p10, %p5975_p7 }
  0xdc   :  { %5985 = shalt.err (!%p5982_p11)
}
  0xdd   :  { %174 = dma.hbm_to_vmem [thread:$0]  %s7107_s18, 32, %s172_s28, [#allocation18]  }
  0xde   :  { %s6062_s27 = smov [#allocation22]   ;;  %s5986_s23 = scalar_lea.hbm %s7110_s21, 16 }
  0xdf   :  { %s193_s8 = sshll.u32 %s6062_s27, 4  ;;  %p5987_p12 = scmp.ne.s32.totalorder %s7110_s21, %s5986_s23  ;;  %s194_s8 = int_to_ptr.vmem [resolvable:$true] %s193_s8 }
  0xe0   :  { %p5990_p13 = scmp.lt.u32.totalorder %s5986_s23, %s7110_s21 }
  0xe2   :  { %p5992_p0 = pnand %p5990_p13, %p5987_p12 }
  0xe4   :  { %5995 = shalt.err (!%p5992_p0)
}
  0xe5   :  { %s5996_s26 = scalar_lea.vmem %s194_s8, 16  ;;  %s6000_s18 = scalar_lea.vmem %s194_s8, 32 }
  0xe6   :  { %p5997_p1 = scmp.ne.s32.totalorder %s194_s8, %s5996_s26  ;;  %p6001_p2 = scmp.lt.s32.totalorder %s194_s8, %s194_s8 }
  0xe7   :  { %p6002_p3 = scmp.lt.s32.totalorder %s6000_s18, %s5996_s26 }
  0xe9   :  { %p6003_p4 = por %p6002_p3, %p6001_p2 }
  0xeb   :  { %p6004_p5 = pnand %p6003_p4, %p5997_p1 }
  0xed   :  { %6007 = shalt.err (!%p6004_p5)
}
  0xee   :  { %196 = dma.hbm_to_vmem [thread:$0]  %s7110_s21, 16, %s194_s8, [#allocation21]  }
  0xef   :  { %6030 = dma.done.wait [#allocation3], 4608  }
  0xf0   :  { %6031 = vsyncadd [#allocation3], 4294962688 }
  0xf1   :  { %6032 = dma.done.wait [#allocation6], 26112  }
  0xf2   :  { %6033 = vsyncadd [#allocation6], 4294941184 }
  0xf3   :  { %6034 = dma.done.wait [#allocation9], 24608  }
  0xf4   :  { %6035 = vsyncadd [#allocation9], 4294942688 }
  0xf5   :  { %6036 = dma.done.wait [#allocation12], 24608  }
  0xf6   :  { %6037 = vsyncadd [#allocation12], 4294942688 }
  0xf7   :  { %6038 = dma.done.wait [#allocation15], 800  }
  0xf8   :  { %6039 = vsyncadd [#allocation15], 4294966496 }
  0xf9   :  { %6040 = dma.done.wait [#allocation18], 24608  }
  0xfa   :  { %6041 = vsyncadd [#allocation18], 4294942688 }
  0xfb   :  { %6042 = dma.done.wait [#allocation21], 48  }
  0xfc   :  { %6043 = vsyncadd [#allocation21], 4294967248  ;;  %vm244_vm0 = vcmask 261120   ;;  %s7128_s1 = sld [smem:[#allocation32_spill]]  ;;  %s7129_s11 = sld [smem:[#allocation33_spill]]  ;;  %v458_v8 = vld [vmem:[#allocation2 + $0x68] sm:$0xff] }
  0xfd   :  { %v460_v9 = vld [vmem:[#allocation2 + $0x78] sm:$0xff]  ;;  %v457_v11 = vld [vmem:[#allocation2 + $0x60] sm:$0xff]  ;;  %v459_v12 = vld [vmem:[#allocation2 + $0x70] sm:$0xff]  ;;  %v6063_v36 = vmov 0.0   ;;  %vm469_vm1 = vcmask 392192   ;;  %s7130_s29 = sld [smem:[#allocation35_spill]] }
  0xfe   :  { %v4623_v10 = vpack.c.bf16 %v460_v9, %v458_v8  ;;  %v462_v13 = vld [vmem:[#allocation2 + $0x88] sm:$0xff]  ;;  %v464_v14 = vld [vmem:[#allocation2 + $0x98] sm:$0xff]  ;;  %v4625_v19 = vpack.c.bf16 %v459_v12, %v457_v11  ;;  %v461_v21 = vld [vmem:[#allocation2 + $0x80] sm:$0xff]  ;;  %s7131_s16 = sld [smem:[#allocation36_spill]]  ;;  %s7132_s9 = sld [smem:[#allocation38_spill]]  ;;  %vm3506_vm2 = vcmask 130048  }
  0xff   :  { %v4627_v20 = vpack.c.bf16 %v464_v14, %v462_v13  ;;  %v463_v22 = vld [vmem:[#allocation2 + $0x90] sm:$0xff]  ;;  %v466_v23 = vld [vmem:[#allocation2 + $0xa8] sm:$0xff]  ;;  %v468_v24 = vld [vmem:[#allocation2 + $0xb8] sm:$0xff]  ;;  %s6064_s7 = smov [#allocation23]   ;;  %vm4399_vm3 = vcmask 74752  }
 0x100   :  { %v4629_v28 = vpack.c.bf16 %v463_v22, %v461_v21  ;;  %v4631_v29 = vpack.c.bf16 %v468_v24, %v466_v23  ;;  %v465_v30 = vld [vmem:[#allocation2 + $0xa0] sm:$0xff]  ;;  %v467_v31 = vld [vmem:[#allocation2 + $0xb0] sm:$0xff]  ;;  %v343_v37 = vld [vmem:[#allocation2 + $0x8] sm:$0xff]  ;;  %v898_v21 = vlaneseq  ;;  %s4407_s5 = sshll.u32 %s6064_s7, 4  ;;  %s4408_s5 = int_to_ptr.vmem [resolvable:$true] %s4407_s5 }
 0x101   :  { %v4633_v33 = vpack.c.bf16 %v467_v31, %v465_v30  ;;  %v345_v38 = vld [vmem:[#allocation2 + $0x18] sm:$0xff]  ;;  %v342_v40 = vld [vmem:[#allocation2] sm:$0xff]  ;;  %v344_v41 = vld [vmem:[#allocation2 + $0x10] sm:$0xff]  ;;  %s6008_s26 = scalar_lea.vmem %s4408_s5, 32  ;;  %p6013_p7 = scmp.lt.s32.totalorder %s4408_s5, %s4408_s5 }
 0x102   :  { %v236_v0 = vld [vmem:[%s7128_s1] sm:$0xff]  ;;  %v237_v1 = vld [vmem:[%s7128_s1 + $0x8] sm:$0xff]  ;;  %v238_v2 = vld [vmem:[%s7128_s1 + $0x10] sm:$0xff]  ;;  %v4635_v39 = vpack.c.bf16 %v345_v38, %v343_v37  ;;  %v4637_v44 = vpack.c.bf16 %v344_v41, %v342_v40  ;;  %v899_v22 = vshrl.u32 %v898_v21, 7  ;;  %p6009_p6 = scmp.ne.s32.totalorder %s4408_s5, %s6008_s26  ;;  %p6014_p8 = scmp.lt.s32.totalorder %s6008_s26, %s6008_s26 }
 0x103   :  { %v4607_v3 = vpack.c.bf16 %v237_v1, %v236_v0  ;;  %v239_v4 = vld [vmem:[%s7128_s1 + $0x18] sm:$0xff]  ;;  %v4426_v5 = vld [vmem:[%s7129_s11 + $0x20] sm:$0xff]  ;;  %v4427_v15 = vld [vmem:[%s7129_s11 + $0x28] sm:$0xff] }
 0x104   :  { %v4611_v6 = vpack.c.bf16 %v239_v4, %v238_v2  ;;  %4587 = vmatprep.mubr.msk.f32.mxu1 %vm244_vm0, %v4426_v5  ;;  %v240_v7 = vld [vmem:[%s7129_s11] sm:$0xff]  ;;  %v241_v16 = vld [vmem:[%s7129_s11 + $0x8] sm:$0xff]  ;;  %v4428_v17 = vld [vmem:[%s7129_s11 + $0x30] sm:$0xff]  ;;  %v6457_v23 = vsub.s32 1, %v899_v22  ;;  %p6015_p9 = por %p6014_p8, %p6013_p7 }
 0x105   :  { %4616 = vmatprep.subr.bf16.mxu1 %v4607_v3  ;;  %4608 = vmatprep.subr.bf16.mxu0 %v4607_v3  ;;  %v242_v18 = vld [vmem:[%s7129_s11 + $0x10] sm:$0xff]  ;;  %v4429_v25 = vld [vmem:[%s7129_s11 + $0x38] sm:$0xff]  ;;  %v4442_v27 = vld [vmem:[%s7129_s11 + $0x40] sm:$0xff] }
 0x106   :  { %4618 = vmatpush3.bf16.msra.mxu1 %v4607_v3  ;;  %4610 = vmatpush3.bf16.msra.mxu0 %v4607_v3  ;;  %v243_v26 = vld [vmem:[%s7129_s11 + $0x18] sm:$0xff]  ;;  %v4443_v32 = vld [vmem:[%s7129_s11 + $0x48] sm:$0xff]  ;;  %v4444_v34 = vld [vmem:[%s7129_s11 + $0x50] sm:$0xff]  ;;  %p6016_p10 = pnand %p6015_p9, %p6009_p6 }
 0x107   :  { %4620 = vmatprep.subr.bf16.mxu1 %v4611_v6  ;;  %4612 = vmatprep.subr.bf16.mxu0 %v4611_v6  ;;  %v4445_v35 = vld [vmem:[%s7129_s11 + $0x58] sm:$0xff]  ;;  %v347_v42 = vld [vmem:[#allocation2 + $0x28] sm:$0xff]  ;;  %v346_v47 = vld [vmem:[#allocation2 + $0x20] sm:$0xff] }
 0x108   :  { %4573 = vmatprep.mubr.msk.f32.mxu0 %vm244_vm0, %v240_v7  ;;  %v349_v43 = vld [vmem:[#allocation2 + $0x38] sm:$0xff]  ;;  %v348_v48 = vld [vmem:[#allocation2 + $0x30] sm:$0xff]  ;;  %v351_v51 = vld [vmem:[#allocation2 + $0x48] sm:$0xff] }
 0x109   :  { %v4639_v46 = vpack.c.bf16 %v349_v43, %v347_v42  ;;  %v353_v52 = vld [vmem:[#allocation2 + $0x58] sm:$0xff]  ;;  %v4641_v54 = vpack.c.bf16 %v348_v48, %v346_v47  ;;  %v350_v57 = vld [vmem:[#allocation2 + $0x40] sm:$0xff]  ;;  %v352_v58 = vld [vmem:[#allocation2 + $0x50] sm:$0xff] }
 0x10a   :  { %4622 = vmatpush3.bf16.msra.mxu1 %v4611_v6  ;;  %4614 = vmatpush3.bf16.msra.mxu0 %v4611_v6  ;;  %v4643_v56 = vpack.c.bf16 %v353_v52, %v351_v51  ;;  %v776_v61 = vld [vmem:[#allocation2 + $0xc8] sm:$0xff]  ;;  %v778_v62 = vld [vmem:[#allocation2 + $0xd8] sm:$0xff]  ;;  %v4645_v0 = vpack.c.bf16 %v352_v58, %v350_v57  ;;  %v775_v4 = vld [vmem:[#allocation2 + $0xc0] sm:$0xff] }
 0x10b   :  { %4648 = vmatprep.subr.bf16.mxu1 %v4607_v3  ;;  %4624 = vmatprep.subr.bf16.mxu0 %v4623_v10  ;;  %v4655_v1 = vpack.c.bf16 %v778_v62, %v776_v61  ;;  %v777_v5 = vld [vmem:[#allocation2 + $0xd0] sm:$0xff]  ;;  %v782_v7 = vld [vmem:[#allocation2 + $0xf8] sm:$0xff]  ;;  %v779_v12 = vld [vmem:[#allocation2 + $0xe0] sm:$0xff] }
 0x10c   :  { %v4657_v10 = vpack.c.bf16 %v777_v5, %v775_v4  ;;  %v781_v13 = vld [vmem:[#allocation2 + $0xf0] sm:$0xff]  ;;  %v784_v14 = vld [vmem:[#allocation2 + $0x108] sm:$0xff]  ;;  %v896_v24 = vld [vmem:[%s7130_s29] sm:$0x3] }
 0x10d   :  { %4588 = vmatmul.mubr.msk.f32.vlgmr.msra.gmra.mrb[0].mxu1 %vm244_vm0, %v4427_v15  ;;  %4574 = vmatmul.mubr.msk.f32.vlgmr.msra.gmra.mrb[0].mxu0 %vm244_vm0, %v241_v16  ;;  %v786_v15 = vld [vmem:[#allocation2 + $0x118] sm:$0xff]  ;;  %v4661_v16 = vpack.c.bf16 %v781_v13, %v779_v12  ;;  %v1201_v52 = vld [vmem:[#allocation5 + $0x208] sm:$0xff]  ;;  %v1202_v61 = vld [vmem:[#allocation5 + $0x210] sm:$0xff] }
 0x10e   :  { %4590 = vmatprep.mubr.msk.f32.mxu1 %vm244_vm0, %v4428_v17  ;;  %4576 = vmatprep.mubr.msk.f32.mxu0 %vm244_vm0, %v242_v18  ;;  %v4663_v17 = vpack.c.bf16 %v786_v15, %v784_v14  ;;  %v783_v18 = vld [vmem:[#allocation2 + $0x100] sm:$0xff]  ;;  %v1205_v62 = vld [vmem:[#allocation5 + $0x228] sm:$0xff]  ;;  %v1206_v5 = vld [vmem:[#allocation5 + $0x230] sm:$0xff] }
 0x10f   :  { %4650 = vmatpush3.bf16.msra.mxu1 %v4607_v3  ;;  %4626 = vmatpush1.bf16.msra.mxu0 %v4625_v19  ;;  %v785_v19 = vld [vmem:[#allocation2 + $0x110] sm:$0xff]  ;;  %v1204_v4 = vld [vmem:[#allocation5 + $0x220] sm:$0xff]  ;;  %v1213_v14 = vld [vmem:[#allocation5 + $0x268] sm:$0xff] }
 0x110   :  { %4652 = vmatprep.subr.bf16.mxu1 %v4611_v6  ;;  %4628 = vmatprep.subr.bf16.mxu0 %v4627_v20  ;;  %v4665_v20 = vpack.c.bf16 %v785_v19, %v783_v18  ;;  %v1208_v12 = vld [vmem:[#allocation5 + $0x240] sm:$0xff]  ;;  %v1210_v13 = vld [vmem:[#allocation5 + $0x250] sm:$0xff]  ;;  %v1215_v15 = vld [vmem:[#allocation5 + $0x278] sm:$0xff] }
 0x111   :  { %4591 = vmatmul.mubr.msk.f32.gmra.mrb[2].mxu1 %vm244_vm0, %v4429_v25  ;;  %4577 = vmatmul.mubr.msk.f32.gmra.mrb[2].mxu0 %vm244_vm0, %v243_v26  ;;  %v6462_v25 = vsub.s32 0, %v899_v22  ;;  %v4693_v18 = vpack.c.bf16 %v1210_v13, %v1208_v12  ;;  %v4695_v19 = vpack.c.bf16 %v1215_v15, %v1213_v14  ;;  %v1214_v21 = vld [vmem:[#allocation5 + $0x270] sm:$0xff]  ;;  %v1217_v22 = vld [vmem:[#allocation5 + $0x288] sm:$0xff]  ;;  %v1239_v14 = vld [vmem:[#allocation5 + $0x338] sm:$0xff] }
 0x112   :  { %4601 = vmatprep.mubr.msk.f32.mxu1 %vm244_vm0, %v4442_v27  ;;  %546 = vmatprep.mubr.f32.mxu0 %v6063_v36  ;;  %v905_v27 = vrot.slane %v896_v24, %v6457_v23  ;;  %v1234_v12 = vld [vmem:[#allocation5 + $0x310] sm:$0xff]  ;;  %v1237_v13 = vld [vmem:[#allocation5 + $0x328] sm:$0xff] }
 0x113   :  { %4654 = vmatpush3.bf16.msra.mxu1 %v4611_v6  ;;  %4630 = vmatpush1.bf16.msra.mxu0 %v4629_v28  ;;  %v780_v6 = vld [vmem:[#allocation2 + $0xe8] sm:$0xff]  ;;  %v901_v28 = vrot.slane %v896_v24, %v6462_v25  ;;  %v1219_v24 = vld [vmem:[#allocation5 + $0x298] sm:$0xff] }
 0x114   :  { %4632 = vmatprep.subr.bf16.mxu0 %v4631_v29  ;;  %v4659_v11 = vpack.c.bf16 %v782_v7, %v780_v6  ;;  %v1209_v6 = vld [vmem:[#allocation5 + $0x248] sm:$0xff]  ;;  %v1211_v7 = vld [vmem:[#allocation5 + $0x258] sm:$0xff] }
 0x116   :  { %4602 = vmatmul.mubr.msk.f32.vlgmr.msra.gmra.mrb[4].mxu1 %vm244_vm0, %v4443_v32 }
 0x117   :  { %4604 = vmatprep.mubr.msk.f32.mxu1 %vm244_vm0, %v4444_v34  ;;  %4634 = vmatpush1.bf16.msra.mxu0 %v4633_v33 }
 0x118   :  { %4636 = vmatprep.subr.bf16.mxu0 %v4635_v39 }
 0x11a   :  { %4605 = vmatmul.mubr.msk.f32.gmra.mrb[6].mxu1 %vm244_vm0, %v4445_v35 }
 0x11b   :  { %1174 = vmatprep.mubr.f32.mxu1 %v6063_v36 }
 0x1e0   :  { %v4589_v45 = vpop.f32.mrb[0].mxu1  ;;  %v4575_v49 = vpop.f32.mrb[0].mxu0 }
 0x1e1   :  { %v437_v50 = vpop.f32.mrb[1].mxu1  ;;  %v323_v53 = vpop.f32.mrb[1].mxu0 }
 0x1e2   :  { %4434 = vmatmul.mubr.msk.f32.vlgmr.msra.gmra.mrb[4].mxu0 %vm469_vm1, %v437_v50 }
 0x1e3   :  { %552 = vmatprep.mubr.f32.mxu0 %v6063_v36  ;;  %4638 = vmatpush1.bf16.msra.mxu0 %v4637_v44 }
 0x1e4   :  { %v4592_v55 = vpop.f32.mrb[2].mxu1  ;;  %4640 = vmatprep.subr.bf16.mxu0 %v4639_v46  ;;  %v4578_v59 = vpop.f32.mrb[2].mxu0 }
 0x1e5   :  { %v447_v60 = vpop.f32.mrb[3].mxu1  ;;  %v333_v63 = vpop.f32.mrb[3].mxu0 }
 0x1e6   :  { %4435 = vmatmul.mubr.msk.f32.gmra.mrb[6].mxu0 %vm469_vm1, %v4589_v45 }
 0x1e7   :  { %558 = vmatprep.mubr.f32.mxu0 %v6063_v36  ;;  %4642 = vmatpush1.bf16.msra.mxu0 %v4641_v54 }
 0x1e8   :  { %4644 = vmatprep.subr.bf16.mxu0 %v4643_v56 }
 0x1e9   :  { %v4603_v2 = vpop.f32.mrb[4].mxu1 }
 0x1ea   :  { %4436 = vmatmul.mubr.msk.f32.gmra.mrb[8].mxu0 %vm469_vm1, %v447_v60  ;;  %v755_v3 = vpop.f32.mrb[5].mxu1  ;;  %v1200_v60 = vld [vmem:[#allocation5 + $0x200] sm:$0xff] }
 0x1eb   :  { %564 = vmatprep.mubr.f32.mxu0 %v6063_v36  ;;  %4646 = vmatpush1.bf16.msra.mxu0 %v4645_v0  ;;  %v4458_v0 = vld [vmem:[%s7131_s16 + $0x20] sm:$0xff] }
 0x1ec   :  { %4656 = vmatprep.subr.bf16.mxu0 %v4655_v1  ;;  %v924_v1 = vld [vmem:[%s7131_s16] sm:$0xff] }
 0x1ed   :  { %v4606_v8 = vpop.f32.mrb[6].mxu1 }
 0x1ee   :  { %4437 = vmatmul.mubr.msk.f32.gmra.mrb[10].mxu0 %vm469_vm1, %v4592_v55  ;;  %v765_v9 = vpop.f32.mrb[7].mxu1 }
 0x1ef   :  { %647 = vmatprep.mubr.f32.mxu0 %v6063_v36 }
 0x1f2   :  { %4438 = vmatmul.mubr.msk.f32.vlgmr.msra.gmra.mrb[4].mxu0 %vm469_vm1, %v323_v53  ;;  %v1203_v53 = vld [vmem:[#allocation5 + $0x218] sm:$0xff] }
 0x1f3   :  { %653 = vmatprep.mubr.f32.mxu0 %v6063_v36  ;;  %4658 = vmatpush1.bf16.msra.mxu0 %v4657_v10  ;;  %v4683_v58 = vpack.c.bf16 %v1203_v53, %v1201_v52  ;;  %v4689_v10 = vpack.c.bf16 %v1206_v5, %v1204_v4  ;;  %v1220_v52 = vld [vmem:[#allocation5 + $0x2a0] sm:$0xff]  ;;  %v1222_v53 = vld [vmem:[#allocation5 + $0x2b0] sm:$0xff] }
 0x1f4   :  { %4660 = vmatprep.subr.bf16.mxu0 %v4659_v11  ;;  %v4691_v11 = vpack.c.bf16 %v1211_v7, %v1209_v6  ;;  %v1228_v5 = vld [vmem:[#allocation5 + $0x2e0] sm:$0xff]  ;;  %v1230_v6 = vld [vmem:[#allocation5 + $0x2f0] sm:$0xff]  ;;  %v1233_v7 = vld [vmem:[#allocation5 + $0x308] sm:$0xff] }
 0x1f6   :  { %4439 = vmatmul.mubr.msk.f32.gmra.mrb[6].mxu0 %vm469_vm1, %v4575_v49 }
 0x1f7   :  { %659 = vmatprep.mubr.f32.mxu0 %v6063_v36  ;;  %4662 = vmatpush1.bf16.msra.mxu0 %v4661_v16  ;;  %v4460_v16 = vld [vmem:[%s7131_s16 + $0x30] sm:$0xff] }
 0x1f8   :  { %4664 = vmatprep.subr.bf16.mxu0 %v4663_v17  ;;  %v926_v17 = vld [vmem:[%s7131_s16 + $0x10] sm:$0xff] }
 0x1fa   :  { %4440 = vmatmul.mubr.msk.f32.gmra.mrb[8].mxu0 %vm469_vm1, %v333_v63  ;;  %v1207_v63 = vld [vmem:[#allocation5 + $0x238] sm:$0xff] }
 0x1fb   :  { %665 = vmatprep.mubr.f32.mxu0 %v6063_v36  ;;  %4666 = vmatpush1.bf16.msra.mxu0 %v4665_v20  ;;  %v1212_v20 = vld [vmem:[#allocation5 + $0x260] sm:$0xff] }
 0x1fe   :  { %4441 = vmatmul.mubr.msk.f32.gmra.mrb[10].mxu0 %vm469_vm1, %v4578_v59 }
 0x1ff   :  { %863 = vmatprep.mubr.f32.mxu0 %v6063_v36 }
 0x202   :  { %4450 = vmatmul.mubr.msk.f32.vlgmr.msra.gmra.mrb[4].mxu0 %vm469_vm1, %v755_v3  ;;  %v4687_v3 = vpack.c.bf16 %v1207_v63, %v1205_v62  ;;  %v1224_v63 = vld [vmem:[#allocation5 + $0x2c0] sm:$0xff] }
 0x203   :  { %869 = vmatprep.mubr.f32.mxu0 %v6063_v36 }
 0x206   :  { %4451 = vmatmul.mubr.msk.f32.gmra.mrb[6].mxu0 %vm469_vm1, %v4603_v2  ;;  %v4685_v2 = vpack.c.bf16 %v1202_v61, %v1200_v60  ;;  %v1227_v60 = vld [vmem:[#allocation5 + $0x2d8] sm:$0xff]  ;;  %v4705_v61 = vpack.c.bf16 %v1222_v53, %v1220_v52  ;;  %v1248_v53 = vld [vmem:[#allocation5 + $0x380] sm:$0xff] }
 0x207   :  { %875 = vmatprep.mubr.f32.mxu0 %v6063_v36 }
 0x20a   :  { %4452 = vmatmul.mubr.msk.f32.gmra.mrb[8].mxu0 %vm469_vm1, %v765_v9  ;;  %v925_v9 = vld [vmem:[%s7131_s16 + $0x8] sm:$0xff] }
 0x20b   :  { %881 = vmatprep.mubr.f32.mxu0 %v6063_v36 }
 0x20e   :  { %4453 = vmatmul.mubr.msk.f32.gmra.mrb[10].mxu0 %vm469_vm1, %v4606_v8  ;;  %v4459_v8 = vld [vmem:[%s7131_s16 + $0x28] sm:$0xff] }
 0x20f   :  { %1004 = vmatprep.mubr.f32.mxu0 %v6063_v36 }
 0x2d5   :  { %v865_v26 = vpop.f32.mrb[4].mxu0 }
 0x2d6   :  { %v867_v29 = vpop.f32.mrb[5].mxu0  ;;  %v6468_v32 = vadd.f32 %v901_v28, %v865_v26  ;;  %v4461_v26 = vld [vmem:[%s7131_s16 + $0x38] sm:$0xff] }
 0x2d7   :  { %v6466_v30 = vadd.f32 %v905_v27, %v867_v29  ;;  %v4699_v29 = vpack.c.bf16 %v1219_v24, %v1217_v22  ;;  %v1240_v24 = vld [vmem:[#allocation5 + $0x340] sm:$0xff] }
 0x2d8   :  { %v916_v41 = vmax.f32 %v6468_v32, 0.0 }
 0x2d9   :  { %v871_v31 = vpop.f32.mrb[6].mxu0  ;;  %v917_v38 = vmax.f32 %v6466_v30, 0.0 }
 0x2da   :  { %v6470_v33 = vadd.f32 %v901_v28, %v871_v31  ;;  %v873_v34 = vpop.f32.mrb[7].mxu0  ;;  %v1216_v31 = vld [vmem:[#allocation5 + $0x280] sm:$0xff] }
 0x2db   :  { %v6472_v35 = vadd.f32 %v905_v27, %v873_v34  ;;  %v1218_v34 = vld [vmem:[#allocation5 + $0x290] sm:$0xff] }
 0x2dc   :  { %v918_v37 = vmax.f32 %v6470_v33, 0.0 }
 0x2dd   :  { %v919_v39 = vmax.f32 %v6472_v35, 0.0  ;;  %v877_v40 = vpop.f32.mrb[8].mxu0 }
 0x2de   :  { %v879_v42 = vpop.f32.mrb[9].mxu0  ;;  %v6488_v44 = vpack.c.bf16 %v918_v37, %v916_v41  ;;  %v6494_v47 = vadd.f32 %v901_v28, %v877_v40  ;;  %v1221_v40 = vld [vmem:[#allocation5 + $0x2a8] sm:$0xff] }
 0x2df   :  { %v6482_v43 = vpack.c.bf16 %v919_v39, %v917_v38  ;;  %v6490_v45 = vadd.f32 %v905_v27, %v879_v42  ;;  %v1223_v42 = vld [vmem:[#allocation5 + $0x2b8] sm:$0xff] }
 0x2e0   :  { %v920_v56 = vmax.f32 %v6494_v47, 0.0 }
 0x2e1   :  { %v883_v46 = vpop.f32.mrb[10].mxu0  ;;  %4668 = vmatprep.subr.bf16.mxu0 %v6482_v43  ;;  %4676 = vmatprep.subr.bf16.mxu1 %v6482_v43  ;;  %v921_v54 = vmax.f32 %v6490_v45, 0.0  ;;  %v2560_v45 = vld [vmem:[%s7102_s13] sm:$0xff] }
 0x2e2   :  { %v6496_v48 = vadd.f32 %v901_v28, %v883_v46  ;;  %v885_v49 = vpop.f32.mrb[11].mxu0  ;;  %4670 = vmatpush1.bf16.msra.mxu0 %v6488_v44  ;;  %4678 = vmatpush1.bf16.msra.mxu1 %v6488_v44  ;;  %v4697_v28 = vpack.c.bf16 %v1214_v21, %v1212_v20  ;;  %v4701_v46 = vpack.c.bf16 %v1218_v34, %v1216_v31  ;;  %v1243_v20 = vld [vmem:[#allocation5 + $0x358] sm:$0xff]  ;;  %v1244_v34 = vld [vmem:[#allocation5 + $0x360] sm:$0xff] }
 0x2e3   :  { %v6500_v50 = vadd.f32 %v905_v27, %v885_v49  ;;  %v927_v27 = vld [vmem:[%s7131_s16 + $0x18] sm:$0xff]  ;;  %v4703_v49 = vpack.c.bf16 %v1223_v42, %v1221_v40  ;;  %v1246_v40 = vld [vmem:[#allocation5 + $0x370] sm:$0xff]  ;;  %v1249_v42 = vld [vmem:[#allocation5 + $0x388] sm:$0xff] }
 0x2e4   :  { %v922_v51 = vmax.f32 %v6496_v48, 0.0  ;;  %v2561_v48 = vld [vmem:[%s7102_s13 + $0x8] sm:$0xff] }
 0x2e5   :  { %v923_v55 = vmax.f32 %v6500_v50, 0.0  ;;  %v4490_v50 = vld [vmem:[%s7099_s10 + $0x10] sm:$0xff] }
 0x2e6   :  { %v6516_v59 = vpack.c.bf16 %v922_v51, %v920_v56 }
 0x2e7   :  { %v6510_v57 = vpack.c.bf16 %v923_v55, %v921_v54 }
 0x2e9   :  { %4672 = vmatprep.subr.bf16.mxu0 %v6510_v57  ;;  %4680 = vmatprep.subr.bf16.mxu1 %v6510_v57 }
 0x2ea   :  { %4674 = vmatpush1.bf16.msra.mxu0 %v6516_v59  ;;  %4682 = vmatpush1.bf16.msra.mxu1 %v6516_v59 }
 0x2eb   :  { %4684 = vmatprep.subr.bf16.mxu0 %v4683_v58  ;;  %v1225_v58 = vld [vmem:[#allocation5 + $0x2c8] sm:$0xff] }
 0x2ec   :  { %v4707_v62 = vpack.c.bf16 %v1227_v60, %v1225_v58  ;;  %v1250_v58 = vld [vmem:[#allocation5 + $0x390] sm:$0xff]  ;;  %v1253_v60 = vld [vmem:[#allocation5 + $0x3a8] sm:$0xff] }
 0x2ed   :  { %4462 = vmatmul.mubr.msk.f32.vlgmr.msra.gmra.mrb[8].mxu1 %vm244_vm0, %v4458_v0  ;;  %4454 = vmatmul.mubr.msk.f32.vlgmr.msra.gmra.mrb[12].mxu0 %vm244_vm0, %v924_v1  ;;  %v1226_v0 = vld [vmem:[#allocation5 + $0x2d0] sm:$0xff]  ;;  %v1229_v1 = vld [vmem:[#allocation5 + $0x2e8] sm:$0xff] }
 0x2ee   :  { %1180 = vmatprep.mubr.f32.mxu1 %v6063_v36  ;;  %1010 = vmatprep.mubr.f32.mxu0 %v6063_v36 }
 0x2ef   :  { %4686 = vmatpush1.bf16.msra.mxu0 %v4685_v2  ;;  %v1231_v2 = vld [vmem:[#allocation5 + $0x2f8] sm:$0xff] }
 0x2f0   :  { %4688 = vmatprep.subr.bf16.mxu0 %v4687_v3  ;;  %v4709_v3 = vpack.c.bf16 %v1226_v0, %v1224_v63  ;;  %v4711_v4 = vpack.c.bf16 %v1231_v2, %v1229_v1  ;;  %v1252_v0 = vld [vmem:[#allocation5 + $0x3a0] sm:$0xff]  ;;  %v1254_v1 = vld [vmem:[#allocation5 + $0x3b0] sm:$0xff]  ;;  %v1257_v2 = vld [vmem:[#allocation5 + $0x3c8] sm:$0xff] }
 0x2f1   :  { %4463 = vmatmul.mubr.msk.f32.gmra.mrb[10].mxu1 %vm244_vm0, %v4459_v8  ;;  %4455 = vmatmul.mubr.msk.f32.gmra.mrb[14].mxu0 %vm244_vm0, %v925_v9  ;;  %v1235_v8 = vld [vmem:[#allocation5 + $0x318] sm:$0xff]  ;;  %v4713_v9 = vpack.c.bf16 %v1230_v6, %v1228_v5  ;;  %v1256_v6 = vld [vmem:[#allocation5 + $0x3c0] sm:$0xff] }
 0x2f2   :  { %1186 = vmatprep.mubr.f32.mxu1 %v6063_v36  ;;  %1016 = vmatprep.mubr.f32.mxu0 %v6063_v36 }
 0x2f3   :  { %4690 = vmatpush1.bf16.msra.mxu0 %v4689_v10  ;;  %v4715_v10 = vpack.c.bf16 %v1235_v8, %v1233_v7  ;;  %v1258_v7 = vld [vmem:[#allocation5 + $0x3d0] sm:$0xff]  ;;  %v1261_v8 = vld [vmem:[#allocation5 + $0x3e8] sm:$0xff] }
 0x2f4   :  { %4692 = vmatprep.subr.bf16.mxu0 %v4691_v11  ;;  %v1232_v11 = vld [vmem:[#allocation5 + $0x300] sm:$0xff] }
 0x2f5   :  { %4464 = vmatmul.mubr.msk.f32.gmra.mrb[12].mxu1 %vm244_vm0, %v4460_v16  ;;  %4456 = vmatmul.mubr.msk.f32.gmra.mrb[16].mxu0 %vm244_vm0, %v926_v17  ;;  %v4717_v15 = vpack.c.bf16 %v1234_v12, %v1232_v11  ;;  %v4719_v16 = vpack.c.bf16 %v1239_v14, %v1237_v13  ;;  %v1236_v17 = vld [vmem:[#allocation5 + $0x320] sm:$0xff]  ;;  %v1262_v13 = vld [vmem:[#allocation5 + $0x3f0] sm:$0xff] }
 0x2f6   :  { %1192 = vmatprep.mubr.f32.mxu1 %v6063_v36  ;;  %1022 = vmatprep.mubr.f32.mxu0 %v6063_v36  ;;  %v1260_v12 = vld [vmem:[#allocation5 + $0x3e0] sm:$0xff] }
 0x2f7   :  { %4694 = vmatpush1.bf16.msra.mxu0 %v4693_v18  ;;  %v1238_v18 = vld [vmem:[#allocation5 + $0x330] sm:$0xff]  ;;  %v4745_v14 = vpack.c.bf16 %v1262_v13, %v1260_v12  ;;  %v1574_v12 = vld [vmem:[#allocation5 + $0x4c8] sm:$0xff]  ;;  %v1576_v13 = vld [vmem:[#allocation5 + $0x4d8] sm:$0xff] }
 0x2f8   :  { %4696 = vmatprep.subr.bf16.mxu0 %v4695_v19  ;;  %v1241_v19 = vld [vmem:[#allocation5 + $0x348] sm:$0xff]  ;;  %v4721_v21 = vpack.c.bf16 %v1238_v18, %v1236_v17 }
 0x2f9   :  { %4465 = vmatmul.mubr.msk.f32.gmra.mrb[14].mxu1 %vm244_vm0, %v4461_v26  ;;  %4457 = vmatmul.mubr.msk.f32.gmra.mrb[18].mxu0 %vm244_vm0, %v927_v27  ;;  %v4723_v22 = vpack.c.bf16 %v1243_v20, %v1241_v19  ;;  %v1242_v26 = vld [vmem:[#allocation5 + $0x350] sm:$0xff]  ;;  %v1245_v27 = vld [vmem:[#allocation5 + $0x368] sm:$0xff]  ;;  %v1552_v19 = vld [vmem:[#allocation5 + $0x418] sm:$0xff] }
 0x2fa   :  { %v1550_v18 = vld [vmem:[#allocation5 + $0x408] sm:$0xff]  ;;  %v1549_v20 = vld [vmem:[#allocation5 + $0x400] sm:$0xff] }
 0x2fb   :  { %4698 = vmatpush1.bf16.msra.mxu0 %v4697_v28  ;;  %v1247_v28 = vld [vmem:[#allocation5 + $0x378] sm:$0xff] }
 0x2fc   :  { %4700 = vmatprep.subr.bf16.mxu0 %v4699_v29  ;;  %v4725_v29 = vpack.c.bf16 %v1242_v26, %v1240_v24  ;;  %v4727_v31 = vpack.c.bf16 %v1247_v28, %v1245_v27  ;;  %v1554_v24 = vld [vmem:[#allocation5 + $0x428] sm:$0xff]  ;;  %v1556_v26 = vld [vmem:[#allocation5 + $0x438] sm:$0xff] }
 0x2fd   :  { %v4823_v28 = vpack.c.bf16 %v1556_v26, %v1554_v24  ;;  %v1579_v24 = vld [vmem:[#allocation5 + $0x4f0] sm:$0xff]  ;;  %v1582_v26 = vld [vmem:[#allocation5 + $0x508] sm:$0xff] }
 0x2ff   :  { %4702 = vmatpush1.bf16.msra.mxu0 %v4701_v46  ;;  %v1251_v46 = vld [vmem:[#allocation5 + $0x398] sm:$0xff] }
 0x300   :  { %4704 = vmatprep.subr.bf16.mxu0 %v4703_v49  ;;  %v4729_v49 = vpack.c.bf16 %v1246_v40, %v1244_v34  ;;  %v4731_v52 = vpack.c.bf16 %v1251_v46, %v1249_v42  ;;  %v1558_v34 = vld [vmem:[#allocation5 + $0x448] sm:$0xff]  ;;  %v1560_v40 = vld [vmem:[#allocation5 + $0x458] sm:$0xff] }
 0x301   :  { %v4827_v46 = vpack.c.bf16 %v1560_v40, %v1558_v34  ;;  %v1581_v34 = vld [vmem:[#allocation5 + $0x500] sm:$0xff]  ;;  %v1583_v40 = vld [vmem:[#allocation5 + $0x510] sm:$0xff] }
 0x303   :  { %4706 = vmatpush1.bf16.msra.mxu0 %v4705_v61  ;;  %v1255_v61 = vld [vmem:[#allocation5 + $0x3b8] sm:$0xff] }
 0x304   :  { %4708 = vmatprep.subr.bf16.mxu0 %v4707_v62  ;;  %v4733_v62 = vpack.c.bf16 %v1250_v58, %v1248_v53  ;;  %v4735_v63 = vpack.c.bf16 %v1255_v61, %v1253_v60  ;;  %v1562_v53 = vld [vmem:[#allocation5 + $0x468] sm:$0xff]  ;;  %v1564_v58 = vld [vmem:[#allocation5 + $0x478] sm:$0xff] }
 0x305   :  { %v4831_v61 = vpack.c.bf16 %v1564_v58, %v1562_v53  ;;  %v1036_v53 = vld [vmem:[#allocation5 + $0x38] sm:$0xff]  ;;  %v4853_v58 = vpack.c.bf16 %v1583_v40, %v1581_v34 }
 0x307   :  { %4710 = vmatpush1.bf16.msra.mxu0 %v4709_v3  ;;  %v1259_v3 = vld [vmem:[#allocation5 + $0x3d8] sm:$0xff] }
 0x308   :  { %4712 = vmatprep.subr.bf16.mxu0 %v4711_v4  ;;  %v4737_v4 = vpack.c.bf16 %v1254_v1, %v1252_v0  ;;  %v4739_v5 = vpack.c.bf16 %v1259_v3, %v1257_v2  ;;  %v1566_v0 = vld [vmem:[#allocation5 + $0x488] sm:$0xff]  ;;  %v1568_v1 = vld [vmem:[#allocation5 + $0x498] sm:$0xff] }
 0x309   :  { %v4835_v3 = vpack.c.bf16 %v1568_v1, %v1566_v0  ;;  %v1585_v1 = vld [vmem:[#allocation5 + $0x520] sm:$0xff] }
 0x30b   :  { %4714 = vmatpush1.bf16.msra.mxu0 %v4713_v9  ;;  %v1263_v9 = vld [vmem:[#allocation5 + $0x3f8] sm:$0xff] }
 0x30c   :  { %4716 = vmatprep.subr.bf16.mxu0 %v4715_v10  ;;  %v4741_v10 = vpack.c.bf16 %v1258_v7, %v1256_v6  ;;  %v4743_v11 = vpack.c.bf16 %v1263_v9, %v1261_v8  ;;  %v1570_v6 = vld [vmem:[#allocation5 + $0x4a8] sm:$0xff]  ;;  %v1572_v7 = vld [vmem:[#allocation5 + $0x4b8] sm:$0xff] }
 0x30d   :  { %v4839_v9 = vpack.c.bf16 %v1572_v7, %v1570_v6  ;;  %v1590_v7 = vld [vmem:[#allocation5 + $0x548] sm:$0xff] }
 0x30f   :  { %4718 = vmatpush1.bf16.msra.mxu0 %v4717_v15  ;;  %v1030_v15 = vld [vmem:[#allocation5 + $0x8] sm:$0xff] }
 0x310   :  { %4720 = vmatprep.subr.bf16.mxu0 %v4719_v16  ;;  %v1032_v16 = vld [vmem:[#allocation5 + $0x18] sm:$0xff] }
 0x311   :  { %v4747_v17 = vpack.c.bf16 %v1032_v16, %v1030_v15  ;;  %v4843_v15 = vpack.c.bf16 %v1576_v13, %v1574_v12  ;;  %v1573_v16 = vld [vmem:[#allocation5 + $0x4c0] sm:$0xff] }
 0x312   :  { %v1037_v13 = vld [vmem:[#allocation5 + $0x40] sm:$0xff] }
 0x313   :  { %4722 = vmatpush1.bf16.msra.mxu0 %v4721_v21  ;;  %v4819_v21 = vpack.c.bf16 %v1552_v19, %v1550_v18  ;;  %v1578_v18 = vld [vmem:[#allocation5 + $0x4e8] sm:$0xff]  ;;  %v1580_v19 = vld [vmem:[#allocation5 + $0x4f8] sm:$0xff] }
 0x314   :  { %4724 = vmatprep.subr.bf16.mxu0 %v4723_v22  ;;  %v1551_v22 = vld [vmem:[#allocation5 + $0x410] sm:$0xff] }
 0x315   :  { %v4821_v27 = vpack.c.bf16 %v1551_v22, %v1549_v20  ;;  %4820 = vmatprep.subr.bf16.mxu1 %v4819_v21  ;;  %v4847_v21 = vpack.c.bf16 %v1580_v19, %v1578_v18  ;;  %v1577_v22 = vld [vmem:[#allocation5 + $0x4e0] sm:$0xff]  ;;  %v1591_v18 = vld [vmem:[#allocation5 + $0x550] sm:$0xff] }
 0x317   :  { %4726 = vmatpush1.bf16.msra.mxu0 %v4725_v29  ;;  %v1553_v29 = vld [vmem:[#allocation5 + $0x420] sm:$0xff]  ;;  %4822 = vmatpush1.bf16.msra.mxu1 %v4821_v27  ;;  %v1584_v27 = vld [vmem:[#allocation5 + $0x518] sm:$0xff] }
 0x318   :  { %4728 = vmatprep.subr.bf16.mxu0 %v4727_v31  ;;  %v1555_v31 = vld [vmem:[#allocation5 + $0x430] sm:$0xff]  ;;  %4824 = vmatprep.subr.bf16.mxu1 %v4823_v28  ;;  %v4849_v28 = vpack.c.bf16 %v1579_v24, %v1577_v22  ;;  %v1594_v24 = vld [vmem:[#allocation5 + $0x568] sm:$0xff] }
 0x319   :  { %v4825_v42 = vpack.c.bf16 %v1555_v31, %v1553_v29  ;;  %v1029_v29 = vld [vmem:[#allocation5] sm:$0xff]  ;;  %v4851_v31 = vpack.c.bf16 %v1584_v27, %v1582_v26  ;;  %v1596_v26 = vld [vmem:[#allocation5 + $0x578] sm:$0xff]  ;;  %v1042_v27 = vld [vmem:[#allocation5 + $0x68] sm:$0xff] }
 0x31b   :  { %4730 = vmatpush1.bf16.msra.mxu0 %v4729_v49  ;;  %v1557_v49 = vld [vmem:[#allocation5 + $0x440] sm:$0xff]  ;;  %4826 = vmatpush1.bf16.msra.mxu1 %v4825_v42  ;;  %v1031_v42 = vld [vmem:[#allocation5 + $0x10] sm:$0xff] }
 0x31c   :  { %4732 = vmatprep.subr.bf16.mxu0 %v4731_v52  ;;  %v1559_v52 = vld [vmem:[#allocation5 + $0x450] sm:$0xff]  ;;  %4828 = vmatprep.subr.bf16.mxu1 %v4827_v46  ;;  %v1586_v46 = vld [vmem:[#allocation5 + $0x528] sm:$0xff] }
 0x31d   :  { %v4829_v60 = vpack.c.bf16 %v1559_v52, %v1557_v49  ;;  %v1588_v49 = vld [vmem:[#allocation5 + $0x538] sm:$0xff]  ;;  %v1034_v52 = vld [vmem:[#allocation5 + $0x28] sm:$0xff] }
 0x31e   :  { %v4855_v0 = vpack.c.bf16 %v1588_v49, %v1586_v46  ;;  %v1041_v49 = vld [vmem:[#allocation5 + $0x60] sm:$0xff] }
 0x31f   :  { %4734 = vmatpush1.bf16.msra.mxu0 %v4733_v62  ;;  %v1561_v62 = vld [vmem:[#allocation5 + $0x460] sm:$0xff]  ;;  %4830 = vmatpush1.bf16.msra.mxu1 %v4829_v60 }
 0x320   :  { %4736 = vmatprep.subr.bf16.mxu0 %v4735_v63  ;;  %v1563_v63 = vld [vmem:[#allocation5 + $0x470] sm:$0xff]  ;;  %4832 = vmatprep.subr.bf16.mxu1 %v4831_v61  ;;  %v4749_v61 = vpack.c.bf16 %v1031_v42, %v1029_v29  ;;  %v4863_v42 = vpack.c.bf16 %v1596_v26, %v1594_v24  ;;  %v1060_v24 = vld [vmem:[#allocation5 + $0xf8] sm:$0xff] }
 0x321   :  { %v4833_v2 = vpack.c.bf16 %v1563_v63, %v1561_v62  ;;  %v1033_v62 = vld [vmem:[#allocation5 + $0x20] sm:$0xff] }
 0x323   :  { %4738 = vmatpush1.bf16.msra.mxu0 %v4737_v4  ;;  %v1565_v4 = vld [vmem:[#allocation5 + $0x480] sm:$0xff]  ;;  %4834 = vmatpush1.bf16.msra.mxu1 %v4833_v2  ;;  %v1587_v2 = vld [vmem:[#allocation5 + $0x530] sm:$0xff] }
 0x324   :  { %4740 = vmatprep.subr.bf16.mxu0 %v4739_v5  ;;  %v1567_v5 = vld [vmem:[#allocation5 + $0x490] sm:$0xff]  ;;  %4836 = vmatprep.subr.bf16.mxu1 %v4835_v3 }
 0x325   :  { %v4837_v8 = vpack.c.bf16 %v1567_v5, %v1565_v4  ;;  %v4751_v4 = vpack.c.bf16 %v1036_v53, %v1034_v52  ;;  %v1035_v5 = vld [vmem:[#allocation5 + $0x30] sm:$0xff] }
 0x326   :  { %v4753_v12 = vpack.c.bf16 %v1035_v5, %v1033_v62  ;;  %v1043_v52 = vld [vmem:[#allocation5 + $0x70] sm:$0xff] }
 0x327   :  { %4742 = vmatpush1.bf16.msra.mxu0 %v4741_v10  ;;  %v1569_v10 = vld [vmem:[#allocation5 + $0x4a0] sm:$0xff]  ;;  %4838 = vmatpush1.bf16.msra.mxu1 %v4837_v8  ;;  %v1592_v8 = vld [vmem:[#allocation5 + $0x558] sm:$0xff]  ;;  %v4761_v62 = vpack.c.bf16 %v1043_v52, %v1041_v49  ;;  %v1063_v49 = vld [vmem:[#allocation5 + $0x110] sm:$0xff] }
 0x328   :  { %4744 = vmatprep.subr.bf16.mxu0 %v4743_v11  ;;  %v1571_v11 = vld [vmem:[#allocation5 + $0x4b0] sm:$0xff]  ;;  %4840 = vmatprep.subr.bf16.mxu1 %v4839_v9  ;;  %v1038_v9 = vld [vmem:[#allocation5 + $0x48] sm:$0xff] }
 0x329   :  { %v1066_v52 = vld [vmem:[#allocation5 + $0x128] sm:$0xff] }
 0x32b   :  { %4746 = vmatpush1.bf16.msra.mxu0 %v4745_v14  ;;  %v4841_v14 = vpack.c.bf16 %v1571_v11, %v1569_v10  ;;  %v1040_v10 = vld [vmem:[#allocation5 + $0x58] sm:$0xff]  ;;  %v4857_v11 = vpack.c.bf16 %v1587_v2, %v1585_v1 }
 0x32c   :  { %4748 = vmatprep.subr.bf16.mxu0 %v4747_v17  ;;  %v1575_v17 = vld [vmem:[#allocation5 + $0x4d0] sm:$0xff]  ;;  %v4755_v19 = vpack.c.bf16 %v1040_v10, %v1038_v9  ;;  %v1052_v9 = vld [vmem:[#allocation5 + $0xb8] sm:$0xff] }
 0x32d   :  { %4842 = vmatpush1.bf16.msra.mxu1 %v4841_v14  ;;  %v4845_v20 = vpack.c.bf16 %v1575_v17, %v1573_v16  ;;  %v4859_v16 = vpack.c.bf16 %v1592_v8, %v1590_v7  ;;  %v1589_v17 = vld [vmem:[#allocation5 + $0x540] sm:$0xff]  ;;  %v1050_v8 = vld [vmem:[#allocation5 + $0xa8] sm:$0xff] }
 0x32e   :  { %4844 = vmatprep.subr.bf16.mxu1 %v4843_v15  ;;  %v4861_v29 = vpack.c.bf16 %v1591_v18, %v1589_v17 }
 0x331   :  { %4846 = vmatpush1.bf16.msra.mxu1 %v4845_v20  ;;  %v1039_v20 = vld [vmem:[#allocation5 + $0x50] sm:$0xff] }
 0x332   :  { %4848 = vmatprep.subr.bf16.mxu1 %v4847_v21 }
 0x335   :  { %4850 = vmatpush1.bf16.msra.mxu1 %v4849_v28  ;;  %v1044_v28 = vld [vmem:[#allocation5 + $0x78] sm:$0xff] }
 0x336   :  { %4852 = vmatprep.subr.bf16.mxu1 %v4851_v31  ;;  %v4757_v31 = vpack.c.bf16 %v1039_v20, %v1037_v13  ;;  %v4759_v46 = vpack.c.bf16 %v1044_v28, %v1042_v27  ;;  %v1051_v13 = vld [vmem:[#allocation5 + $0xb0] sm:$0xff]  ;;  %v1057_v28 = vld [vmem:[#allocation5 + $0xe0] sm:$0xff] }
 0x337   :  { %v1055_v20 = vld [vmem:[#allocation5 + $0xd0] sm:$0xff] }
 0x339   :  { %4854 = vmatpush1.bf16.msra.mxu1 %v4853_v58 }
 0x33a   :  { %4856 = vmatprep.subr.bf16.mxu1 %v4855_v0 }
 0x33d   :  { %4858 = vmatpush1.bf16.msra.mxu1 %v4857_v11  ;;  %v4767_v11 = vpack.c.bf16 %v1052_v9, %v1050_v8  ;;  %v1069_v8 = vld [vmem:[#allocation5 + $0x140] sm:$0xff]  ;;  %v1071_v9 = vld [vmem:[#allocation5 + $0x150] sm:$0xff] }
 0x33e   :  { %4860 = vmatprep.subr.bf16.mxu1 %v4859_v16  ;;  %v1056_v16 = vld [vmem:[#allocation5 + $0xd8] sm:$0xff] }
 0x341   :  { %4862 = vmatpush1.bf16.msra.mxu1 %v4861_v29  ;;  %v1062_v29 = vld [vmem:[#allocation5 + $0x108] sm:$0xff] }
 0x342   :  { %4864 = vmatprep.subr.bf16.mxu1 %v4863_v42 }
 0x3c0   :  { %v1176_v60 = vpop.f32.mrb[8].mxu1  ;;  %v6560_v63 = vpop.f32.mrb[12].mxu0 }
 0x3c1   :  { %v1178_v3 = vpop.f32.mrb[9].mxu1  ;;  %v6562_v6 = vpop.f32.mrb[13].mxu0 }
 0x3c2   :  { %1328 = vmatprep.mubr.f32.mxu0 %v1178_v3  ;;  %v1045_v3 = vld [vmem:[#allocation5 + $0x80] sm:$0xff] }
 0x3c3   :  { %1329 = vmatmul.mubr.f32.vlgmr.msra.gmra.mrb[20].mxu0 %v1176_v60  ;;  %v1046_v60 = vld [vmem:[#allocation5 + $0x88] sm:$0xff] }
 0x3c4   :  { %4750 = vmatpush1.bf16.msra.mxu0 %v4749_v61  ;;  %v1182_v14 = vpop.f32.mrb[10].mxu1  ;;  %v6564_v15 = vpop.f32.mrb[14].mxu0  ;;  %v1048_v61 = vld [vmem:[#allocation5 + $0x98] sm:$0xff] }
 0x3c5   :  { %4752 = vmatprep.subr.bf16.mxu0 %v4751_v4  ;;  %v1184_v21 = vpop.f32.mrb[11].mxu1  ;;  %v6566_v22 = vpop.f32.mrb[15].mxu0  ;;  %v4763_v2 = vpack.c.bf16 %v1048_v61, %v1046_v60  ;;  %v1047_v4 = vld [vmem:[#allocation5 + $0x90] sm:$0xff] }
 0x3c6   :  { %1334 = vmatprep.mubr.f32.mxu0 %v1184_v21  ;;  %v4765_v10 = vpack.c.bf16 %v1047_v4, %v1045_v3  ;;  %v1058_v21 = vld [vmem:[#allocation5 + $0xe8] sm:$0xff]  ;;  %v1072_v3 = vld [vmem:[#allocation5 + $0x158] sm:$0xff] }
 0x3c7   :  { %1335 = vmatmul.mubr.f32.gmra.mrb[22].mxu0 %v1182_v14  ;;  %v1054_v14 = vld [vmem:[#allocation5 + $0xc8] sm:$0xff]  ;;  %v4775_v27 = vpack.c.bf16 %v1060_v24, %v1058_v21  ;;  %v1077_v21 = vld [vmem:[#allocation5 + $0x180] sm:$0xff]  ;;  %v1079_v24 = vld [vmem:[#allocation5 + $0x190] sm:$0xff] }
 0x3c8   :  { %4754 = vmatpush1.bf16.msra.mxu0 %v4753_v12  ;;  %v1188_v34 = vpop.f32.mrb[12].mxu1  ;;  %v6568_v40 = vpop.f32.mrb[16].mxu0  ;;  %v1049_v12 = vld [vmem:[#allocation5 + $0xa0] sm:$0xff]  ;;  %v4771_v18 = vpack.c.bf16 %v1056_v16, %v1054_v14  ;;  %v1075_v16 = vld [vmem:[#allocation5 + $0x170] sm:$0xff] }
 0x3c9   :  { %4756 = vmatprep.subr.bf16.mxu0 %v4755_v19  ;;  %v1190_v53 = vpop.f32.mrb[13].mxu1  ;;  %v6570_v58 = vpop.f32.mrb[17].mxu0  ;;  %v4769_v17 = vpack.c.bf16 %v1051_v13, %v1049_v12  ;;  %v1053_v19 = vld [vmem:[#allocation5 + $0xc0] sm:$0xff]  ;;  %v4789_v12 = vpack.c.bf16 %v1071_v9, %v1069_v8  ;;  %v1602_v9 = vld [vmem:[#allocation5 + $0x5a8] sm:$0xff] }
 0x3ca   :  { %1340 = vmatprep.mubr.f32.mxu0 %v1190_v53  ;;  %v4773_v26 = vpack.c.bf16 %v1055_v20, %v1053_v19  ;;  %v1068_v53 = vld [vmem:[#allocation5 + $0x138] sm:$0xff]  ;;  %v1073_v14 = vld [vmem:[#allocation5 + $0x160] sm:$0xff] }
 0x3cb   :  { %1341 = vmatmul.mubr.f32.gmra.mrb[24].mxu0 %v1188_v34  ;;  %v4783_v61 = vpack.c.bf16 %v1068_v53, %v1066_v52  ;;  %v4793_v19 = vpack.c.bf16 %v1075_v16, %v1073_v14  ;;  %v1085_v52 = vld [vmem:[#allocation5 + $0x1c0] sm:$0xff]  ;;  %v1087_v53 = vld [vmem:[#allocation5 + $0x1d0] sm:$0xff]  ;;  %v1606_v16 = vld [vmem:[#allocation5 + $0x5c8] sm:$0xff] }
 0x3cc   :  { %4758 = vmatpush1.bf16.msra.mxu0 %v4757_v31  ;;  %v1194_v0 = vpop.f32.mrb[14].mxu1  ;;  %v6572_v1 = vpop.f32.mrb[18].mxu0  ;;  %v1064_v31 = vld [vmem:[#allocation5 + $0x118] sm:$0xff] }
 0x3cd   :  { %4760 = vmatprep.subr.bf16.mxu0 %v4759_v46  ;;  %v1196_v5 = vpop.f32.mrb[15].mxu1  ;;  %v6574_v7 = vpop.f32.mrb[19].mxu0  ;;  %v4779_v42 = vpack.c.bf16 %v1064_v31, %v1062_v29  ;;  %v1061_v46 = vld [vmem:[#allocation5 + $0x100] sm:$0xff]  ;;  %v1083_v31 = vld [vmem:[#allocation5 + $0x1b0] sm:$0xff] }
 0x3ce   :  { %1346 = vmatprep.mubr.f32.mxu0 %v1196_v5  ;;  %v4781_v60 = vpack.c.bf16 %v1063_v49, %v1061_v46  ;;  %v1081_v29 = vld [vmem:[#allocation5 + $0x1a0] sm:$0xff] }
 0x3cf   :  { %1347 = vmatmul.mubr.f32.gmra.mrb[26].mxu0 %v1194_v0  ;;  %v1067_v0 = vld [vmem:[#allocation5 + $0x130] sm:$0xff]  ;;  %v4801_v46 = vpack.c.bf16 %v1083_v31, %v1081_v29 }
 0x3d0   :  { %4762 = vmatpush1.bf16.msra.mxu0 %v4761_v62  ;;  %1417 = vmatprep.mubr.f32.mxu0 %v6562_v6  ;;  %v1059_v6 = vld [vmem:[#allocation5 + $0xf0] sm:$0xff]  ;;  %v1065_v62 = vld [vmem:[#allocation5 + $0x120] sm:$0xff] }
 0x3d1   :  { %4764 = vmatprep.subr.bf16.mxu0 %v4763_v2  ;;  %v4777_v34 = vpack.c.bf16 %v1059_v6, %v1057_v28  ;;  %v1070_v2 = vld [vmem:[#allocation5 + $0x148] sm:$0xff]  ;;  %v4785_v4 = vpack.c.bf16 %v1067_v0, %v1065_v62  ;;  %v4797_v28 = vpack.c.bf16 %v1079_v24, %v1077_v21  ;;  %v4805_v62 = vpack.c.bf16 %v1087_v53, %v1085_v52 }
 0x3d2   :  { %v4787_v5 = vpack.c.bf16 %v1072_v3, %v1070_v2  ;;  %v1089_v2 = vld [vmem:[#allocation5 + $0x1e0] sm:$0xff]  ;;  %v1091_v3 = vld [vmem:[#allocation5 + $0x1f0] sm:$0xff]  ;;  %v1610_v24 = vld [vmem:[#allocation5 + $0x5e8] sm:$0xff] }
 0x3d4   :  { %4766 = vmatpush1.bf16.msra.mxu0 %v4765_v10  ;;  %v1074_v10 = vld [vmem:[#allocation5 + $0x168] sm:$0xff] }
 0x3d5   :  { %4768 = vmatprep.subr.bf16.mxu0 %v4767_v11  ;;  %v1076_v11 = vld [vmem:[#allocation5 + $0x178] sm:$0xff] }
 0x3d6   :  { %v4791_v13 = vpack.c.bf16 %v1076_v11, %v1074_v10  ;;  %v1604_v10 = vld [vmem:[#allocation5 + $0x5b8] sm:$0xff] }
 0x3d7   :  { %v4871_v11 = vpack.c.bf16 %v1604_v10, %v1602_v9 }
 0x3d8   :  { %4770 = vmatpush1.bf16.msra.mxu0 %v4769_v17  ;;  %v1078_v17 = vld [vmem:[#allocation5 + $0x188] sm:$0xff] }
 0x3d9   :  { %4772 = vmatprep.subr.bf16.mxu0 %v4771_v18  ;;  %v1080_v18 = vld [vmem:[#allocation5 + $0x198] sm:$0xff] }
 0x3da   :  { %v4795_v20 = vpack.c.bf16 %v1080_v18, %v1078_v17  ;;  %v1608_v17 = vld [vmem:[#allocation5 + $0x5d8] sm:$0xff] }
 0x3db   :  { %v4875_v18 = vpack.c.bf16 %v1608_v17, %v1606_v16 }
 0x3dc   :  { %4774 = vmatpush1.bf16.msra.mxu0 %v4773_v26  ;;  %v1082_v26 = vld [vmem:[#allocation5 + $0x1a8] sm:$0xff] }
 0x3dd   :  { %4776 = vmatprep.subr.bf16.mxu0 %v4775_v27  ;;  %v1084_v27 = vld [vmem:[#allocation5 + $0x1b8] sm:$0xff] }
 0x3de   :  { %v4799_v6 = vpack.c.bf16 %v1084_v27, %v1082_v26  ;;  %v1612_v26 = vld [vmem:[#allocation5 + $0x5f8] sm:$0xff] }
 0x3df   :  { %v4879_v27 = vpack.c.bf16 %v1612_v26, %v1610_v24 }
 0x3e0   :  { %4778 = vmatpush1.bf16.msra.mxu0 %v4777_v34  ;;  %v1086_v34 = vld [vmem:[#allocation5 + $0x1c8] sm:$0xff] }
 0x3e1   :  { %4780 = vmatprep.subr.bf16.mxu0 %v4779_v42  ;;  %v1088_v42 = vld [vmem:[#allocation5 + $0x1d8] sm:$0xff] }
 0x3e2   :  { %v4803_v49 = vpack.c.bf16 %v1088_v42, %v1086_v34 }
 0x3e4   :  { %4782 = vmatpush1.bf16.msra.mxu0 %v4781_v60  ;;  %v1090_v60 = vld [vmem:[#allocation5 + $0x1e8] sm:$0xff] }
 0x3e5   :  { %4784 = vmatprep.subr.bf16.mxu0 %v4783_v61  ;;  %v1092_v61 = vld [vmem:[#allocation5 + $0x1f8] sm:$0xff] }
 0x3e6   :  { %v4807_v0 = vpack.c.bf16 %v1092_v61, %v1090_v60 }
 0x3e8   :  { %4786 = vmatpush1.bf16.msra.mxu0 %v4785_v4  ;;  %v4809_v4 = vpack.c.bf16 %v1091_v3, %v1089_v2 }
 0x3e9   :  { %4788 = vmatprep.subr.bf16.mxu0 %v4787_v5  ;;  %v1599_v5 = vld [vmem:[#allocation5 + $0x590] sm:$0xff] }
 0x3ec   :  { %4790 = vmatpush1.bf16.msra.mxu0 %v4789_v12  ;;  %v1601_v12 = vld [vmem:[#allocation5 + $0x5a0] sm:$0xff] }
 0x3ed   :  { %4792 = vmatprep.subr.bf16.mxu0 %v4791_v13  ;;  %v1603_v13 = vld [vmem:[#allocation5 + $0x5b0] sm:$0xff] }
 0x3ee   :  { %v4873_v14 = vpack.c.bf16 %v1603_v13, %v1601_v12 }
 0x3f0   :  { %4794 = vmatpush1.bf16.msra.mxu0 %v4793_v19  ;;  %v1605_v19 = vld [vmem:[#allocation5 + $0x5c0] sm:$0xff] }
 0x3f1   :  { %4796 = vmatprep.subr.bf16.mxu0 %v4795_v20  ;;  %v1607_v20 = vld [vmem:[#allocation5 + $0x5d0] sm:$0xff] }
 0x3f2   :  { %v4877_v21 = vpack.c.bf16 %v1607_v20, %v1605_v19 }
 0x3f4   :  { %4798 = vmatpush1.bf16.msra.mxu0 %v4797_v28  ;;  %v1609_v28 = vld [vmem:[#allocation5 + $0x5e0] sm:$0xff] }
 0x3f5   :  { %4800 = vmatprep.subr.bf16.mxu0 %v4799_v6  ;;  %v1611_v6 = vld [vmem:[#allocation5 + $0x5f0] sm:$0xff] }
 0x3f6   :  { %v4881_v29 = vpack.c.bf16 %v1611_v6, %v1609_v28 }
 0x3f8   :  { %4802 = vmatpush1.bf16.msra.mxu0 %v4801_v46 }
 0x3f9   :  { %4804 = vmatprep.subr.bf16.mxu0 %v4803_v49 }
 0x3fc   :  { %4806 = vmatpush1.bf16.msra.mxu0 %v4805_v62 }
 0x3fd   :  { %4808 = vmatprep.subr.bf16.mxu0 %v4807_v0 }
 0x400   :  { %4810 = vmatpush1.bf16.msra.mxu0 %v4809_v4 }
 0x401   :  { %4812 = vmatprep.subr.bf16.mxu0 %v6482_v43  ;;  %v4466_v43 = vld [vmem:[%s7131_s16 + $0x40] sm:$0xff] }
 0x403   :  { %1418 = vmatmul.mubr.f32.vlgmr.msra.gmra.mrb[20].mxu0 %v6560_v63  ;;  %v1593_v63 = vld [vmem:[#allocation5 + $0x560] sm:$0xff] }
 0x404   :  { %4814 = vmatpush1.bf16.msra.mxu0 %v6488_v44  ;;  %1423 = vmatprep.mubr.f32.mxu0 %v6566_v22  ;;  %v4467_v44 = vld [vmem:[%s7131_s16 + $0x48] sm:$0xff] }
 0x405   :  { %4816 = vmatprep.subr.bf16.mxu0 %v6510_v57  ;;  %v4468_v57 = vld [vmem:[%s7131_s16 + $0x50] sm:$0xff] }
 0x407   :  { %1424 = vmatmul.mubr.f32.gmra.mrb[22].mxu0 %v6564_v15  ;;  %v1595_v15 = vld [vmem:[#allocation5 + $0x570] sm:$0xff] }
 0x408   :  { %4818 = vmatpush1.bf16.msra.mxu0 %v6516_v59  ;;  %1429 = vmatprep.mubr.f32.mxu0 %v6570_v58  ;;  %v4469_v59 = vld [vmem:[%s7131_s16 + $0x58] sm:$0xff]  ;;  %v4865_v22 = vpack.c.bf16 %v1595_v15, %v1593_v63 }
 0x409   :  { %v1600_v58 = vld [vmem:[#allocation5 + $0x598] sm:$0xff] }
 0x40a   :  { %4866 = vmatpush1.bf16.msra.mxu1 %v4865_v22 }
 0x40b   :  { %1430 = vmatmul.mubr.f32.gmra.mrb[24].mxu0 %v6568_v40  ;;  %v1598_v40 = vld [vmem:[#allocation5 + $0x588] sm:$0xff] }
 0x40c   :  { %1435 = vmatprep.mubr.f32.mxu0 %v6574_v7  ;;  %v1597_v7 = vld [vmem:[#allocation5 + $0x580] sm:$0xff] }
 0x40d   :  { %v4869_v8 = vpack.c.bf16 %v1599_v5, %v1597_v7 }
 0x40f   :  { %1436 = vmatmul.mubr.f32.gmra.mrb[26].mxu0 %v6572_v1  ;;  %v4867_v1 = vpack.c.bf16 %v1600_v58, %v1598_v40 }
 0x410   :  { %1523 = vmatprep.mubr.f32.mxu0 %v6063_v36 }
 0x411   :  { %4868 = vmatprep.subr.bf16.mxu1 %v4867_v1 }
 0x412   :  { %4870 = vmatpush1.bf16.msra.mxu1 %v4869_v8 }
 0x413   :  { %4470 = vmatmul.mubr.msk.f32.vlgmr.msra.gmra.mrb[28].mxu0 %vm244_vm0, %v4466_v43  ;;  %4872 = vmatprep.subr.bf16.mxu1 %v4871_v11 }
 0x414   :  { %1529 = vmatprep.mubr.f32.mxu0 %v6063_v36 }
 0x416   :  { %4874 = vmatpush1.bf16.msra.mxu1 %v4873_v14 }
 0x417   :  { %4471 = vmatmul.mubr.msk.f32.gmra.mrb[30].mxu0 %vm244_vm0, %v4467_v44  ;;  %4876 = vmatprep.subr.bf16.mxu1 %v4875_v18 }
 0x418   :  { %1535 = vmatprep.mubr.f32.mxu0 %v6063_v36 }
 0x41a   :  { %4878 = vmatpush1.bf16.msra.mxu1 %v4877_v21 }
 0x41b   :  { %4472 = vmatmul.mubr.msk.f32.gmra.mrb[32].mxu0 %vm244_vm0, %v4468_v57  ;;  %4880 = vmatprep.subr.bf16.mxu1 %v4879_v27  ;;  %v1710_v57 = vld [vmem:[%s7132_s9] sm:$0x3] }
 0x41c   :  { %1541 = vmatprep.mubr.f32.mxu0 %v6063_v36  ;;  %v1715_v15 = vrot.slane %v1710_v57, %v6462_v25  ;;  %v1719_v58 = vrot.slane %v1710_v57, %v6457_v23  ;;  %v1741_v57 = vld [vmem:[#allocation7 + $0x18] sm:$0xff] }
 0x41e   :  { %4882 = vmatpush1.bf16.msra.mxu1 %v4881_v29 }
 0x41f   :  { %4473 = vmatmul.mubr.msk.f32.gmra.mrb[34].mxu0 %vm244_vm0, %v4469_v59 }
 0x420   :  { %1818 = vmatprep.mubr.f32.mxu0 %v6063_v36 }
 0x4d6   :  { %v1419_v31 = vpop.f32.mrb[20].mxu0 }
 0x4d7   :  { %v1421_v34 = vpop.f32.mrb[21].mxu0 }
 0x4da   :  { %v1425_v42 = vpop.f32.mrb[22].mxu0 }
 0x4db   :  { %v1427_v46 = vpop.f32.mrb[23].mxu0 }
 0x4de   :  { %v1431_v49 = vpop.f32.mrb[24].mxu0 }
 0x4df   :  { %v1433_v52 = vpop.f32.mrb[25].mxu0 }
 0x4e2   :  { %v1437_v53 = vpop.f32.mrb[26].mxu0 }
 0x4e3   :  { %v1439_v60 = vpop.f32.mrb[27].mxu0 }
 0x4e6   :  { %v1525_v61 = vpop.f32.mrb[28].mxu0 }
 0x4e7   :  { %v1527_v62 = vpop.f32.mrb[29].mxu0 }
 0x4e8   :  { %1677 = vmatprep.mubr.f32.mxu1 %v1527_v62 }
 0x4e9   :  { %1678 = vmatmul.mubr.f32.vlgmr.msra.gmra.mrb[16].mxu1 %v1525_v61 }
 0x4ea   :  { %v1531_v0 = vpop.f32.mrb[30].mxu0 }
 0x4eb   :  { %v1533_v2 = vpop.f32.mrb[31].mxu0 }
 0x4ec   :  { %1683 = vmatprep.mubr.f32.mxu1 %v1533_v2 }
 0x4ed   :  { %1684 = vmatmul.mubr.f32.gmra.mrb[18].mxu1 %v1531_v0 }
 0x4ee   :  { %v1537_v3 = vpop.f32.mrb[32].mxu0 }
 0x4ef   :  { %v1539_v4 = vpop.f32.mrb[33].mxu0 }
 0x4f0   :  { %1689 = vmatprep.mubr.f32.mxu1 %v1539_v4  ;;  %v1739_v4 = vld [vmem:[#allocation7 + $0x8] sm:$0xff] }
 0x4f1   :  { %1690 = vmatmul.mubr.f32.gmra.mrb[20].mxu1 %v1537_v3  ;;  %v2017_v3 = vld [vmem:[#allocation8 + $0x218] sm:$0xff] }
 0x4f2   :  { %v1543_v43 = vpop.f32.mrb[34].mxu0 }
 0x4f3   :  { %v1545_v44 = vpop.f32.mrb[35].mxu0 }
 0x4f4   :  { %1695 = vmatprep.mubr.f32.mxu1 %v1545_v44  ;;  %v1740_v44 = vld [vmem:[#allocation7 + $0x10] sm:$0xff] }
 0x4f5   :  { %1696 = vmatmul.mubr.f32.gmra.mrb[22].mxu1 %v1543_v43 }
 0x5bc   :  { %v1679_v59 = vpop.f32.mrb[16].mxu1 }
 0x5bd   :  { %v5627_v63 = vadd.f32 %v1679_v59, %v1419_v31  ;;  %v1681_v22 = vpop.f32.mrb[17].mxu1  ;;  %v2014_v59 = vld [vmem:[#allocation8 + $0x200] sm:$0xff] }
 0x5be   :  { %v5628_v40 = vadd.f32 %v1681_v22, %v1421_v34  ;;  %v2021_v22 = vld [vmem:[#allocation8 + $0x238] sm:$0xff] }
 0x5bf   :  { %v1722_v7 = vadd.f32 %v5627_v63, %v1715_v15  ;;  %v2016_v63 = vld [vmem:[#allocation8 + $0x210] sm:$0xff] }
 0x5c0   :  { %v1685_v1 = vpop.f32.mrb[18].mxu1  ;;  %v1723_v9 = vadd.f32 %v5628_v40, %v1719_v58  ;;  %v1908_v40 = vld [vmem:[#allocation7 + $0x20] sm:$0xff] }
 0x5c1   :  { %v5629_v5 = vadd.f32 %v1685_v1, %v1425_v42  ;;  %v1687_v8 = vpop.f32.mrb[19].mxu1  ;;  %v1730_v14 = vmax.f32 %v1722_v7, 0.0  ;;  %v2018_v7 = vld [vmem:[#allocation8 + $0x220] sm:$0xff] }
 0x5c2   :  { %v5630_v10 = vadd.f32 %v1687_v8, %v1427_v46  ;;  %v1731_v19 = vmax.f32 %v1723_v9, 0.0  ;;  %v2023_v8 = vld [vmem:[#allocation8 + $0x248] sm:$0xff]  ;;  %v2025_v9 = vld [vmem:[#allocation8 + $0x258] sm:$0xff] }
 0x5c3   :  { %v1724_v11 = vadd.f32 %v5629_v5, %v1715_v15  ;;  %v2020_v5 = vld [vmem:[#allocation8 + $0x230] sm:$0xff] }
 0x5c4   :  { %v1725_v12 = vadd.f32 %v5630_v10, %v1719_v58  ;;  %v1691_v13 = vpop.f32.mrb[20].mxu1  ;;  %v1909_v10 = vld [vmem:[#allocation7 + $0x28] sm:$0xff] }
 0x5c5   :  { %v1732_v16 = vmax.f32 %v1724_v11, 0.0  ;;  %v5631_v17 = vadd.f32 %v1691_v13, %v1431_v49  ;;  %v1693_v18 = vpop.f32.mrb[21].mxu1  ;;  %v4905_v11 = vpack.c.bf16 %v2020_v5, %v2018_v7  ;;  %v2022_v13 = vld [vmem:[#allocation8 + $0x240] sm:$0xff]  ;;  %v2047_v7 = vld [vmem:[#allocation8 + $0x308] sm:$0xff]  ;;  %v2049_v5 = vld [vmem:[#allocation8 + $0x318] sm:$0xff] }
 0x5c6   :  { %v1733_v20 = vmax.f32 %v1725_v12, 0.0  ;;  %v5632_v21 = vadd.f32 %v1693_v18, %v1433_v52  ;;  %v4907_v12 = vpack.c.bf16 %v2025_v9, %v2023_v8  ;;  %v1910_v18 = vld [vmem:[#allocation7 + $0x30] sm:$0xff]  ;;  %v4931_v9 = vpack.c.bf16 %v2049_v5, %v2047_v7 }
 0x5c7   :  { %v6614_v24 = vpack.c.bf16 %v1732_v16, %v1730_v14  ;;  %v1726_v28 = vadd.f32 %v5631_v17, %v1715_v15  ;;  %v2024_v14 = vld [vmem:[#allocation8 + $0x250] sm:$0xff]  ;;  %v2027_v16 = vld [vmem:[#allocation8 + $0x268] sm:$0xff]  ;;  %v2029_v17 = vld [vmem:[#allocation8 + $0x278] sm:$0xff] }
 0x5c8   :  { %v1697_v26 = vpop.f32.mrb[22].mxu1  ;;  %v6616_v27 = vpack.c.bf16 %v1733_v20, %v1731_v19  ;;  %v1727_v31 = vadd.f32 %v5632_v21, %v1719_v58  ;;  %v4909_v19 = vpack.c.bf16 %v2024_v14, %v2022_v13  ;;  %v4911_v20 = vpack.c.bf16 %v2029_v17, %v2027_v16  ;;  %v2026_v21 = vld [vmem:[#allocation8 + $0x260] sm:$0xff]  ;;  %v2053_v13 = vld [vmem:[#allocation8 + $0x338] sm:$0xff]  ;;  %v2072_v7 = vld [vmem:[#allocation8 + $0x3d0] sm:$0xff] }
 0x5c9   :  { %v5633_v6 = vadd.f32 %v1697_v26, %v1437_v53  ;;  %v1699_v29 = vpop.f32.mrb[23].mxu1  ;;  %v1734_v49 = vmax.f32 %v1726_v28, 0.0  ;;  %v1738_v53 = vld [vmem:[#allocation7] sm:$0xff]  ;;  %v2028_v26 = vld [vmem:[#allocation8 + $0x270] sm:$0xff]  ;;  %v2031_v28 = vld [vmem:[#allocation8 + $0x288] sm:$0xff] }
 0x5ca   :  { %v5634_v34 = vadd.f32 %v1699_v29, %v1439_v60  ;;  %4884 = vmatprep.subr.bf16.mxu0 %v6616_v27  ;;  %v1735_v62 = vmax.f32 %v1727_v31, 0.0  ;;  %v2015_v60 = vld [vmem:[#allocation8 + $0x208] sm:$0xff]  ;;  %v1911_v29 = vld [vmem:[#allocation7 + $0x38] sm:$0xff]  ;;  %v4913_v31 = vpack.c.bf16 %v2028_v26, %v2026_v21  ;;  %v2050_v17 = vld [vmem:[#allocation8 + $0x320] sm:$0xff] }
 0x5cb   :  { %v1728_v42 = vadd.f32 %v5633_v6, %v1715_v15  ;;  %4886 = vmatpush1.bf16.msra.mxu0 %v6614_v24  ;;  %v4899_v43 = vpack.c.bf16 %v2017_v3, %v2015_v60  ;;  %v2019_v15 = vld [vmem:[#allocation8 + $0x228] sm:$0xff]  ;;  %v2033_v6 = vld [vmem:[#allocation8 + $0x298] sm:$0xff]  ;;  %v2036_v60 = vld [vmem:[#allocation8 + $0x2b0] sm:$0xff] }
 0x5cc   :  { %v1729_v46 = vadd.f32 %v5634_v34, %v1719_v58  ;;  %v4901_v58 = vpack.c.bf16 %v2016_v63, %v2014_v59  ;;  %v4903_v1 = vpack.c.bf16 %v2021_v22, %v2019_v15  ;;  %v4915_v34 = vpack.c.bf16 %v2033_v6, %v2031_v28  ;;  %v2039_v3 = vld [vmem:[#allocation8 + $0x2c8] sm:$0xff]  ;;  %v2040_v59 = vld [vmem:[#allocation8 + $0x2d0] sm:$0xff]  ;;  %v2045_v15 = vld [vmem:[#allocation8 + $0x2f8] sm:$0xff] }
 0x5cd   :  { %v1736_v61 = vmax.f32 %v1728_v42, 0.0  ;;  %v2030_v42 = vld [vmem:[#allocation8 + $0x280] sm:$0xff]  ;;  %v2043_v63 = vld [vmem:[#allocation8 + $0x2e8] sm:$0xff]  ;;  %v2056_v6 = vld [vmem:[#allocation8 + $0x350] sm:$0xff] }
 0x5ce   :  { %v1737_v52 = vmax.f32 %v1729_v46, 0.0  ;;  %v2032_v46 = vld [vmem:[#allocation8 + $0x290] sm:$0xff]  ;;  %v2054_v28 = vld [vmem:[#allocation8 + $0x340] sm:$0xff] }
 0x5cf   :  { %v6620_v0 = vpack.c.bf16 %v1736_v61, %v1734_v49  ;;  %v2035_v49 = vld [vmem:[#allocation8 + $0x2a8] sm:$0xff]  ;;  %v2037_v61 = vld [vmem:[#allocation8 + $0x2b8] sm:$0xff] }
 0x5d0   :  { %v6622_v2 = vpack.c.bf16 %v1737_v52, %v1735_v62  ;;  %v4917_v62 = vpack.c.bf16 %v2032_v46, %v2030_v42  ;;  %v4919_v52 = vpack.c.bf16 %v2037_v61, %v2035_v49  ;;  %v2058_v46 = vld [vmem:[#allocation8 + $0x360] sm:$0xff]  ;;  %v2060_v49 = vld [vmem:[#allocation8 + $0x370] sm:$0xff] }
 0x5d1   :  { %v4945_v61 = vpack.c.bf16 %v2060_v49, %v2058_v46  ;;  %v1850_v46 = vld [vmem:[#allocation8 + $0x38] sm:$0xff] }
 0x5d2   :  { %4888 = vmatprep.subr.bf16.mxu0 %v6622_v2 }
 0x5d3   :  { %4890 = vmatpush1.bf16.msra.mxu0 %v6620_v0 }
 0x5d4   :  { %4892 = vmatprep.subr.bf16.mxu0 %v6616_v27 }
 0x5d6   :  { %4474 = vmatmul.mubr.msk.f32.vlgmr.msra.gmra.mrb[36].mxu0 %vm244_vm0, %v1738_v53  ;;  %v2034_v53 = vld [vmem:[#allocation8 + $0x2a0] sm:$0xff] }
 0x5d7   :  { %4894 = vmatpush1.bf16.msra.mxu0 %v6614_v24  ;;  %1824 = vmatprep.mubr.f32.mxu0 %v6063_v36 }
 0x5d8   :  { %4896 = vmatprep.subr.bf16.mxu0 %v6622_v2 }
 0x5da   :  { %4475 = vmatmul.mubr.msk.f32.gmra.mrb[38].mxu0 %vm244_vm0, %v1739_v4  ;;  %v2041_v4 = vld [vmem:[#allocation8 + $0x2d8] sm:$0xff] }
 0x5db   :  { %4898 = vmatpush1.bf16.msra.mxu0 %v6620_v0  ;;  %1830 = vmatprep.mubr.f32.mxu0 %v6063_v36 }
 0x5dc   :  { %4900 = vmatprep.subr.bf16.mxu0 %v4899_v43  ;;  %v4921_v43 = vpack.c.bf16 %v2036_v60, %v2034_v53  ;;  %v2062_v60 = vld [vmem:[#allocation8 + $0x380] sm:$0xff] }
 0x5de   :  { %4476 = vmatmul.mubr.msk.f32.gmra.mrb[40].mxu0 %vm244_vm0, %v1740_v44  ;;  %v4923_v44 = vpack.c.bf16 %v2041_v4, %v2039_v3  ;;  %v2064_v3 = vld [vmem:[#allocation8 + $0x390] sm:$0xff] }
 0x5df   :  { %1836 = vmatprep.mubr.f32.mxu0 %v6063_v36  ;;  %v4949_v4 = vpack.c.bf16 %v2064_v3, %v2062_v60  ;;  %v1849_v60 = vld [vmem:[#allocation8 + $0x30] sm:$0xff]  ;;  %v1852_v3 = vld [vmem:[#allocation8 + $0x48] sm:$0xff] }
 0x5e2   :  { %4477 = vmatmul.mubr.msk.f32.gmra.mrb[42].mxu0 %vm244_vm0, %v1741_v57  ;;  %v2038_v57 = vld [vmem:[#allocation8 + $0x2c0] sm:$0xff] }
 0x5e3   :  { %1988 = vmatprep.mubr.f32.mxu0 %v6063_v36  ;;  %v4925_v22 = vpack.c.bf16 %v2040_v59, %v2038_v57  ;;  %v2066_v59 = vld [vmem:[#allocation8 + $0x3a0] sm:$0xff] }
 0x5e6   :  { %4478 = vmatmul.mubr.msk.f32.vlgmr.msra.gmra.mrb[44].mxu0 %vm244_vm0, %v1908_v40  ;;  %v4927_v40 = vpack.c.bf16 %v2045_v15, %v2043_v63  ;;  %v2068_v63 = vld [vmem:[#allocation8 + $0x3b0] sm:$0xff] }
 0x5e7   :  { %1994 = vmatprep.mubr.f32.mxu0 %v6063_v36  ;;  %4902 = vmatpush1.bf16.msra.mxu0 %v4901_v58  ;;  %v2042_v58 = vld [vmem:[#allocation8 + $0x2e0] sm:$0xff]  ;;  %v4953_v15 = vpack.c.bf16 %v2068_v63, %v2066_v59 }
 0x5e8   :  { %4904 = vmatprep.subr.bf16.mxu0 %v4903_v1  ;;  %v2044_v1 = vld [vmem:[#allocation8 + $0x2f0] sm:$0xff]  ;;  %v1851_v63 = vld [vmem:[#allocation8 + $0x40] sm:$0xff] }
 0x5e9   :  { %v4929_v8 = vpack.c.bf16 %v2044_v1, %v2042_v58  ;;  %v2070_v1 = vld [vmem:[#allocation8 + $0x3c0] sm:$0xff] }
 0x5ea   :  { %4479 = vmatmul.mubr.msk.f32.gmra.mrb[46].mxu0 %vm244_vm0, %v1909_v10  ;;  %v2046_v10 = vld [vmem:[#allocation8 + $0x300] sm:$0xff]  ;;  %v4957_v5 = vpack.c.bf16 %v2072_v7, %v2070_v1 }
 0x5eb   :  { %2000 = vmatprep.mubr.f32.mxu0 %v6063_v36  ;;  %4906 = vmatpush1.bf16.msra.mxu0 %v4905_v11  ;;  %v2048_v11 = vld [vmem:[#allocation8 + $0x310] sm:$0xff] }
 0x5ec   :  { %4908 = vmatprep.subr.bf16.mxu0 %v4907_v12  ;;  %v2051_v12 = vld [vmem:[#allocation8 + $0x328] sm:$0xff]  ;;  %v4933_v14 = vpack.c.bf16 %v2048_v11, %v2046_v10  ;;  %v2074_v11 = vld [vmem:[#allocation8 + $0x3e0] sm:$0xff] }
 0x5ed   :  { %v4935_v16 = vpack.c.bf16 %v2053_v13, %v2051_v12  ;;  %v2076_v12 = vld [vmem:[#allocation8 + $0x3f0] sm:$0xff] }
 0x5ee   :  { %4480 = vmatmul.mubr.msk.f32.gmra.mrb[48].mxu0 %vm244_vm0, %v1910_v18  ;;  %v2052_v18 = vld [vmem:[#allocation8 + $0x330] sm:$0xff]  ;;  %v4961_v13 = vpack.c.bf16 %v2076_v12, %v2074_v11  ;;  %v1862_v11 = vld [vmem:[#allocation8 + $0x98] sm:$0xff] }
 0x5ef   :  { %2006 = vmatprep.mubr.f32.mxu0 %v6063_v36  ;;  %4910 = vmatpush1.bf16.msra.mxu0 %v4909_v19  ;;  %v2055_v19 = vld [vmem:[#allocation8 + $0x348] sm:$0xff]  ;;  %v4937_v21 = vpack.c.bf16 %v2052_v18, %v2050_v17 }
 0x5f0   :  { %4912 = vmatprep.subr.bf16.mxu0 %v4911_v20  ;;  %v2057_v20 = vld [vmem:[#allocation8 + $0x358] sm:$0xff] }
 0x5f1   :  { %v4939_v26 = vpack.c.bf16 %v2057_v20, %v2055_v19 }
 0x5f2   :  { %4481 = vmatmul.mubr.msk.f32.gmra.mrb[50].mxu0 %vm244_vm0, %v1911_v29  ;;  %v2059_v29 = vld [vmem:[#allocation8 + $0x368] sm:$0xff] }
 0x5f3   :  { %4914 = vmatpush1.bf16.msra.mxu0 %v4913_v31  ;;  %v2061_v31 = vld [vmem:[#allocation8 + $0x378] sm:$0xff] }
 0x5f4   :  { %4916 = vmatprep.subr.bf16.mxu0 %v4915_v34  ;;  %v4941_v34 = vpack.c.bf16 %v2056_v6, %v2054_v28  ;;  %v4943_v42 = vpack.c.bf16 %v2061_v31, %v2059_v29  ;;  %v1843_v31 = vld [vmem:[#allocation8] sm:$0xff] }
 0x5f7   :  { %4918 = vmatpush1.bf16.msra.mxu0 %v4917_v62  ;;  %v2063_v62 = vld [vmem:[#allocation8 + $0x388] sm:$0xff] }
 0x5f8   :  { %4920 = vmatprep.subr.bf16.mxu0 %v4919_v52  ;;  %v2065_v52 = vld [vmem:[#allocation8 + $0x398] sm:$0xff] }
 0x5f9   :  { %v4947_v53 = vpack.c.bf16 %v2065_v52, %v2063_v62 }
 0x5fb   :  { %4922 = vmatpush1.bf16.msra.mxu0 %v4921_v43  ;;  %v2067_v43 = vld [vmem:[#allocation8 + $0x3a8] sm:$0xff] }
 0x5fc   :  { %4924 = vmatprep.subr.bf16.mxu0 %v4923_v44  ;;  %v2069_v44 = vld [vmem:[#allocation8 + $0x3b8] sm:$0xff] }
 0x5fd   :  { %v4951_v57 = vpack.c.bf16 %v2069_v44, %v2067_v43 }
 0x5ff   :  { %4926 = vmatpush1.bf16.msra.mxu0 %v4925_v22  ;;  %v2071_v22 = vld [vmem:[#allocation8 + $0x3c8] sm:$0xff] }
 0x600   :  { %4928 = vmatprep.subr.bf16.mxu0 %v4927_v40  ;;  %v2073_v40 = vld [vmem:[#allocation8 + $0x3d8] sm:$0xff] }
 0x601   :  { %v4955_v58 = vpack.c.bf16 %v2073_v40, %v2071_v22  ;;  %v1856_v22 = vld [vmem:[#allocation8 + $0x68] sm:$0xff]  ;;  %v1858_v40 = vld [vmem:[#allocation8 + $0x78] sm:$0xff] }
 0x603   :  { %4930 = vmatpush1.bf16.msra.mxu0 %v4929_v8  ;;  %v2075_v8 = vld [vmem:[#allocation8 + $0x3e8] sm:$0xff] }
 0x604   :  { %4932 = vmatprep.subr.bf16.mxu0 %v4931_v9  ;;  %v2077_v9 = vld [vmem:[#allocation8 + $0x3f8] sm:$0xff] }
 0x605   :  { %v4959_v10 = vpack.c.bf16 %v2077_v9, %v2075_v8  ;;  %v1855_v8 = vld [vmem:[#allocation8 + $0x60] sm:$0xff]  ;;  %v1857_v9 = vld [vmem:[#allocation8 + $0x70] sm:$0xff] }
 0x607   :  { %4934 = vmatpush1.bf16.msra.mxu0 %v4933_v14  ;;  %v1844_v14 = vld [vmem:[#allocation8 + $0x8] sm:$0xff] }
 0x608   :  { %4936 = vmatprep.subr.bf16.mxu0 %v4935_v16  ;;  %v1846_v16 = vld [vmem:[#allocation8 + $0x18] sm:$0xff] }
 0x609   :  { %v4963_v17 = vpack.c.bf16 %v1846_v16, %v1844_v14 }
 0x60b   :  { %4938 = vmatpush1.bf16.msra.mxu0 %v4937_v21 }
 0x60c   :  { %4940 = vmatprep.subr.bf16.mxu0 %v4939_v26 }
 0x60f   :  { %4942 = vmatpush1.bf16.msra.mxu0 %v4941_v34  ;;  %v1845_v34 = vld [vmem:[#allocation8 + $0x10] sm:$0xff] }
 0x610   :  { %4944 = vmatprep.subr.bf16.mxu0 %v4943_v42  ;;  %v1848_v42 = vld [vmem:[#allocation8 + $0x28] sm:$0xff] }
 0x611   :  { %v4967_v52 = vpack.c.bf16 %v1850_v46, %v1848_v42  ;;  %v1866_v42 = vld [vmem:[#allocation8 + $0xb8] sm:$0xff] }
 0x613   :  { %4946 = vmatpush1.bf16.msra.mxu0 %v4945_v61  ;;  %v4965_v61 = vpack.c.bf16 %v1845_v34, %v1843_v31  ;;  %v1861_v31 = vld [vmem:[#allocation8 + $0x90] sm:$0xff]  ;;  %v1864_v34 = vld [vmem:[#allocation8 + $0xa8] sm:$0xff] }
 0x614   :  { %4948 = vmatprep.subr.bf16.mxu0 %v4947_v53  ;;  %v1847_v53 = vld [vmem:[#allocation8 + $0x20] sm:$0xff] }
 0x615   :  { %v4969_v44 = vpack.c.bf16 %v1849_v60, %v1847_v53  ;;  %v1870_v53 = vld [vmem:[#allocation8 + $0xd8] sm:$0xff] }
 0x617   :  { %4950 = vmatpush1.bf16.msra.mxu0 %v4949_v4  ;;  %v1854_v4 = vld [vmem:[#allocation8 + $0x58] sm:$0xff] }
 0x618   :  { %4952 = vmatprep.subr.bf16.mxu0 %v4951_v57  ;;  %v4971_v59 = vpack.c.bf16 %v1854_v4, %v1852_v3  ;;  %v1867_v4 = vld [vmem:[#allocation8 + $0xc0] sm:$0xff] }
 0x61b   :  { %4954 = vmatpush1.bf16.msra.mxu0 %v4953_v15  ;;  %v1853_v15 = vld [vmem:[#allocation8 + $0x50] sm:$0xff] }
 0x61c   :  { %4956 = vmatprep.subr.bf16.mxu0 %v4955_v58  ;;  %v4973_v1 = vpack.c.bf16 %v1853_v15, %v1851_v63  ;;  %v1873_v15 = vld [vmem:[#allocation8 + $0xf0] sm:$0xff] }
 0x61f   :  { %4958 = vmatpush1.bf16.msra.mxu0 %v4957_v5  ;;  %v4975_v5 = vpack.c.bf16 %v1858_v40, %v1856_v22  ;;  %v1876_v22 = vld [vmem:[#allocation8 + $0x108] sm:$0xff]  ;;  %v1878_v40 = vld [vmem:[#allocation8 + $0x118] sm:$0xff] }
 0x620   :  { %4960 = vmatprep.subr.bf16.mxu0 %v4959_v10  ;;  %v1860_v10 = vld [vmem:[#allocation8 + $0x88] sm:$0xff] }
 0x621   :  { %v4979_v16 = vpack.c.bf16 %v1862_v11, %v1860_v10 }
 0x623   :  { %4962 = vmatpush1.bf16.msra.mxu0 %v4961_v13  ;;  %v4977_v13 = vpack.c.bf16 %v1857_v9, %v1855_v8  ;;  %v1880_v8 = vld [vmem:[#allocation8 + $0x128] sm:$0xff]  ;;  %v1882_v9 = vld [vmem:[#allocation8 + $0x138] sm:$0xff] }
 0x624   :  { %4964 = vmatprep.subr.bf16.mxu0 %v4963_v17  ;;  %v1859_v17 = vld [vmem:[#allocation8 + $0x80] sm:$0xff]  ;;  %v4999_v11 = vpack.c.bf16 %v1882_v9, %v1880_v8  ;;  %v1901_v9 = vld [vmem:[#allocation8 + $0x1d0] sm:$0xff] }
 0x625   :  { %v4981_v46 = vpack.c.bf16 %v1861_v31, %v1859_v17  ;;  %v1899_v8 = vld [vmem:[#allocation8 + $0x1c0] sm:$0xff] }
 0x6a9   :  { %v6645_v18 = vpop.f32.mrb[36].mxu0 }
 0x6aa   :  { %v1822_v19 = vpop.f32.mrb[37].mxu0 }
 0x6ad   :  { %v6647_v20 = vpop.f32.mrb[38].mxu0 }
 0x6ae   :  { %v6649_v21 = vpop.f32.mrb[39].mxu0 }
 0x6b1   :  { %v6651_v26 = vpop.f32.mrb[40].mxu0 }
 0x6b2   :  { %v6653_v28 = vpop.f32.mrb[41].mxu0 }
 0x6b5   :  { %v6655_v6 = vpop.f32.mrb[42].mxu0 }
 0x6b6   :  { %v6657_v29 = vpop.f32.mrb[43].mxu0 }
 0x6b9   :  { %v1990_v49 = vpop.f32.mrb[44].mxu0 }
 0x6ba   :  { %v1992_v62 = vpop.f32.mrb[45].mxu0 }
 0x6bb   :  { %2142 = vmatprep.mubr.f32.mxu0 %v1992_v62  ;;  %v1865_v62 = vld [vmem:[#allocation8 + $0xb0] sm:$0xff] }
 0x6bc   :  { %2143 = vmatmul.mubr.f32.vlgmr.msra.gmra.mrb[52].mxu0 %v1990_v49  ;;  %v4983_v49 = vpack.c.bf16 %v1866_v42, %v1864_v34  ;;  %v1883_v34 = vld [vmem:[#allocation8 + $0x140] sm:$0xff]  ;;  %v1885_v42 = vld [vmem:[#allocation8 + $0x150] sm:$0xff] }
 0x6bd   :  { %4966 = vmatpush1.bf16.msra.mxu0 %v4965_v61  ;;  %v1996_v43 = vpop.f32.mrb[46].mxu0  ;;  %v1863_v61 = vld [vmem:[#allocation8 + $0xa0] sm:$0xff] }
 0x6be   :  { %v1998_v57 = vpop.f32.mrb[47].mxu0  ;;  %4968 = vmatprep.subr.bf16.mxu0 %v4967_v52  ;;  %v1868_v52 = vld [vmem:[#allocation8 + $0xc8] sm:$0xff]  ;;  %v4985_v60 = vpack.c.bf16 %v1865_v62, %v1863_v61  ;;  %v5005_v61 = vpack.c.bf16 %v1885_v42, %v1883_v34  ;;  %v2366_v34 = vld [vmem:[#allocation8 + $0x418] sm:$0xff] }
 0x6bf   :  { %2148 = vmatprep.mubr.f32.mxu0 %v1998_v57  ;;  %v4987_v3 = vpack.c.bf16 %v1870_v53, %v1868_v52  ;;  %v1874_v57 = vld [vmem:[#allocation8 + $0xf8] sm:$0xff]  ;;  %v1887_v52 = vld [vmem:[#allocation8 + $0x160] sm:$0xff]  ;;  %v1889_v53 = vld [vmem:[#allocation8 + $0x170] sm:$0xff] }
 0x6c0   :  { %2149 = vmatmul.mubr.f32.gmra.mrb[54].mxu0 %v1996_v43  ;;  %v1869_v43 = vld [vmem:[#allocation8 + $0xd0] sm:$0xff] }
 0x6c1   :  { %4970 = vmatpush1.bf16.msra.mxu0 %v4969_v44  ;;  %v2002_v58 = vpop.f32.mrb[48].mxu0  ;;  %v1872_v44 = vld [vmem:[#allocation8 + $0xe8] sm:$0xff] }
 0x6c2   :  { %v2004_v7 = vpop.f32.mrb[49].mxu0  ;;  %4972 = vmatprep.subr.bf16.mxu0 %v4971_v59  ;;  %v4989_v59 = vpack.c.bf16 %v1869_v43, %v1867_v4  ;;  %v4991_v63 = vpack.c.bf16 %v1874_v57, %v1872_v44  ;;  %v5009_v4 = vpack.c.bf16 %v1889_v53, %v1887_v52  ;;  %v1891_v44 = vld [vmem:[#allocation8 + $0x180] sm:$0xff]  ;;  %v1893_v57 = vld [vmem:[#allocation8 + $0x190] sm:$0xff]  ;;  %v2376_v53 = vld [vmem:[#allocation8 + $0x468] sm:$0xff] }
 0x6c3   :  { %2154 = vmatprep.mubr.f32.mxu0 %v2004_v7  ;;  %v1875_v7 = vld [vmem:[#allocation8 + $0x100] sm:$0xff] }
 0x6c4   :  { %2155 = vmatmul.mubr.f32.gmra.mrb[56].mxu0 %v2002_v58  ;;  %v2371_v52 = vld [vmem:[#allocation8 + $0x440] sm:$0xff] }
 0x6c5   :  { %4974 = vmatpush1.bf16.msra.mxu0 %v4973_v1  ;;  %v2008_v12 = vpop.f32.mrb[50].mxu0  ;;  %v4995_v1 = vpack.c.bf16 %v1878_v40, %v1876_v22  ;;  %v1895_v22 = vld [vmem:[#allocation8 + $0x1a0] sm:$0xff]  ;;  %v1897_v40 = vld [vmem:[#allocation8 + $0x1b0] sm:$0xff] }
 0x6c6   :  { %v2010_v14 = vpop.f32.mrb[51].mxu0  ;;  %4976 = vmatprep.subr.bf16.mxu0 %v4975_v5  ;;  %v1877_v5 = vld [vmem:[#allocation8 + $0x110] sm:$0xff] }
 0x6c7   :  { %2160 = vmatprep.mubr.f32.mxu0 %v2010_v14  ;;  %v4997_v10 = vpack.c.bf16 %v1877_v5, %v1875_v7  ;;  %v1884_v14 = vld [vmem:[#allocation8 + $0x148] sm:$0xff]  ;;  %v5017_v7 = vpack.c.bf16 %v1897_v40, %v1895_v22  ;;  %v2379_v40 = vld [vmem:[#allocation8 + $0x480] sm:$0xff] }
 0x6c8   :  { %2161 = vmatmul.mubr.f32.gmra.mrb[58].mxu0 %v2008_v12  ;;  %v1879_v12 = vld [vmem:[#allocation8 + $0x120] sm:$0xff] }
 0x6c9   :  { %4978 = vmatpush1.bf16.msra.mxu0 %v4977_v13  ;;  %2231 = vmatprep.mubr.f32.mxu0 %v1822_v19  ;;  %v1871_v19 = vld [vmem:[#allocation8 + $0xe0] sm:$0xff]  ;;  %v1881_v13 = vld [vmem:[#allocation8 + $0x130] sm:$0xff] }
 0x6ca   :  { %4980 = vmatprep.subr.bf16.mxu0 %v4979_v16  ;;  %v4993_v58 = vpack.c.bf16 %v1873_v15, %v1871_v19  ;;  %v1886_v16 = vld [vmem:[#allocation8 + $0x158] sm:$0xff]  ;;  %v5001_v17 = vpack.c.bf16 %v1881_v13, %v1879_v12  ;;  %v5013_v19 = vpack.c.bf16 %v1893_v57, %v1891_v44  ;;  %v5021_v12 = vpack.c.bf16 %v1901_v9, %v1899_v8  ;;  %v2375_v44 = vld [vmem:[#allocation8 + $0x460] sm:$0xff]  ;;  %v2377_v57 = vld [vmem:[#allocation8 + $0x470] sm:$0xff] }
 0x6cb   :  { %v5003_v31 = vpack.c.bf16 %v1886_v16, %v1884_v14  ;;  %v1903_v14 = vld [vmem:[#allocation8 + $0x1e0] sm:$0xff]  ;;  %v1905_v16 = vld [vmem:[#allocation8 + $0x1f0] sm:$0xff] }
 0x6cc   :  { %v2383_v9 = vld [vmem:[#allocation8 + $0x4a0] sm:$0xff] }
 0x6cd   :  { %4982 = vmatpush1.bf16.msra.mxu0 %v4981_v46  ;;  %v1888_v46 = vld [vmem:[#allocation8 + $0x168] sm:$0xff] }
 0x6ce   :  { %4984 = vmatprep.subr.bf16.mxu0 %v4983_v49  ;;  %v1890_v49 = vld [vmem:[#allocation8 + $0x178] sm:$0xff] }
 0x6cf   :  { %v5007_v62 = vpack.c.bf16 %v1890_v49, %v1888_v46  ;;  %v2368_v46 = vld [vmem:[#allocation8 + $0x428] sm:$0xff]  ;;  %v2367_v49 = vld [vmem:[#allocation8 + $0x420] sm:$0xff] }
 0x6d1   :  { %4986 = vmatpush1.bf16.msra.mxu0 %v4985_v60  ;;  %v1892_v60 = vld [vmem:[#allocation8 + $0x188] sm:$0xff] }
 0x6d2   :  { %4988 = vmatprep.subr.bf16.mxu0 %v4987_v3  ;;  %v1894_v3 = vld [vmem:[#allocation8 + $0x198] sm:$0xff] }
 0x6d3   :  { %v5011_v43 = vpack.c.bf16 %v1894_v3, %v1892_v60  ;;  %v2378_v60 = vld [vmem:[#allocation8 + $0x478] sm:$0xff]  ;;  %v2259_v3 = vld [vmem:[#allocation7 + $0x50] sm:$0xff] }
 0x6d5   :  { %4990 = vmatpush1.bf16.msra.mxu0 %v4989_v59  ;;  %v1896_v59 = vld [vmem:[#allocation8 + $0x1a8] sm:$0xff] }
 0x6d6   :  { %4992 = vmatprep.subr.bf16.mxu0 %v4991_v63  ;;  %v1898_v63 = vld [vmem:[#allocation8 + $0x1b8] sm:$0xff] }
 0x6d7   :  { %v5015_v15 = vpack.c.bf16 %v1898_v63, %v1896_v59  ;;  %v2380_v59 = vld [vmem:[#allocation8 + $0x488] sm:$0xff]  ;;  %v2382_v63 = vld [vmem:[#allocation8 + $0x498] sm:$0xff] }
 0x6d8   :  { %v5051_v22 = vpack.c.bf16 %v2382_v63, %v2380_v59 }
 0x6d9   :  { %4994 = vmatpush1.bf16.msra.mxu0 %v4993_v58  ;;  %v1900_v58 = vld [vmem:[#allocation8 + $0x1c8] sm:$0xff] }
 0x6da   :  { %4996 = vmatprep.subr.bf16.mxu0 %v4995_v1  ;;  %v1902_v1 = vld [vmem:[#allocation8 + $0x1d8] sm:$0xff] }
 0x6db   :  { %v5019_v5 = vpack.c.bf16 %v1902_v1, %v1900_v58  ;;  %v2381_v58 = vld [vmem:[#allocation8 + $0x490] sm:$0xff]  ;;  %v2384_v1 = vld [vmem:[#allocation8 + $0x4a8] sm:$0xff] }
 0x6dd   :  { %4998 = vmatpush1.bf16.msra.mxu0 %v4997_v10  ;;  %v1904_v10 = vld [vmem:[#allocation8 + $0x1e8] sm:$0xff] }
 0x6de   :  { %5000 = vmatprep.subr.bf16.mxu0 %v4999_v11  ;;  %v1906_v11 = vld [vmem:[#allocation8 + $0x1f8] sm:$0xff] }
 0x6df   :  { %v5023_v13 = vpack.c.bf16 %v1906_v11, %v1904_v10  ;;  %v2385_v10 = vld [vmem:[#allocation8 + $0x4b0] sm:$0xff]  ;;  %v2388_v11 = vld [vmem:[#allocation8 + $0x4c8] sm:$0xff] }
 0x6e1   :  { %5002 = vmatpush1.bf16.msra.mxu0 %v5001_v17  ;;  %v5025_v17 = vpack.c.bf16 %v1905_v16, %v1903_v14  ;;  %v2387_v16 = vld [vmem:[#allocation8 + $0x4c0] sm:$0xff] }
 0x6e2   :  { %5004 = vmatprep.subr.bf16.mxu0 %v5003_v31  ;;  %v2364_v31 = vld [vmem:[#allocation8 + $0x408] sm:$0xff] }
 0x6e3   :  { %v5035_v42 = vpack.c.bf16 %v2366_v34, %v2364_v31  ;;  %v2392_v31 = vld [vmem:[#allocation8 + $0x4e8] sm:$0xff]  ;;  %v2394_v34 = vld [vmem:[#allocation8 + $0x4f8] sm:$0xff] }
 0x6e5   :  { %5006 = vmatpush1.bf16.msra.mxu0 %v5005_v61  ;;  %v2372_v61 = vld [vmem:[#allocation8 + $0x448] sm:$0xff] }
 0x6e6   :  { %5008 = vmatprep.subr.bf16.mxu0 %v5007_v62 }
 0x6e9   :  { %5010 = vmatpush1.bf16.msra.mxu0 %v5009_v4 }
 0x6ea   :  { %5012 = vmatprep.subr.bf16.mxu0 %v5011_v43  ;;  %v5047_v43 = vpack.c.bf16 %v2378_v60, %v2376_v53  ;;  %v2406_v53 = vld [vmem:[#allocation8 + $0x558] sm:$0xff] }
 0x6ed   :  { %5014 = vmatpush1.bf16.msra.mxu0 %v5013_v19  ;;  %v2260_v19 = vld [vmem:[#allocation7 + $0x58] sm:$0xff] }
 0x6ee   :  { %5016 = vmatprep.subr.bf16.mxu0 %v5015_v15  ;;  %v5049_v15 = vpack.c.bf16 %v2377_v57, %v2375_v44  ;;  %v2408_v44 = vld [vmem:[#allocation8 + $0x568] sm:$0xff]  ;;  %v2410_v57 = vld [vmem:[#allocation8 + $0x578] sm:$0xff] }
 0x6ef   :  { %v5079_v63 = vpack.c.bf16 %v2410_v57, %v2408_v44  ;;  %v2653_v57 = vld [vmem:[%s7103_s14 + $0x40] sm:$0xff] }
 0x6f1   :  { %5018 = vmatpush1.bf16.msra.mxu0 %v5017_v7  ;;  %v2386_v7 = vld [vmem:[#allocation8 + $0x4b8] sm:$0xff] }
 0x6f2   :  { %5020 = vmatprep.subr.bf16.mxu0 %v5019_v5  ;;  %v5053_v5 = vpack.c.bf16 %v2381_v58, %v2379_v40  ;;  %v5055_v8 = vpack.c.bf16 %v2386_v7, %v2384_v1  ;;  %v2414_v40 = vld [vmem:[#allocation8 + $0x598] sm:$0xff]  ;;  %v2411_v7 = vld [vmem:[#allocation8 + $0x580] sm:$0xff] }
 0x6f5   :  { %5022 = vmatpush1.bf16.msra.mxu0 %v5021_v12  ;;  %v2390_v12 = vld [vmem:[#allocation8 + $0x4d8] sm:$0xff] }
 0x6f6   :  { %5024 = vmatprep.subr.bf16.mxu0 %v5023_v13  ;;  %v5057_v13 = vpack.c.bf16 %v2385_v10, %v2383_v9  ;;  %v5059_v14 = vpack.c.bf16 %v2390_v12, %v2388_v11  ;;  %v2418_v9 = vld [vmem:[#allocation8 + $0x5b8] sm:$0xff]  ;;  %v2415_v12 = vld [vmem:[#allocation8 + $0x5a0] sm:$0xff] }
 0x6f9   :  { %5026 = vmatpush1.bf16.msra.mxu0 %v5025_v17  ;;  %v2389_v17 = vld [vmem:[#allocation8 + $0x4d0] sm:$0xff] }
 0x6fa   :  { %5028 = vmatprep.subr.bf16.mxu0 %v6616_v27  ;;  %v2363_v27 = vld [vmem:[#allocation8 + $0x400] sm:$0xff] }
 0x6fc   :  { %2232 = vmatmul.mubr.f32.vlgmr.msra.gmra.mrb[52].mxu0 %v6645_v18  ;;  %v2365_v18 = vld [vmem:[#allocation8 + $0x410] sm:$0xff] }
 0x6fd   :  { %2237 = vmatprep.mubr.f32.mxu0 %v6649_v21  ;;  %5030 = vmatpush1.bf16.msra.mxu0 %v6614_v24  ;;  %v2370_v21 = vld [vmem:[#allocation8 + $0x438] sm:$0xff]  ;;  %v2257_v24 = vld [vmem:[#allocation7 + $0x40] sm:$0xff] }
 0x6fe   :  { %5032 = vmatprep.subr.bf16.mxu0 %v6622_v2  ;;  %v5037_v2 = vpack.c.bf16 %v2365_v18, %v2363_v27  ;;  %v5063_v27 = vpack.c.bf16 %v2394_v34, %v2392_v31  ;;  %v2391_v18 = vld [vmem:[#allocation8 + $0x4e0] sm:$0xff] }
 0x6ff   :  { %v2419_v34 = vld [vmem:[#allocation8 + $0x5c0] sm:$0xff] }
 0x700   :  { %2238 = vmatmul.mubr.f32.gmra.mrb[54].mxu0 %v6647_v20  ;;  %v5039_v20 = vpack.c.bf16 %v2370_v21, %v2368_v46  ;;  %v2393_v46 = vld [vmem:[#allocation8 + $0x4f0] sm:$0xff]  ;;  %v2396_v21 = vld [vmem:[#allocation8 + $0x508] sm:$0xff] }
 0x701   :  { %2243 = vmatprep.mubr.f32.mxu0 %v6653_v28  ;;  %5034 = vmatpush1.bf16.msra.mxu0 %v6620_v0  ;;  %v2369_v28 = vld [vmem:[#allocation8 + $0x430] sm:$0xff]  ;;  %v2374_v0 = vld [vmem:[#allocation8 + $0x458] sm:$0xff] }
 0x702   :  { %5036 = vmatprep.subr.bf16.mxu0 %v5035_v42  ;;  %v5043_v62 = vpack.c.bf16 %v2374_v0, %v2372_v61  ;;  %v5061_v42 = vpack.c.bf16 %v2389_v17, %v2387_v16  ;;  %v2400_v61 = vld [vmem:[#allocation8 + $0x528] sm:$0xff]  ;;  %v2402_v0 = vld [vmem:[#allocation8 + $0x538] sm:$0xff] }
 0x703   :  { %v2422_v16 = vld [vmem:[#allocation8 + $0x5d8] sm:$0xff] }
 0x704   :  { %2244 = vmatmul.mubr.f32.gmra.mrb[56].mxu0 %v6651_v26  ;;  %v2258_v26 = vld [vmem:[#allocation7 + $0x48] sm:$0xff] }
 0x705   :  { %2249 = vmatprep.mubr.f32.mxu0 %v6657_v29  ;;  %v5041_v29 = vpack.c.bf16 %v2369_v28, %v2367_v49  ;;  %v2395_v49 = vld [vmem:[#allocation8 + $0x500] sm:$0xff]  ;;  %v2397_v28 = vld [vmem:[#allocation8 + $0x510] sm:$0xff] }
 0x708   :  { %2250 = vmatmul.mubr.f32.gmra.mrb[58].mxu0 %v6655_v6  ;;  %v2373_v6 = vld [vmem:[#allocation8 + $0x450] sm:$0xff] }
 0x709   :  { %2337 = vmatprep.mubr.f32.mxu0 %v6063_v36  ;;  %v5045_v4 = vpack.c.bf16 %v2373_v6, %v2371_v52  ;;  %v2401_v52 = vld [vmem:[#allocation8 + $0x530] sm:$0xff]  ;;  %v2404_v6 = vld [vmem:[#allocation8 + $0x548] sm:$0xff] }
 0x70c   :  { %4482 = vmatmul.mubr.msk.f32.vlgmr.msra.gmra.mrb[60].mxu0 %vm244_vm0, %v2257_v24  ;;  %v2398_v24 = vld [vmem:[#allocation8 + $0x518] sm:$0xff] }
 0x70d   :  { %2343 = vmatprep.mubr.f32.mxu0 %v6063_v36  ;;  %5038 = vmatpush1.bf16.msra.mxu0 %v5037_v2  ;;  %v5065_v2 = vpack.c.bf16 %v2393_v46, %v2391_v18  ;;  %v2426_v18 = vld [vmem:[#allocation8 + $0x5f8] sm:$0xff] }
 0x70e   :  { %5040 = vmatprep.subr.bf16.mxu0 %v5039_v20  ;;  %v5067_v20 = vpack.c.bf16 %v2398_v24, %v2396_v21  ;;  %v2423_v24 = vld [vmem:[#allocation8 + $0x5e0] sm:$0xff] }
 0x710   :  { %4483 = vmatmul.mubr.msk.f32.gmra.mrb[62].mxu0 %vm244_vm0, %v2258_v26  ;;  %v5069_v26 = vpack.c.bf16 %v2397_v28, %v2395_v49  ;;  %v2646_v49 = vld [vmem:[%s7103_s14 + $0x8] sm:$0xff]  ;;  %v2648_v28 = vld [vmem:[%s7103_s14 + $0x18] sm:$0xff] }
 0x711   :  { %2349 = vmatprep.mubr.f32.mxu0 %v6063_v36  ;;  %5042 = vmatpush1.bf16.msra.mxu0 %v5041_v29  ;;  %v5071_v29 = vpack.c.bf16 %v2402_v0, %v2400_v61  ;;  %v2645_v61 = vld [vmem:[%s7103_s14] sm:$0xff]  ;;  %v5107_v0 = vpack.c.bf16 %v2648_v28, %v2646_v49  ;;  %v2675_v28 = vld [vmem:[%s7103_s14 + $0xf0] sm:$0xff] }
 0x712   :  { %5044 = vmatprep.subr.bf16.mxu0 %v5043_v62  ;;  %v2399_v62 = vld [vmem:[#allocation8 + $0x520] sm:$0xff] }
 0x713   :  { %v5073_v60 = vpack.c.bf16 %v2401_v52, %v2399_v62  ;;  %v2652_v62 = vld [vmem:[%s7103_s14 + $0x38] sm:$0xff]  ;;  %5108 = vmatprep.subr.bf16.mxu1 %v5107_v0  ;;  %v2673_v49 = vld [vmem:[%s7103_s14 + $0xe0] sm:$0xff] }
 0x714   :  { %4484 = vmatmul.mubr.msk.f32.gmra.mrb[64].mxu0 %vm244_vm0, %v2259_v3  ;;  %v5075_v3 = vpack.c.bf16 %v2406_v53, %v2404_v6  ;;  %v2649_v53 = vld [vmem:[%s7103_s14 + $0x20] sm:$0xff]  ;;  %v2680_v0 = vld [vmem:[%s7103_s14 + $0x118] sm:$0xff] }
 0x715   :  { %2355 = vmatprep.mubr.f32.mxu0 %v6063_v36  ;;  %5046 = vmatpush1.bf16.msra.mxu0 %v5045_v4  ;;  %v2403_v4 = vld [vmem:[#allocation8 + $0x540] sm:$0xff] }
 0x716   :  { %5048 = vmatprep.subr.bf16.mxu0 %v5047_v43  ;;  %v2405_v43 = vld [vmem:[#allocation8 + $0x550] sm:$0xff] }
 0x717   :  { %v5077_v59 = vpack.c.bf16 %v2405_v43, %v2403_v4  ;;  %v2656_v4 = vld [vmem:[%s7103_s14 + $0x58] sm:$0xff] }
 0x718   :  { %4485 = vmatmul.mubr.msk.f32.gmra.mrb[66].mxu0 %vm244_vm0, %v2260_v19  ;;  %v2407_v19 = vld [vmem:[#allocation8 + $0x560] sm:$0xff] }
 0x719   :  { %5050 = vmatpush1.bf16.msra.mxu0 %v5049_v15  ;;  %v2409_v15 = vld [vmem:[#allocation8 + $0x570] sm:$0xff] }
 0x71a   :  { %5052 = vmatprep.subr.bf16.mxu0 %v5051_v22  ;;  %v2412_v22 = vld [vmem:[#allocation8 + $0x588] sm:$0xff]  ;;  %v5081_v58 = vpack.c.bf16 %v2409_v15, %v2407_v19  ;;  %v2660_v19 = vld [vmem:[%s7103_s14 + $0x78] sm:$0xff] }
 0x71b   :  { %v5083_v1 = vpack.c.bf16 %v2414_v40, %v2412_v22  ;;  %v2657_v40 = vld [vmem:[%s7103_s14 + $0x60] sm:$0xff] }
 0x71d   :  { %5054 = vmatpush1.bf16.msra.mxu0 %v5053_v5  ;;  %v2413_v5 = vld [vmem:[#allocation8 + $0x590] sm:$0xff] }
 0x71e   :  { %5056 = vmatprep.subr.bf16.mxu0 %v5055_v8  ;;  %v2416_v8 = vld [vmem:[#allocation8 + $0x5a8] sm:$0xff]  ;;  %v5085_v10 = vpack.c.bf16 %v2413_v5, %v2411_v7  ;;  %v2664_v7 = vld [vmem:[%s7103_s14 + $0x98] sm:$0xff] }
 0x71f   :  { %v5087_v11 = vpack.c.bf16 %v2418_v9, %v2416_v8  ;;  %v2661_v9 = vld [vmem:[%s7103_s14 + $0x80] sm:$0xff] }
 0x721   :  { %5058 = vmatpush1.bf16.msra.mxu0 %v5057_v13  ;;  %v2417_v13 = vld [vmem:[#allocation8 + $0x5b0] sm:$0xff] }
 0x722   :  { %5060 = vmatprep.subr.bf16.mxu0 %v5059_v14  ;;  %v2420_v14 = vld [vmem:[#allocation8 + $0x5c8] sm:$0xff]  ;;  %v5089_v17 = vpack.c.bf16 %v2417_v13, %v2415_v12  ;;  %v2668_v12 = vld [vmem:[%s7103_s14 + $0xb8] sm:$0xff] }
 0x723   :  { %v5091_v31 = vpack.c.bf16 %v2422_v16, %v2420_v14  ;;  %v2665_v16 = vld [vmem:[%s7103_s14 + $0xa0] sm:$0xff] }
 0x725   :  { %5062 = vmatpush1.bf16.msra.mxu0 %v5061_v42  ;;  %v2421_v42 = vld [vmem:[#allocation8 + $0x5d0] sm:$0xff] }
 0x726   :  { %5064 = vmatprep.subr.bf16.mxu0 %v5063_v27  ;;  %v2424_v27 = vld [vmem:[#allocation8 + $0x5e8] sm:$0xff]  ;;  %v5093_v46 = vpack.c.bf16 %v2421_v42, %v2419_v34  ;;  %v2672_v34 = vld [vmem:[%s7103_s14 + $0xd8] sm:$0xff] }
 0x727   :  { %v5095_v21 = vpack.c.bf16 %v2426_v18, %v2424_v27  ;;  %v2669_v18 = vld [vmem:[%s7103_s14 + $0xc0] sm:$0xff] }
 0x729   :  { %5066 = vmatpush1.bf16.msra.mxu0 %v5065_v2  ;;  %v2425_v2 = vld [vmem:[#allocation8 + $0x5f0] sm:$0xff] }
 0x72a   :  { %5068 = vmatprep.subr.bf16.mxu0 %v5067_v20  ;;  %v5097_v20 = vpack.c.bf16 %v2425_v2, %v2423_v24  ;;  %v2676_v24 = vld [vmem:[%s7103_s14 + $0xf8] sm:$0xff] }
 0x72d   :  { %5070 = vmatpush1.bf16.msra.mxu0 %v5069_v26  ;;  %v2647_v26 = vld [vmem:[%s7103_s14 + $0x10] sm:$0xff] }
 0x72e   :  { %5072 = vmatprep.subr.bf16.mxu0 %v5071_v29  ;;  %v2650_v29 = vld [vmem:[%s7103_s14 + $0x28] sm:$0xff]  ;;  %v5109_v52 = vpack.c.bf16 %v2647_v26, %v2645_v61  ;;  %v5137_v26 = vpack.c.bf16 %v2675_v28, %v2673_v49  ;;  %v2699_v49 = vld [vmem:[%s7103_s14 + $0x1b0] sm:$0xff] }
 0x72f   :  { %v5111_v6 = vpack.c.bf16 %v2652_v62, %v2650_v29  ;;  %v2678_v61 = vld [vmem:[%s7103_s14 + $0x108] sm:$0xff]  ;;  %v2677_v62 = vld [vmem:[%s7103_s14 + $0x100] sm:$0xff] }
 0x730   :  { %5110 = vmatpush1.bf16.msra.mxu1 %v5109_v52  ;;  %v5139_v29 = vpack.c.bf16 %v2680_v0, %v2678_v61  ;;  %v2679_v52 = vld [vmem:[%s7103_s14 + $0x110] sm:$0xff]  ;;  %v2702_v61 = vld [vmem:[%s7103_s14 + $0x1c8] sm:$0xff]  ;;  %v2704_v0 = vld [vmem:[%s7103_s14 + $0x1d8] sm:$0xff] }
 0x731   :  { %5074 = vmatpush1.bf16.msra.mxu0 %v5073_v60  ;;  %v2651_v60 = vld [vmem:[%s7103_s14 + $0x30] sm:$0xff]  ;;  %5112 = vmatprep.subr.bf16.mxu1 %v5111_v6  ;;  %v2682_v6 = vld [vmem:[%s7103_s14 + $0x128] sm:$0xff] }
 0x732   :  { %5076 = vmatprep.subr.bf16.mxu0 %v5075_v3  ;;  %v2654_v3 = vld [vmem:[%s7103_s14 + $0x48] sm:$0xff]  ;;  %v5113_v43 = vpack.c.bf16 %v2651_v60, %v2649_v53  ;;  %v2684_v53 = vld [vmem:[%s7103_s14 + $0x138] sm:$0xff]  ;;  %v5141_v60 = vpack.c.bf16 %v2679_v52, %v2677_v62  ;;  %v2703_v62 = vld [vmem:[%s7103_s14 + $0x1d0] sm:$0xff] }
 0x733   :  { %v5115_v44 = vpack.c.bf16 %v2656_v4, %v2654_v3  ;;  %v5143_v3 = vpack.c.bf16 %v2684_v53, %v2682_v6  ;;  %v2681_v4 = vld [vmem:[%s7103_s14 + $0x120] sm:$0xff]  ;;  %v2706_v6 = vld [vmem:[%s7103_s14 + $0x1e8] sm:$0xff]  ;;  %v2708_v53 = vld [vmem:[%s7103_s14 + $0x1f8] sm:$0xff] }
 0x734   :  { %5114 = vmatpush1.bf16.msra.mxu1 %v5113_v43  ;;  %v2683_v43 = vld [vmem:[%s7103_s14 + $0x130] sm:$0xff] }
 0x735   :  { %5078 = vmatpush1.bf16.msra.mxu0 %v5077_v59  ;;  %v2655_v59 = vld [vmem:[%s7103_s14 + $0x50] sm:$0xff]  ;;  %5116 = vmatprep.subr.bf16.mxu1 %v5115_v44  ;;  %v2686_v44 = vld [vmem:[%s7103_s14 + $0x148] sm:$0xff] }
 0x736   :  { %5080 = vmatprep.subr.bf16.mxu0 %v5079_v63  ;;  %v2658_v63 = vld [vmem:[%s7103_s14 + $0x68] sm:$0xff]  ;;  %v5117_v15 = vpack.c.bf16 %v2655_v59, %v2653_v57  ;;  %v2688_v57 = vld [vmem:[%s7103_s14 + $0x158] sm:$0xff]  ;;  %v5145_v59 = vpack.c.bf16 %v2683_v43, %v2681_v4  ;;  %v2707_v4 = vld [vmem:[%s7103_s14 + $0x1f0] sm:$0xff] }
 0x737   :  { %v5119_v22 = vpack.c.bf16 %v2660_v19, %v2658_v63  ;;  %v5147_v63 = vpack.c.bf16 %v2688_v57, %v2686_v44  ;;  %v2685_v19 = vld [vmem:[%s7103_s14 + $0x140] sm:$0xff] }
 0x738   :  { %5118 = vmatpush1.bf16.msra.mxu1 %v5117_v15  ;;  %v2687_v15 = vld [vmem:[%s7103_s14 + $0x150] sm:$0xff]  ;;  %v2524_v44 = vld [vmem:[#allocation10] sm:$0x3] }
 0x739   :  { %5082 = vmatpush1.bf16.msra.mxu0 %v5081_v58  ;;  %v2659_v58 = vld [vmem:[%s7103_s14 + $0x70] sm:$0xff]  ;;  %5120 = vmatprep.subr.bf16.mxu1 %v5119_v22  ;;  %v2690_v22 = vld [vmem:[%s7103_s14 + $0x168] sm:$0xff]  ;;  %v2529_v57 = vrot.slane %v2524_v44, %v6462_v25 }
 0x73a   :  { %5084 = vmatprep.subr.bf16.mxu0 %v5083_v1  ;;  %v2662_v1 = vld [vmem:[%s7103_s14 + $0x88] sm:$0xff]  ;;  %v5121_v5 = vpack.c.bf16 %v2659_v58, %v2657_v40  ;;  %v2692_v40 = vld [vmem:[%s7103_s14 + $0x178] sm:$0xff]  ;;  %v5149_v58 = vpack.c.bf16 %v2687_v15, %v2685_v19 }
 0x73b   :  { %v5123_v8 = vpack.c.bf16 %v2664_v7, %v2662_v1  ;;  %v5151_v1 = vpack.c.bf16 %v2692_v40, %v2690_v22  ;;  %v2689_v7 = vld [vmem:[%s7103_s14 + $0x160] sm:$0xff] }
 0x73c   :  { %5122 = vmatpush1.bf16.msra.mxu1 %v5121_v5  ;;  %v2691_v5 = vld [vmem:[%s7103_s14 + $0x170] sm:$0xff] }
 0x73d   :  { %5086 = vmatpush1.bf16.msra.mxu0 %v5085_v10  ;;  %v2663_v10 = vld [vmem:[%s7103_s14 + $0x90] sm:$0xff]  ;;  %5124 = vmatprep.subr.bf16.mxu1 %v5123_v8  ;;  %v5153_v8 = vpack.c.bf16 %v2691_v5, %v2689_v7 }
 0x73e   :  { %5088 = vmatprep.subr.bf16.mxu0 %v5087_v11  ;;  %v2666_v11 = vld [vmem:[%s7103_s14 + $0xa8] sm:$0xff]  ;;  %v5125_v13 = vpack.c.bf16 %v2663_v10, %v2661_v9 }
 0x73f   :  { %v5127_v14 = vpack.c.bf16 %v2668_v12, %v2666_v11 }
 0x740   :  { %5126 = vmatpush1.bf16.msra.mxu1 %v5125_v13 }
 0x741   :  { %5090 = vmatpush1.bf16.msra.mxu0 %v5089_v17  ;;  %v2667_v17 = vld [vmem:[%s7103_s14 + $0xb0] sm:$0xff]  ;;  %5128 = vmatprep.subr.bf16.mxu1 %v5127_v14 }
 0x742   :  { %5092 = vmatprep.subr.bf16.mxu0 %v5091_v31  ;;  %v2670_v31 = vld [vmem:[%s7103_s14 + $0xc8] sm:$0xff]  ;;  %v5129_v42 = vpack.c.bf16 %v2667_v17, %v2665_v16 }
 0x743   :  { %v5131_v27 = vpack.c.bf16 %v2672_v34, %v2670_v31  ;;  %v2694_v31 = vld [vmem:[%s7103_s14 + $0x188] sm:$0xff]  ;;  %v2696_v34 = vld [vmem:[%s7103_s14 + $0x198] sm:$0xff] }
 0x744   :  { %5130 = vmatpush1.bf16.msra.mxu1 %v5129_v42  ;;  %v5155_v42 = vpack.c.bf16 %v2696_v34, %v2694_v31 }
 0x745   :  { %5094 = vmatpush1.bf16.msra.mxu0 %v5093_v46  ;;  %v2671_v46 = vld [vmem:[%s7103_s14 + $0xd0] sm:$0xff]  ;;  %5132 = vmatprep.subr.bf16.mxu1 %v5131_v27  ;;  %v2693_v27 = vld [vmem:[%s7103_s14 + $0x180] sm:$0xff] }
 0x746   :  { %5096 = vmatprep.subr.bf16.mxu0 %v5095_v21  ;;  %v2674_v21 = vld [vmem:[%s7103_s14 + $0xe8] sm:$0xff]  ;;  %v5133_v2 = vpack.c.bf16 %v2671_v46, %v2669_v18  ;;  %v2695_v18 = vld [vmem:[%s7103_s14 + $0x190] sm:$0xff] }
 0x747   :  { %v5157_v46 = vpack.c.bf16 %v2695_v18, %v2693_v27 }
 0x748   :  { %5134 = vmatpush1.bf16.msra.mxu1 %v5133_v2 }
 0x749   :  { %5098 = vmatpush1.bf16.msra.mxu0 %v5097_v20  ;;  %v5135_v20 = vpack.c.bf16 %v2676_v24, %v2674_v21  ;;  %v2698_v21 = vld [vmem:[%s7103_s14 + $0x1a8] sm:$0xff]  ;;  %v2700_v24 = vld [vmem:[%s7103_s14 + $0x1b8] sm:$0xff] }
 0x74a   :  { %v5159_v2 = vpack.c.bf16 %v2700_v24, %v2698_v21 }
 0x74b   :  { %5136 = vmatprep.subr.bf16.mxu1 %v5135_v20  ;;  %v2697_v20 = vld [vmem:[%s7103_s14 + $0x1a0] sm:$0xff] }
 0x74c   :  { %5138 = vmatpush1.bf16.msra.mxu1 %v5137_v26  ;;  %v5161_v28 = vpack.c.bf16 %v2699_v49, %v2697_v20  ;;  %v5163_v26 = vpack.c.bf16 %v2704_v0, %v2702_v61  ;;  %v3035_v49 = vld [vmem:[#allocation11 + $0x208] sm:$0xff] }
 0x74d   :  { %5140 = vmatprep.subr.bf16.mxu1 %v5139_v29  ;;  %v2701_v29 = vld [vmem:[%s7103_s14 + $0x1c0] sm:$0xff] }
 0x74e   :  { %v5165_v52 = vpack.c.bf16 %v2703_v62, %v2701_v29  ;;  %v3034_v29 = vld [vmem:[#allocation11 + $0x200] sm:$0xff]  ;;  %v3036_v62 = vld [vmem:[#allocation11 + $0x210] sm:$0xff] }
 0x750   :  { %5142 = vmatpush1.bf16.msra.mxu1 %v5141_v60  ;;  %v5167_v60 = vpack.c.bf16 %v2708_v53, %v2706_v6  ;;  %v3041_v6 = vld [vmem:[#allocation11 + $0x238] sm:$0xff] }
 0x751   :  { %5144 = vmatprep.subr.bf16.mxu1 %v5143_v3  ;;  %v2705_v3 = vld [vmem:[%s7103_s14 + $0x1e0] sm:$0xff] }
 0x752   :  { %v5169_v43 = vpack.c.bf16 %v2707_v4, %v2705_v3  ;;  %v2798_v53 = vld [vmem:[%s7099_s10] sm:$0xff] }
 0x754   :  { %5146 = vmatpush1.bf16.msra.mxu1 %v5145_v59  ;;  %v2533_v59 = vrot.slane %v2524_v44, %v6457_v23  ;;  %v3040_v44 = vld [vmem:[#allocation11 + $0x230] sm:$0xff] }
 0x755   :  { %5148 = vmatprep.subr.bf16.mxu1 %v5147_v63 }
 0x758   :  { %5150 = vmatpush1.bf16.msra.mxu1 %v5149_v58 }
 0x759   :  { %5152 = vmatprep.subr.bf16.mxu1 %v5151_v1 }
 0x75c   :  { %5154 = vmatpush1.bf16.msra.mxu1 %v5153_v8 }
 0x75d   :  { %5156 = vmatprep.subr.bf16.mxu1 %v5155_v42 }
 0x760   :  { %5158 = vmatpush1.bf16.msra.mxu1 %v5157_v46 }
 0x761   :  { %5160 = vmatprep.subr.bf16.mxu1 %v5159_v2 }
 0x764   :  { %5162 = vmatpush1.bf16.msra.mxu1 %v5161_v28  ;;  %v3037_v28 = vld [vmem:[#allocation11 + $0x218] sm:$0xff] }
 0x765   :  { %5164 = vmatprep.subr.bf16.mxu1 %v5163_v26  ;;  %v5187_v26 = vpack.c.bf16 %v3037_v28, %v3035_v49 }
 0x768   :  { %5166 = vmatpush1.bf16.msra.mxu1 %v5165_v52  ;;  %v3039_v52 = vld [vmem:[#allocation11 + $0x228] sm:$0xff] }
 0x769   :  { %5168 = vmatprep.subr.bf16.mxu1 %v5167_v60  ;;  %v5189_v60 = vpack.c.bf16 %v3036_v62, %v3034_v29  ;;  %v5191_v4 = vpack.c.bf16 %v3041_v6, %v3039_v52  ;;  %v3077_v29 = vld [vmem:[#allocation11 + $0x358] sm:$0xff]  ;;  %v3074_v6 = vld [vmem:[#allocation11 + $0x340] sm:$0xff] }
 0x76c   :  { %5170 = vmatpush1.bf16.msra.mxu1 %v5169_v43  ;;  %v3038_v43 = vld [vmem:[#allocation11 + $0x220] sm:$0xff] }
 0x7df   :  { %v2339_v9 = vpop.f32.mrb[60].mxu0 }
 0x7e0   :  { %v2341_v10 = vpop.f32.mrb[61].mxu0 }
 0x7e1   :  { %2491 = vmatprep.mubr.f32.mxu0 %v2341_v10 }
 0x7e2   :  { %2492 = vmatmul.mubr.f32.vlgmr.msra.gmra.mrb[52].mxu0 %v2339_v9 }
 0x7e3   :  { %v2345_v11 = vpop.f32.mrb[62].mxu0 }
 0x7e4   :  { %v2347_v12 = vpop.f32.mrb[63].mxu0 }
 0x7e5   :  { %2497 = vmatprep.mubr.f32.mxu0 %v2347_v12 }
 0x7e6   :  { %2498 = vmatmul.mubr.f32.gmra.mrb[54].mxu0 %v2345_v11 }
 0x7e7   :  { %v2351_v13 = vpop.f32.mrb[64].mxu0 }
 0x7e8   :  { %v2353_v14 = vpop.f32.mrb[65].mxu0 }
 0x7e9   :  { %2503 = vmatprep.mubr.f32.mxu0 %v2353_v14 }
 0x7ea   :  { %2504 = vmatmul.mubr.f32.gmra.mrb[56].mxu0 %v2351_v13 }
 0x7eb   :  { %v2357_v16 = vpop.f32.mrb[66].mxu0 }
 0x7ec   :  { %v2359_v17 = vpop.f32.mrb[67].mxu0 }
 0x7ed   :  { %2509 = vmatprep.mubr.f32.mxu0 %v2359_v17 }
 0x7ee   :  { %2510 = vmatmul.mubr.f32.gmra.mrb[58].mxu0 %v2357_v16 }
 0x7ef   :  { %2632 = vmatprep.mubr.f32.mxu0 %v6063_v36 }
 0x8b5   :  { %v2493_v63 = vpop.f32.mrb[52].mxu0 }
 0x8b6   :  { %v2536_v19 = vadd.f32 %v2529_v57, %v2493_v63  ;;  %v2495_v15 = vpop.f32.mrb[53].mxu0  ;;  %v3045_v63 = vld [vmem:[#allocation11 + $0x258] sm:$0xff] }
 0x8b7   :  { %v2537_v22 = vadd.f32 %v2533_v59, %v2495_v15  ;;  %v5193_v15 = vpack.c.bf16 %v3040_v44, %v3038_v43 }
 0x8b8   :  { %v2544_v58 = vadd.f32 %v2536_v19, %v916_v41  ;;  %v2799_v19 = vld [vmem:[%s7099_s10 + $0x8] sm:$0xff] }
 0x8b9   :  { %v2499_v40 = vpop.f32.mrb[54].mxu0  ;;  %v2545_v5 = vadd.f32 %v2537_v22, %v917_v38 }
 0x8ba   :  { %v2538_v1 = vadd.f32 %v2529_v57, %v2499_v40  ;;  %v2501_v7 = vpop.f32.mrb[55].mxu0  ;;  %v2552_v12 = vmax.f32 %v2544_v58, 0.0  ;;  %v3042_v40 = vld [vmem:[#allocation11 + $0x240] sm:$0xff]  ;;  %v3044_v58 = vld [vmem:[#allocation11 + $0x250] sm:$0xff] }
 0x8bb   :  { %v2539_v8 = vadd.f32 %v2533_v59, %v2501_v7  ;;  %v2553_v17 = vmax.f32 %v2545_v5, 0.0  ;;  %v3049_v7 = vld [vmem:[#allocation11 + $0x278] sm:$0xff]  ;;  %v5197_v5 = vpack.c.bf16 %v3044_v58, %v3042_v40  ;;  %v3082_v40 = vld [vmem:[#allocation11 + $0x380] sm:$0xff]  ;;  %v3084_v58 = vld [vmem:[#allocation11 + $0x390] sm:$0xff] }
 0x8bc   :  { %v2546_v9 = vadd.f32 %v2538_v1, %v918_v37  ;;  %v3047_v1 = vld [vmem:[#allocation11 + $0x268] sm:$0xff] }
 0x8bd   :  { %v2547_v10 = vadd.f32 %v2539_v8, %v919_v39  ;;  %v2505_v11 = vpop.f32.mrb[56].mxu0  ;;  %v5199_v8 = vpack.c.bf16 %v3049_v7, %v3047_v1  ;;  %v3087_v1 = vld [vmem:[#allocation11 + $0x3a8] sm:$0xff]  ;;  %v3089_v7 = vld [vmem:[#allocation11 + $0x3b8] sm:$0xff] }
 0x8be   :  { %v2554_v13 = vmax.f32 %v2546_v9, 0.0  ;;  %v2540_v14 = vadd.f32 %v2529_v57, %v2505_v11  ;;  %v2507_v16 = vpop.f32.mrb[57].mxu0  ;;  %v3046_v9 = vld [vmem:[#allocation11 + $0x260] sm:$0xff]  ;;  %v3051_v11 = vld [vmem:[#allocation11 + $0x288] sm:$0xff] }
 0x8bf   :  { %v2555_v32 = vmax.f32 %v2547_v10, 0.0  ;;  %v2541_v41 = vadd.f32 %v2533_v59, %v2507_v16  ;;  %v3048_v10 = vld [vmem:[#allocation11 + $0x270] sm:$0xff]  ;;  %v3050_v16 = vld [vmem:[#allocation11 + $0x280] sm:$0xff] }
 0x8c0   :  { %v5101_v31 = vpack.c.bf16 %v2554_v13, %v2552_v12  ;;  %v2548_v30 = vadd.f32 %v2540_v14, %v920_v56  ;;  %v3053_v12 = vld [vmem:[#allocation11 + $0x298] sm:$0xff]  ;;  %v5201_v13 = vpack.c.bf16 %v3048_v10, %v3046_v9  ;;  %v3086_v9 = vld [vmem:[#allocation11 + $0x3a0] sm:$0xff]  ;;  %v3088_v10 = vld [vmem:[#allocation11 + $0x3b0] sm:$0xff] }
 0x8c1   :  { %v5099_v34 = vpack.c.bf16 %v2555_v32, %v2553_v17  ;;  %v2511_v42 = vpop.f32.mrb[58].mxu0  ;;  %v2549_v35 = vadd.f32 %v2541_v41, %v921_v54  ;;  %v4494_v54 = vld [vmem:[%s7099_s10 + $0x20] sm:$0xff]  ;;  %v5203_v14 = vpack.c.bf16 %v3053_v12, %v3051_v11  ;;  %v3052_v17 = vld [vmem:[#allocation11 + $0x290] sm:$0xff]  ;;  %v3055_v32 = vld [vmem:[#allocation11 + $0x2a8] sm:$0xff] }
 0x8c2   :  { %v2542_v38 = vadd.f32 %v2529_v57, %v2511_v42  ;;  %v2513_v33 = vpop.f32.mrb[59].mxu0  ;;  %v2556_v18 = vmax.f32 %v2548_v30, 0.0  ;;  %v3057_v41 = vld [vmem:[#allocation11 + $0x2b8] sm:$0xff]  ;;  %v3054_v42 = vld [vmem:[#allocation11 + $0x2a0] sm:$0xff]  ;;  %v3056_v30 = vld [vmem:[#allocation11 + $0x2b0] sm:$0xff] }
 0x8c3   :  { %v2543_v37 = vadd.f32 %v2533_v59, %v2513_v33  ;;  %5100 = vmatprep.subr.bf16.mxu0 %v5099_v34  ;;  %5172 = vmatprep.subr.bf16.mxu1 %v5099_v34  ;;  %v2557_v21 = vmax.f32 %v2549_v35, 0.0  ;;  %v3043_v59 = vld [vmem:[#allocation11 + $0x248] sm:$0xff]  ;;  %v3061_v33 = vld [vmem:[#allocation11 + $0x2d8] sm:$0xff]  ;;  %v5209_v35 = vpack.c.bf16 %v3056_v30, %v3054_v42  ;;  %v3094_v42 = vld [vmem:[#allocation11 + $0x3e0] sm:$0xff] }
 0x8c4   :  { %v2550_v39 = vadd.f32 %v2542_v38, %v922_v51  ;;  %5102 = vmatpush1.bf16.msra.mxu0 %v5101_v31  ;;  %v4491_v51 = vld [vmem:[%s7099_s10 + $0x18] sm:$0xff]  ;;  %v5195_v22 = vpack.c.bf16 %v3045_v63, %v3043_v59  ;;  %v3059_v38 = vld [vmem:[#allocation11 + $0x2c8] sm:$0xff] }
 0x8c5   :  { %v2551_v27 = vadd.f32 %v2543_v37, %v923_v55  ;;  %v4495_v55 = vld [vmem:[%s7099_s10 + $0x28] sm:$0xff]  ;;  %v5211_v37 = vpack.c.bf16 %v3061_v33, %v3059_v38  ;;  %v3080_v59 = vld [vmem:[#allocation11 + $0x370] sm:$0xff]  ;;  %v3093_v12 = vld [vmem:[#allocation11 + $0x3d8] sm:$0xff] }
 0x8c6   :  { %v2558_v46 = vmax.f32 %v2550_v39, 0.0  ;;  %v3058_v39 = vld [vmem:[#allocation11 + $0x2c0] sm:$0xff]  ;;  %v3083_v63 = vld [vmem:[#allocation11 + $0x388] sm:$0xff]  ;;  %v3096_v30 = vld [vmem:[#allocation11 + $0x3f0] sm:$0xff] }
 0x8c7   :  { %v2559_v47 = vmax.f32 %v2551_v27, 0.0  ;;  %v3060_v27 = vld [vmem:[#allocation11 + $0x2d0] sm:$0xff]  ;;  %v3091_v11 = vld [vmem:[#allocation11 + $0x3c8] sm:$0xff]  ;;  %v2886_v33 = vld [vmem:[#allocation11 + $0x18] sm:$0xff] }
 0x8c8   :  { %v5105_v56 = vpack.c.bf16 %v2558_v46, %v2556_v18  ;;  %v3063_v18 = vld [vmem:[#allocation11 + $0x2e8] sm:$0xff]  ;;  %v3065_v46 = vld [vmem:[#allocation11 + $0x2f8] sm:$0xff] }
 0x8c9   :  { %v5103_v24 = vpack.c.bf16 %v2559_v47, %v2557_v21  ;;  %v5213_v21 = vpack.c.bf16 %v3060_v27, %v3058_v39  ;;  %v5215_v47 = vpack.c.bf16 %v3065_v46, %v3063_v18  ;;  %v2884_v38 = vld [vmem:[#allocation11 + $0x8] sm:$0xff]  ;;  %v2883_v39 = vld [vmem:[#allocation11] sm:$0xff]  ;;  %v2885_v27 = vld [vmem:[#allocation11 + $0x10] sm:$0xff] }
 0x8ca   :  { %v2888_v18 = vld [vmem:[#allocation11 + $0x28] sm:$0xff]  ;;  %v2890_v46 = vld [vmem:[#allocation11 + $0x38] sm:$0xff] }
 0x8cb   :  { %5104 = vmatprep.subr.bf16.mxu0 %v5103_v24 }
 0x8cc   :  { %5106 = vmatpush1.bf16.msra.mxu0 %v5105_v56 }
 0x8cd   :  { %5180 = vmatprep.subr.bf16.mxu0 %v5099_v34 }
 0x8cf   :  { %4486 = vmatmul.mubr.msk.f32.vlgmr.msra.gmra.mrb[68].mxu0 %vm244_vm0, %v2560_v45  ;;  %v3067_v45 = vld [vmem:[#allocation11 + $0x308] sm:$0xff] }
 0x8d0   :  { %5182 = vmatpush1.bf16.msra.mxu0 %v5101_v31  ;;  %2638 = vmatprep.mubr.f32.mxu0 %v6063_v36 }
 0x8d1   :  { %5184 = vmatprep.subr.bf16.mxu0 %v5103_v24 }
 0x8d3   :  { %4487 = vmatmul.mubr.msk.f32.gmra.mrb[70].mxu0 %vm244_vm0, %v2561_v48  ;;  %v3069_v48 = vld [vmem:[#allocation11 + $0x318] sm:$0xff] }
 0x8d4   :  { %5186 = vmatpush1.bf16.msra.mxu0 %v5105_v56  ;;  %3020 = vmatprep.mubr.f32.mxu0 %v6063_v36 }
 0x8d5   :  { %5316 = vmatprep.subr.bf16.mxu0 %v5099_v34  ;;  %v5207_v34 = vpack.c.bf16 %v3057_v41, %v3055_v32  ;;  %v3095_v32 = vld [vmem:[#allocation11 + $0x3e8] sm:$0xff]  ;;  %v3097_v41 = vld [vmem:[#allocation11 + $0x3f8] sm:$0xff] }
 0x8d7   :  { %4492 = vmatmul.mubr.msk.f32.vlgmr.msra.gmra.mrb[72].mxu0 %vm244_vm0, %v4490_v50 }
 0x8d8   :  { %5318 = vmatpush1.bf16.msra.mxu0 %v5101_v31  ;;  %3026 = vmatprep.mubr.f32.mxu0 %v6063_v36 }
 0x8d9   :  { %5320 = vmatprep.subr.bf16.mxu0 %v5103_v24 }
 0x8db   :  { %4493 = vmatmul.mubr.msk.f32.gmra.mrb[74].mxu0 %vm244_vm0, %v4491_v51  ;;  %v5219_v51 = vpack.c.bf16 %v3069_v48, %v3067_v45  ;;  %v2892_v45 = vld [vmem:[#allocation11 + $0x48] sm:$0xff]  ;;  %v2894_v48 = vld [vmem:[#allocation11 + $0x58] sm:$0xff] }
 0x8dc   :  { %5322 = vmatpush1.bf16.msra.mxu0 %v5105_v56  ;;  %3325 = vmatprep.mubr.f32.mxu0 %v6063_v36 }
 0x8df   :  { %4496 = vmatmul.mubr.msk.f32.vlgmr.msra.gmra.mrb[76].mxu0 %vm244_vm0, %v4494_v54  ;;  %v3066_v54 = vld [vmem:[#allocation11 + $0x300] sm:$0xff] }
 0x8e0   :  { %3331 = vmatprep.mubr.f32.mxu0 %v6063_v36 }
 0x8e3   :  { %4497 = vmatmul.mubr.msk.f32.gmra.mrb[78].mxu0 %vm244_vm0, %v4495_v55  ;;  %v3068_v55 = vld [vmem:[#allocation11 + $0x310] sm:$0xff] }
 0x8e4   :  { %3577 = vmatprep.mubr.f32.mxu0 %v6063_v36  ;;  %v5221_v49 = vpack.c.bf16 %v3068_v55, %v3066_v54  ;;  %v2891_v54 = vld [vmem:[#allocation11 + $0x40] sm:$0xff]  ;;  %v2893_v55 = vld [vmem:[#allocation11 + $0x50] sm:$0xff] }
 0x9a2   :  { %v2634_v2 = vpop.f32.mrb[68].mxu0 }
 0x9a3   :  { %v2636_v20 = vpop.f32.mrb[69].mxu0 }
 0x9a4   :  { %2785 = vmatprep.mubr.f32.mxu1 %v2636_v20  ;;  %v3073_v20 = vld [vmem:[#allocation11 + $0x338] sm:$0xff] }
 0x9a5   :  { %2786 = vmatmul.mubr.f32.vlgmr.msra.gmra.mrb[24].mxu1 %v2634_v2  ;;  %v3071_v2 = vld [vmem:[#allocation11 + $0x328] sm:$0xff] }
 0x9a6   :  { %5174 = vmatpush1.bf16.msra.mxu1 %v5101_v31  ;;  %v2640_v61 = vpop.f32.mrb[70].mxu0  ;;  %v5205_v31 = vpack.c.bf16 %v3052_v17, %v3050_v16  ;;  %v5223_v28 = vpack.c.bf16 %v3073_v20, %v3071_v2  ;;  %v3090_v16 = vld [vmem:[#allocation11 + $0x3c0] sm:$0xff]  ;;  %v3092_v17 = vld [vmem:[#allocation11 + $0x3d0] sm:$0xff]  ;;  %v2896_v2 = vld [vmem:[#allocation11 + $0x68] sm:$0xff] }
 0x9a7   :  { %5176 = vmatprep.subr.bf16.mxu1 %v5103_v24  ;;  %v2642_v0 = vpop.f32.mrb[71].mxu0  ;;  %v3064_v24 = vld [vmem:[#allocation11 + $0x2f0] sm:$0xff]  ;;  %v2898_v20 = vld [vmem:[#allocation11 + $0x78] sm:$0xff] }
 0x9a8   :  { %2791 = vmatprep.mubr.f32.mxu1 %v2642_v0  ;;  %v3072_v0 = vld [vmem:[#allocation11 + $0x330] sm:$0xff] }
 0x9a9   :  { %2792 = vmatmul.mubr.f32.gmra.mrb[26].mxu1 %v2640_v61  ;;  %v3070_v61 = vld [vmem:[#allocation11 + $0x320] sm:$0xff] }
 0x9aa   :  { %5178 = vmatpush1.bf16.msra.mxu1 %v5105_v56  ;;  %2870 = vmatprep.mubr.f32.mxu1 %v6063_v36  ;;  %v6923_v3 = vpop.f32.mrb[72].mxu0  ;;  %v3062_v56 = vld [vmem:[#allocation11 + $0x2e0] sm:$0xff]  ;;  %v5225_v62 = vpack.c.bf16 %v3072_v0, %v3070_v61  ;;  %v2897_v0 = vld [vmem:[#allocation11 + $0x70] sm:$0xff] }
 0x9ab   :  { %5188 = vmatprep.subr.bf16.mxu1 %v5187_v26  ;;  %v3024_v57 = vpop.f32.mrb[73].mxu0  ;;  %v5217_v50 = vpack.c.bf16 %v3064_v24, %v3062_v56  ;;  %v3075_v26 = vld [vmem:[#allocation11 + $0x348] sm:$0xff]  ;;  %v2887_v56 = vld [vmem:[#allocation11 + $0x20] sm:$0xff]  ;;  %v2889_v24 = vld [vmem:[#allocation11 + $0x30] sm:$0xff] }
 0x9ac   :  { %v5227_v52 = vpack.c.bf16 %v3077_v29, %v3075_v26  ;;  %v2895_v61 = vld [vmem:[#allocation11 + $0x60] sm:$0xff]  ;;  %v2900_v26 = vld [vmem:[#allocation11 + $0x88] sm:$0xff]  ;;  %v2902_v29 = vld [vmem:[#allocation11 + $0x98] sm:$0xff] }
 0x9ad   :  { %4488 = vmatmul.mubr.msk.f32.vlgmr.msra.gmra.mrb[28].mxu1 %vm244_vm0, %v2798_v53  ;;  %v3076_v53 = vld [vmem:[#allocation11 + $0x350] sm:$0xff] }
 0x9ae   :  { %2876 = vmatprep.mubr.f32.mxu1 %v6063_v36  ;;  %5190 = vmatpush1.bf16.msra.mxu1 %v5189_v60  ;;  %v3079_v60 = vld [vmem:[#allocation11 + $0x368] sm:$0xff]  ;;  %v5229_v43 = vpack.c.bf16 %v3076_v53, %v3074_v6  ;;  %v2901_v6 = vld [vmem:[#allocation11 + $0x90] sm:$0xff] }
 0x9af   :  { %5192 = vmatprep.subr.bf16.mxu1 %v5191_v4  ;;  %v3081_v4 = vld [vmem:[#allocation11 + $0x378] sm:$0xff]  ;;  %v2904_v53 = vld [vmem:[#allocation11 + $0xa8] sm:$0xff] }
 0x9b0   :  { %v5231_v44 = vpack.c.bf16 %v3081_v4, %v3079_v60  ;;  %v2906_v60 = vld [vmem:[#allocation11 + $0xb8] sm:$0xff] }
 0x9b1   :  { %4489 = vmatmul.mubr.msk.f32.gmra.mrb[30].mxu1 %vm244_vm0, %v2799_v19  ;;  %v3085_v19 = vld [vmem:[#allocation11 + $0x398] sm:$0xff] }
 0x9b2   :  { %5194 = vmatpush1.bf16.msra.mxu1 %v5193_v15  ;;  %3162 = vmatprep.mubr.f32.mxu1 %v3024_v57  ;;  %v3078_v57 = vld [vmem:[#allocation11 + $0x360] sm:$0xff] }
 0x9b3   :  { %5196 = vmatprep.subr.bf16.mxu1 %v5195_v22  ;;  %v5233_v15 = vpack.c.bf16 %v3080_v59, %v3078_v57  ;;  %v5235_v22 = vpack.c.bf16 %v3085_v19, %v3083_v63  ;;  %v2905_v57 = vld [vmem:[#allocation11 + $0xb0] sm:$0xff]  ;;  %v3028_v59 = vpop.f32.mrb[74].mxu0  ;;  %v2908_v63 = vld [vmem:[#allocation11 + $0xc8] sm:$0xff]  ;;  %v2910_v19 = vld [vmem:[#allocation11 + $0xd8] sm:$0xff] }
 0x9b6   :  { %5198 = vmatpush1.bf16.msra.mxu1 %v5197_v5  ;;  %v5237_v5 = vpack.c.bf16 %v3084_v58, %v3082_v40  ;;  %v5275_v40 = vpack.c.bf16 %v2910_v19, %v2908_v63  ;;  %v2907_v58 = vld [vmem:[#allocation11 + $0xc0] sm:$0xff]  ;;  %v3340_v63 = vld [vmem:[#allocation11 + $0x408] sm:$0xff]  ;;  %v3342_v19 = vld [vmem:[#allocation11 + $0x418] sm:$0xff] }
 0x9b7   :  { %5200 = vmatprep.subr.bf16.mxu1 %v5199_v8  ;;  %v5239_v8 = vpack.c.bf16 %v3089_v7, %v3087_v1  ;;  %v2909_v1 = vld [vmem:[#allocation11 + $0xd0] sm:$0xff]  ;;  %v2912_v7 = vld [vmem:[#allocation11 + $0xe8] sm:$0xff] }
 0x9ba   :  { %5202 = vmatpush1.bf16.msra.mxu1 %v5201_v13  ;;  %v5241_v13 = vpack.c.bf16 %v3088_v10, %v3086_v9  ;;  %v2911_v10 = vld [vmem:[#allocation11 + $0xe0] sm:$0xff] }
 0x9bb   :  { %5204 = vmatprep.subr.bf16.mxu1 %v5203_v14  ;;  %v5243_v14 = vpack.c.bf16 %v3093_v12, %v3091_v11  ;;  %v2913_v11 = vld [vmem:[#allocation11 + $0xf0] sm:$0xff]  ;;  %v2916_v12 = vld [vmem:[#allocation11 + $0x108] sm:$0xff] }
 0x9be   :  { %5206 = vmatpush1.bf16.msra.mxu1 %v5205_v31  ;;  %v5245_v31 = vpack.c.bf16 %v3092_v17, %v3090_v16  ;;  %v2915_v17 = vld [vmem:[#allocation11 + $0x100] sm:$0xff] }
 0x9bf   :  { %5208 = vmatprep.subr.bf16.mxu1 %v5207_v34  ;;  %v5247_v34 = vpack.c.bf16 %v3097_v41, %v3095_v32  ;;  %v2917_v32 = vld [vmem:[#allocation11 + $0x110] sm:$0xff]  ;;  %v2920_v41 = vld [vmem:[#allocation11 + $0x128] sm:$0xff] }
 0x9c2   :  { %5210 = vmatpush1.bf16.msra.mxu1 %v5209_v35  ;;  %v5249_v35 = vpack.c.bf16 %v3096_v30, %v3094_v42  ;;  %v2919_v30 = vld [vmem:[#allocation11 + $0x120] sm:$0xff] }
 0x9c3   :  { %5212 = vmatprep.subr.bf16.mxu1 %v5211_v37  ;;  %v5251_v37 = vpack.c.bf16 %v2886_v33, %v2884_v38  ;;  %v2921_v38 = vld [vmem:[#allocation11 + $0x130] sm:$0xff]  ;;  %v2924_v33 = vld [vmem:[#allocation11 + $0x148] sm:$0xff] }
 0x9c6   :  { %5214 = vmatpush1.bf16.msra.mxu1 %v5213_v21  ;;  %v5253_v21 = vpack.c.bf16 %v2885_v27, %v2883_v39  ;;  %v2923_v27 = vld [vmem:[#allocation11 + $0x140] sm:$0xff] }
 0x9c7   :  { %5216 = vmatprep.subr.bf16.mxu1 %v5215_v47  ;;  %v5255_v47 = vpack.c.bf16 %v2890_v46, %v2888_v18  ;;  %v2925_v18 = vld [vmem:[#allocation11 + $0x150] sm:$0xff]  ;;  %v2928_v46 = vld [vmem:[#allocation11 + $0x168] sm:$0xff] }
 0x9ca   :  { %5218 = vmatpush1.bf16.msra.mxu1 %v5217_v50  ;;  %v5257_v50 = vpack.c.bf16 %v2889_v24, %v2887_v56  ;;  %v2927_v24 = vld [vmem:[#allocation11 + $0x160] sm:$0xff] }
 0x9cb   :  { %5220 = vmatprep.subr.bf16.mxu1 %v5219_v51  ;;  %v5259_v51 = vpack.c.bf16 %v2894_v48, %v2892_v45  ;;  %v2929_v45 = vld [vmem:[#allocation11 + $0x170] sm:$0xff]  ;;  %v2932_v48 = vld [vmem:[#allocation11 + $0x188] sm:$0xff] }
 0x9ce   :  { %5222 = vmatpush1.bf16.msra.mxu1 %v5221_v49  ;;  %v5261_v49 = vpack.c.bf16 %v2893_v55, %v2891_v54  ;;  %v2931_v55 = vld [vmem:[#allocation11 + $0x180] sm:$0xff] }
 0x9cf   :  { %5224 = vmatprep.subr.bf16.mxu1 %v5223_v28  ;;  %v5263_v28 = vpack.c.bf16 %v2898_v20, %v2896_v2  ;;  %v2933_v2 = vld [vmem:[#allocation11 + $0x190] sm:$0xff]  ;;  %v2936_v20 = vld [vmem:[#allocation11 + $0x1a8] sm:$0xff] }
 0x9d2   :  { %5226 = vmatpush1.bf16.msra.mxu1 %v5225_v62  ;;  %v5265_v62 = vpack.c.bf16 %v2897_v0, %v2895_v61  ;;  %v2935_v0 = vld [vmem:[#allocation11 + $0x1a0] sm:$0xff] }
 0x9d3   :  { %5228 = vmatprep.subr.bf16.mxu1 %v5227_v52  ;;  %v2899_v52 = vld [vmem:[#allocation11 + $0x80] sm:$0xff] }
 0x9d4   :  { %v5269_v4 = vpack.c.bf16 %v2901_v6, %v2899_v52  ;;  %v2939_v6 = vld [vmem:[#allocation11 + $0x1c0] sm:$0xff] }
 0x9d6   :  { %5230 = vmatpush1.bf16.msra.mxu1 %v5229_v43  ;;  %v5271_v43 = vpack.c.bf16 %v2906_v60, %v2904_v53  ;;  %v2941_v53 = vld [vmem:[#allocation11 + $0x1d0] sm:$0xff]  ;;  %v2944_v60 = vld [vmem:[#allocation11 + $0x1e8] sm:$0xff] }
 0x9d7   :  { %5232 = vmatprep.subr.bf16.mxu1 %v5231_v44  ;;  %v2903_v44 = vld [vmem:[#allocation11 + $0xa0] sm:$0xff] }
 0x9da   :  { %5234 = vmatpush1.bf16.msra.mxu1 %v5233_v15  ;;  %v3030_v15 = vpop.f32.mrb[75].mxu0 }
 0x9db   :  { %5236 = vmatprep.subr.bf16.mxu1 %v5235_v22  ;;  %v5273_v22 = vpack.c.bf16 %v2905_v57, %v2903_v44  ;;  %v2943_v57 = vld [vmem:[#allocation11 + $0x1e0] sm:$0xff] }
 0x9de   :  { %5238 = vmatpush1.bf16.msra.mxu1 %v5237_v5  ;;  %v2914_v5 = vld [vmem:[#allocation11 + $0xf8] sm:$0xff] }
 0x9df   :  { %5240 = vmatprep.subr.bf16.mxu1 %v5239_v8  ;;  %v5277_v8 = vpack.c.bf16 %v2909_v1, %v2907_v58  ;;  %v5279_v9 = vpack.c.bf16 %v2914_v5, %v2912_v7  ;;  %v3339_v5 = vld [vmem:[#allocation11 + $0x400] sm:$0xff] }
 0x9e2   :  { %5242 = vmatpush1.bf16.msra.mxu1 %v5241_v13  ;;  %v2918_v13 = vld [vmem:[#allocation11 + $0x118] sm:$0xff] }
 0x9e3   :  { %5244 = vmatprep.subr.bf16.mxu1 %v5243_v14  ;;  %v5281_v14 = vpack.c.bf16 %v2913_v11, %v2911_v10  ;;  %v5283_v16 = vpack.c.bf16 %v2918_v13, %v2916_v12  ;;  %v3346_v10 = vld [vmem:[#allocation11 + $0x438] sm:$0xff] }
 0x9e6   :  { %5246 = vmatpush1.bf16.msra.mxu1 %v5245_v31  ;;  %v2922_v31 = vld [vmem:[#allocation11 + $0x138] sm:$0xff] }
 0x9e7   :  { %5248 = vmatprep.subr.bf16.mxu1 %v5247_v34  ;;  %v5285_v34 = vpack.c.bf16 %v2917_v32, %v2915_v17  ;;  %v5287_v42 = vpack.c.bf16 %v2922_v31, %v2920_v41  ;;  %v3345_v17 = vld [vmem:[#allocation11 + $0x430] sm:$0xff]  ;;  %v3348_v32 = vld [vmem:[#allocation11 + $0x448] sm:$0xff]  ;;  %v3350_v41 = vld [vmem:[#allocation11 + $0x458] sm:$0xff] }
 0x9ea   :  { %5250 = vmatpush1.bf16.msra.mxu1 %v5249_v35  ;;  %v2926_v35 = vld [vmem:[#allocation11 + $0x158] sm:$0xff] }
 0x9eb   :  { %5252 = vmatprep.subr.bf16.mxu1 %v5251_v37  ;;  %v5289_v37 = vpack.c.bf16 %v2921_v38, %v2919_v30  ;;  %v5291_v39 = vpack.c.bf16 %v2926_v35, %v2924_v33  ;;  %v3347_v30 = vld [vmem:[#allocation11 + $0x440] sm:$0xff]  ;;  %v3349_v38 = vld [vmem:[#allocation11 + $0x450] sm:$0xff]  ;;  %v3352_v35 = vld [vmem:[#allocation11 + $0x468] sm:$0xff] }
 0x9ed   :  { %3163 = vmatmul.mubr.f32.vlgmr.msra.gmra.mrb[32].mxu1 %v6923_v3  ;;  %v5267_v3 = vpack.c.bf16 %v2902_v29, %v2900_v26  ;;  %v2937_v26 = vld [vmem:[#allocation11 + $0x1b0] sm:$0xff]  ;;  %v2940_v29 = vld [vmem:[#allocation11 + $0x1c8] sm:$0xff] }
 0x9ee   :  { %5254 = vmatpush1.bf16.msra.mxu1 %v5253_v21  ;;  %3168 = vmatprep.mubr.f32.mxu1 %v3030_v15  ;;  %v2930_v21 = vld [vmem:[#allocation11 + $0x178] sm:$0xff] }
 0x9ef   :  { %5256 = vmatprep.subr.bf16.mxu1 %v5255_v47  ;;  %v5293_v47 = vpack.c.bf16 %v2925_v18, %v2923_v27  ;;  %v5295_v56 = vpack.c.bf16 %v2930_v21, %v2928_v46  ;;  %v3351_v18 = vld [vmem:[#allocation11 + $0x460] sm:$0xff]  ;;  %v3353_v46 = vld [vmem:[#allocation11 + $0x470] sm:$0xff]  ;;  %v3356_v21 = vld [vmem:[#allocation11 + $0x488] sm:$0xff] }
 0x9f1   :  { %3169 = vmatmul.mubr.f32.gmra.mrb[34].mxu1 %v3028_v59  ;;  %v2945_v59 = vld [vmem:[#allocation11 + $0x1f0] sm:$0xff] }
 0x9f2   :  { %5258 = vmatpush1.bf16.msra.mxu1 %v5257_v50  ;;  %v2934_v50 = vld [vmem:[#allocation11 + $0x198] sm:$0xff]  ;;  %v5313_v15 = vpack.c.bf16 %v2945_v59, %v2943_v57  ;;  %v3371_v59 = vld [vmem:[#allocation11 + $0x500] sm:$0xff] }
 0x9f3   :  { %5260 = vmatprep.subr.bf16.mxu1 %v5259_v51  ;;  %v5297_v51 = vpack.c.bf16 %v2929_v45, %v2927_v24  ;;  %v5299_v54 = vpack.c.bf16 %v2934_v50, %v2932_v48  ;;  %v3355_v45 = vld [vmem:[#allocation11 + $0x480] sm:$0xff]  ;;  %v3357_v48 = vld [vmem:[#allocation11 + $0x490] sm:$0xff]  ;;  %v3360_v50 = vld [vmem:[#allocation11 + $0x4a8] sm:$0xff] }
 0x9f6   :  { %5262 = vmatpush1.bf16.msra.mxu1 %v5261_v49  ;;  %v2938_v49 = vld [vmem:[#allocation11 + $0x1b8] sm:$0xff] }
 0x9f7   :  { %5264 = vmatprep.subr.bf16.mxu1 %v5263_v28  ;;  %v5301_v28 = vpack.c.bf16 %v2933_v2, %v2931_v55  ;;  %v5303_v61 = vpack.c.bf16 %v2938_v49, %v2936_v20  ;;  %v3359_v2 = vld [vmem:[#allocation11 + $0x4a0] sm:$0xff]  ;;  %v3361_v20 = vld [vmem:[#allocation11 + $0x4b0] sm:$0xff]  ;;  %v3364_v49 = vld [vmem:[#allocation11 + $0x4c8] sm:$0xff] }
 0x9fa   :  { %5266 = vmatpush1.bf16.msra.mxu1 %v5265_v62  ;;  %v2942_v62 = vld [vmem:[#allocation11 + $0x1d8] sm:$0xff] }
 0x9fb   :  { %5268 = vmatprep.subr.bf16.mxu1 %v5267_v3  ;;  %v5305_v3 = vpack.c.bf16 %v2937_v26, %v2935_v0  ;;  %v5307_v52 = vpack.c.bf16 %v2942_v62, %v2940_v29  ;;  %v3363_v26 = vld [vmem:[#allocation11 + $0x4c0] sm:$0xff]  ;;  %v3365_v29 = vld [vmem:[#allocation11 + $0x4d0] sm:$0xff]  ;;  %v3368_v62 = vld [vmem:[#allocation11 + $0x4e8] sm:$0xff] }
 0x9fe   :  { %5270 = vmatpush1.bf16.msra.mxu1 %v5269_v4  ;;  %v2946_v4 = vld [vmem:[#allocation11 + $0x1f8] sm:$0xff] }
 0x9ff   :  { %5272 = vmatprep.subr.bf16.mxu1 %v5271_v43  ;;  %v5309_v43 = vpack.c.bf16 %v2941_v53, %v2939_v6  ;;  %v5311_v44 = vpack.c.bf16 %v2946_v4, %v2944_v60  ;;  %v3367_v53 = vld [vmem:[#allocation11 + $0x4e0] sm:$0xff]  ;;  %v3369_v60 = vld [vmem:[#allocation11 + $0x4f0] sm:$0xff]  ;;  %v3372_v4 = vld [vmem:[#allocation11 + $0x508] sm:$0xff] }
 0xa02   :  { %5274 = vmatpush1.bf16.msra.mxu1 %v5273_v22  ;;  %v5323_v22 = vpack.c.bf16 %v3342_v19, %v3340_v63  ;;  %v3373_v63 = vld [vmem:[#allocation11 + $0x510] sm:$0xff]  ;;  %v3376_v19 = vld [vmem:[#allocation11 + $0x528] sm:$0xff] }
 0xa03   :  { %5276 = vmatprep.subr.bf16.mxu1 %v5275_v40  ;;  %v6932_v40 = vpop.f32.mrb[76].mxu0 }
 0xa04   :  { %v3329_v58 = vpop.f32.mrb[77].mxu0 }
 0xa05   :  { %v6934_v1 = vpop.f32.mrb[78].mxu0 }
 0xa06   :  { %5278 = vmatpush1.bf16.msra.mxu1 %v5277_v8  ;;  %v6936_v7 = vpop.f32.mrb[79].mxu0  ;;  %v3341_v8 = vld [vmem:[#allocation11 + $0x410] sm:$0xff] }
 0xa07   :  { %5280 = vmatprep.subr.bf16.mxu1 %v5279_v9  ;;  %v3344_v9 = vld [vmem:[#allocation11 + $0x428] sm:$0xff]  ;;  %v5325_v12 = vpack.c.bf16 %v3341_v8, %v3339_v5  ;;  %v3375_v5 = vld [vmem:[#allocation11 + $0x520] sm:$0xff]  ;;  %v3377_v8 = vld [vmem:[#allocation11 + $0x530] sm:$0xff] }
 0xa0a   :  { %5282 = vmatpush1.bf16.msra.mxu1 %v5281_v14  ;;  %v5327_v14 = vpack.c.bf16 %v3346_v10, %v3344_v9  ;;  %v3380_v9 = vld [vmem:[#allocation11 + $0x548] sm:$0xff]  ;;  %v3382_v10 = vld [vmem:[#allocation11 + $0x558] sm:$0xff] }
 0xa0b   :  { %5284 = vmatprep.subr.bf16.mxu1 %v5283_v16  ;;  %v3343_v16 = vld [vmem:[#allocation11 + $0x420] sm:$0xff] }
 0xa0c   :  { %v5329_v31 = vpack.c.bf16 %v3345_v17, %v3343_v16  ;;  %v3384_v16 = vld [vmem:[#allocation11 + $0x568] sm:$0xff]  ;;  %v3386_v17 = vld [vmem:[#allocation11 + $0x578] sm:$0xff] }
 0xa0e   :  { %5286 = vmatpush1.bf16.msra.mxu1 %v5285_v34 }
 0xa0f   :  { %5288 = vmatprep.subr.bf16.mxu1 %v5287_v42  ;;  %v5331_v42 = vpack.c.bf16 %v3350_v41, %v3348_v32  ;;  %v5367_v41 = vpack.c.bf16 %v3386_v17, %v3384_v16  ;;  %v3764_v16 = vld [vmem:[#allocation17 + $0x2b8] sm:$0xff] }
 0xa12   :  { %5290 = vmatpush1.bf16.msra.mxu1 %v5289_v37  ;;  %v3354_v37 = vld [vmem:[#allocation11 + $0x478] sm:$0xff] }
 0xa13   :  { %5292 = vmatprep.subr.bf16.mxu1 %v5291_v39  ;;  %v5333_v39 = vpack.c.bf16 %v3349_v38, %v3347_v30  ;;  %v5335_v27 = vpack.c.bf16 %v3354_v37, %v3352_v35  ;;  %v3390_v30 = vld [vmem:[#allocation11 + $0x598] sm:$0xff]  ;;  %v3387_v35 = vld [vmem:[#allocation11 + $0x580] sm:$0xff]  ;;  %v3389_v37 = vld [vmem:[#allocation11 + $0x590] sm:$0xff] }
 0xa16   :  { %5294 = vmatpush1.bf16.msra.mxu1 %v5293_v47  ;;  %v3358_v47 = vld [vmem:[#allocation11 + $0x498] sm:$0xff] }
 0xa17   :  { %5296 = vmatprep.subr.bf16.mxu1 %v5295_v56  ;;  %v5337_v56 = vpack.c.bf16 %v3353_v46, %v3351_v18  ;;  %v5339_v24 = vpack.c.bf16 %v3358_v47, %v3356_v21  ;;  %v5373_v18 = vpack.c.bf16 %v3389_v37, %v3387_v35  ;;  %v3391_v21 = vld [vmem:[#allocation11 + $0x5a0] sm:$0xff]  ;;  %v3393_v47 = vld [vmem:[#allocation11 + $0x5b0] sm:$0xff] }
 0xa18   :  { %v3767_v35 = vld [vmem:[#allocation17 + $0x2d0] sm:$0xff]  ;;  %v3770_v37 = vld [vmem:[#allocation17 + $0x2e8] sm:$0xff] }
 0xa1a   :  { %5298 = vmatpush1.bf16.msra.mxu1 %v5297_v51  ;;  %v3362_v51 = vld [vmem:[#allocation11 + $0x4b8] sm:$0xff] }
 0xa1b   :  { %5300 = vmatprep.subr.bf16.mxu1 %v5299_v54  ;;  %v5341_v54 = vpack.c.bf16 %v3357_v48, %v3355_v45  ;;  %v5343_v55 = vpack.c.bf16 %v3362_v51, %v3360_v50  ;;  %v5377_v45 = vpack.c.bf16 %v3393_v47, %v3391_v21  ;;  %v3395_v50 = vld [vmem:[#allocation11 + $0x5c0] sm:$0xff]  ;;  %v3397_v51 = vld [vmem:[#allocation11 + $0x5d0] sm:$0xff] }
 0xa1c   :  { %v3771_v21 = vld [vmem:[#allocation17 + $0x2f0] sm:$0xff]  ;;  %v3774_v47 = vld [vmem:[#allocation17 + $0x308] sm:$0xff] }
 0xa1e   :  { %5302 = vmatpush1.bf16.msra.mxu1 %v5301_v28  ;;  %v3366_v28 = vld [vmem:[#allocation11 + $0x4d8] sm:$0xff] }
 0xa1f   :  { %5304 = vmatprep.subr.bf16.mxu1 %v5303_v61  ;;  %v5345_v61 = vpack.c.bf16 %v3361_v20, %v3359_v2  ;;  %v5347_v0 = vpack.c.bf16 %v3366_v28, %v3364_v49  ;;  %v5381_v2 = vpack.c.bf16 %v3397_v51, %v3395_v50  ;;  %v3399_v49 = vld [vmem:[#allocation11 + $0x5e0] sm:$0xff]  ;;  %v3401_v28 = vld [vmem:[#allocation11 + $0x5f0] sm:$0xff] }
 0xa20   :  { %v3775_v50 = vld [vmem:[#allocation17 + $0x310] sm:$0xff]  ;;  %v3778_v51 = vld [vmem:[#allocation17 + $0x328] sm:$0xff] }
 0xa22   :  { %5306 = vmatpush1.bf16.msra.mxu1 %v5305_v3  ;;  %v3370_v3 = vld [vmem:[#allocation11 + $0x4f8] sm:$0xff] }
 0xa23   :  { %5308 = vmatprep.subr.bf16.mxu1 %v5307_v52  ;;  %v5349_v52 = vpack.c.bf16 %v3365_v29, %v3363_v26  ;;  %v5351_v6 = vpack.c.bf16 %v3370_v3, %v3368_v62  ;;  %v3744_v26 = vld [vmem:[#allocation17 + $0x218] sm:$0xff]  ;;  %v3741_v29 = vld [vmem:[#allocation17 + $0x200] sm:$0xff]  ;;  %v3743_v3 = vld [vmem:[#allocation17 + $0x210] sm:$0xff] }
 0xa26   :  { %5310 = vmatpush1.bf16.msra.mxu1 %v5309_v43  ;;  %v3374_v43 = vld [vmem:[#allocation11 + $0x518] sm:$0xff] }
 0xa27   :  { %5312 = vmatprep.subr.bf16.mxu1 %v5311_v44  ;;  %v5353_v44 = vpack.c.bf16 %v3369_v60, %v3367_v53  ;;  %v5355_v57 = vpack.c.bf16 %v3374_v43, %v3372_v4  ;;  %v5397_v53 = vpack.c.bf16 %v3743_v3, %v3741_v29  ;;  %v3745_v4 = vld [vmem:[#allocation17 + $0x220] sm:$0xff]  ;;  %v3747_v43 = vld [vmem:[#allocation17 + $0x230] sm:$0xff]  ;;  %v3786_v3 = vld [vmem:[#allocation17 + $0x368] sm:$0xff] }
 0xa28   :  { %v3781_v29 = vld [vmem:[#allocation17 + $0x340] sm:$0xff] }
 0xa2a   :  { %5314 = vmatpush1.bf16.msra.mxu1 %v5313_v15  ;;  %v3378_v15 = vld [vmem:[#allocation11 + $0x538] sm:$0xff] }
 0xa2b   :  { %5324 = vmatprep.subr.bf16.mxu1 %v5323_v22  ;;  %v5357_v22 = vpack.c.bf16 %v3373_v63, %v3371_v59  ;;  %v3749_v59 = vld [vmem:[#allocation17 + $0x240] sm:$0xff]  ;;  %v3754_v63 = vld [vmem:[#allocation17 + $0x268] sm:$0xff] }
 0xa80   :  { %v2872_v11 = vpop.f32.mrb[28].mxu1 }
 0xa81   :  { %v2874_v13 = vpop.f32.mrb[29].mxu1 }
 0xa82   :  { %3239 = vmatprep.mubr.f32.mxu1 %v2874_v13  ;;  %v3379_v13 = vld [vmem:[#allocation11 + $0x540] sm:$0xff] }
 0xa83   :  { %3240 = vmatmul.mubr.f32.vlgmr.msra.gmra.mrb[32].mxu1 %v2872_v11  ;;  %v5361_v11 = vpack.c.bf16 %v3377_v8, %v3375_v5  ;;  %v3755_v5 = vld [vmem:[#allocation17 + $0x270] sm:$0xff]  ;;  %v3758_v8 = vld [vmem:[#allocation17 + $0x288] sm:$0xff] }
 0xa84   :  { %5326 = vmatpush1.bf16.msra.mxu1 %v5325_v12  ;;  %v2878_v34 = vpop.f32.mrb[30].mxu1  ;;  %v5363_v12 = vpack.c.bf16 %v3382_v10, %v3380_v9  ;;  %v3760_v9 = vld [vmem:[#allocation17 + $0x298] sm:$0xff] }
 0xa85   :  { %5328 = vmatprep.subr.bf16.mxu1 %v5327_v14  ;;  %v2880_v33 = vpop.f32.mrb[31].mxu1  ;;  %v3381_v14 = vld [vmem:[#allocation11 + $0x550] sm:$0xff] }
 0xa86   :  { %3245 = vmatprep.mubr.f32.mxu1 %v2880_v33  ;;  %v5365_v32 = vpack.c.bf16 %v3381_v14, %v3379_v13  ;;  %v3759_v13 = vld [vmem:[#allocation17 + $0x290] sm:$0xff]  ;;  %v3762_v14 = vld [vmem:[#allocation17 + $0x2a8] sm:$0xff] }
 0xa87   :  { %3246 = vmatmul.mubr.f32.gmra.mrb[34].mxu1 %v2878_v34  ;;  %v3385_v34 = vld [vmem:[#allocation11 + $0x570] sm:$0xff] }
 0xa88   :  { %5330 = vmatpush1.bf16.msra.mxu1 %v5329_v31  ;;  %3467 = vmatprep.mubr.f32.mxu1 %v3329_v58  ;;  %v5359_v58 = vpack.c.bf16 %v3378_v15, %v3376_v19  ;;  %v3383_v31 = vld [vmem:[#allocation11 + $0x560] sm:$0xff]  ;;  %v3756_v19 = vld [vmem:[#allocation17 + $0x278] sm:$0xff] }
 0xa89   :  { %5332 = vmatprep.subr.bf16.mxu1 %v5331_v42  ;;  %v3388_v42 = vld [vmem:[#allocation11 + $0x588] sm:$0xff]  ;;  %v5369_v38 = vpack.c.bf16 %v3385_v34, %v3383_v31  ;;  %v3766_v34 = vld [vmem:[#allocation17 + $0x2c8] sm:$0xff] }
 0xa8a   :  { %v5371_v33 = vpack.c.bf16 %v3390_v30, %v3388_v42  ;;  %v3763_v31 = vld [vmem:[#allocation17 + $0x2b0] sm:$0xff]  ;;  %v3768_v42 = vld [vmem:[#allocation17 + $0x2d8] sm:$0xff] }
 0xa8c   :  { %5334 = vmatpush1.bf16.msra.mxu1 %v5333_v39  ;;  %v3392_v39 = vld [vmem:[#allocation11 + $0x5a8] sm:$0xff] }
 0xa8d   :  { %5336 = vmatprep.subr.bf16.mxu1 %v5335_v27  ;;  %v3394_v27 = vld [vmem:[#allocation11 + $0x5b8] sm:$0xff] }
 0xa8e   :  { %v5375_v46 = vpack.c.bf16 %v3394_v27, %v3392_v39  ;;  %v3772_v39 = vld [vmem:[#allocation17 + $0x2f8] sm:$0xff] }
 0xa90   :  { %5338 = vmatpush1.bf16.msra.mxu1 %v5337_v56  ;;  %v3396_v56 = vld [vmem:[#allocation11 + $0x5c8] sm:$0xff] }
 0xa91   :  { %5340 = vmatprep.subr.bf16.mxu1 %v5339_v24  ;;  %v3398_v24 = vld [vmem:[#allocation11 + $0x5d8] sm:$0xff] }
 0xa92   :  { %v5379_v48 = vpack.c.bf16 %v3398_v24, %v3396_v56  ;;  %v3776_v56 = vld [vmem:[#allocation17 + $0x318] sm:$0xff] }
 0xa94   :  { %5342 = vmatpush1.bf16.msra.mxu1 %v5341_v54  ;;  %v3400_v54 = vld [vmem:[#allocation11 + $0x5e8] sm:$0xff] }
 0xa95   :  { %5344 = vmatprep.subr.bf16.mxu1 %v5343_v55  ;;  %v3402_v55 = vld [vmem:[#allocation11 + $0x5f8] sm:$0xff] }
 0xa96   :  { %v5383_v20 = vpack.c.bf16 %v3402_v55, %v3400_v54  ;;  %v3780_v54 = vld [vmem:[#allocation17 + $0x338] sm:$0xff] }
 0xa98   :  { %5346 = vmatpush1.bf16.msra.mxu1 %v5345_v61  ;;  %v5385_v61 = vpack.c.bf16 %v3401_v28, %v3399_v49  ;;  %v3779_v49 = vld [vmem:[#allocation17 + $0x330] sm:$0xff]  ;;  %v3782_v28 = vld [vmem:[#allocation17 + $0x348] sm:$0xff] }
 0xa99   :  { %5348 = vmatprep.subr.bf16.mxu1 %v5347_v0  ;;  %v3742_v0 = vld [vmem:[#allocation17 + $0x208] sm:$0xff] }
 0xa9a   :  { %v5395_v62 = vpack.c.bf16 %v3744_v26, %v3742_v0 }
 0xa9c   :  { %5350 = vmatpush1.bf16.msra.mxu1 %v5349_v52  ;;  %v3746_v52 = vld [vmem:[#allocation17 + $0x228] sm:$0xff] }
 0xa9d   :  { %5352 = vmatprep.subr.bf16.mxu1 %v5351_v6  ;;  %v3748_v6 = vld [vmem:[#allocation17 + $0x238] sm:$0xff] }
 0xa9e   :  { %v5399_v60 = vpack.c.bf16 %v3748_v6, %v3746_v52  ;;  %v3788_v52 = vld [vmem:[#allocation17 + $0x378] sm:$0xff] }
 0xaa0   :  { %5354 = vmatpush1.bf16.msra.mxu1 %v5353_v44  ;;  %v3750_v44 = vld [vmem:[#allocation17 + $0x248] sm:$0xff] }
 0xaa1   :  { %5356 = vmatprep.subr.bf16.mxu1 %v5355_v57  ;;  %v3752_v57 = vld [vmem:[#allocation17 + $0x258] sm:$0xff] }
 0xaa4   :  { %5358 = vmatpush1.bf16.msra.mxu1 %v5357_v22  ;;  %v5407_v22 = vpack.c.bf16 %v3756_v19, %v3754_v63  ;;  %v3796_v63 = vld [vmem:[#allocation17 + $0x3b8] sm:$0xff] }
 0xaa5   :  { %5360 = vmatprep.subr.bf16.mxu1 %v5359_v58  ;;  %v3753_v58 = vld [vmem:[#allocation17 + $0x260] sm:$0xff] }
 0xaa6   :  { %v5409_v10 = vpack.c.bf16 %v3755_v5, %v3753_v58  ;;  %v3795_v58 = vld [vmem:[#allocation17 + $0x3b0] sm:$0xff] }
 0xaa8   :  { %5362 = vmatpush1.bf16.msra.mxu1 %v5361_v11  ;;  %v5411_v11 = vpack.c.bf16 %v3760_v9, %v3758_v8  ;;  %v3484_v8 = vld [vmem:[#allocation13] sm:$0x3] }
 0xaa9   :  { %5364 = vmatprep.subr.bf16.mxu1 %v5363_v12  ;;  %v3757_v12 = vld [vmem:[#allocation17 + $0x280] sm:$0xff]  ;;  %v3489_v9 = vrot.slane %v3484_v8, %v6462_v25 }
 0xaaa   :  { %v5413_v17 = vpack.c.bf16 %v3759_v13, %v3757_v12 }
 0xaac   :  { %5366 = vmatpush1.bf16.msra.mxu1 %v5365_v32  ;;  %v5415_v32 = vpack.c.bf16 %v3764_v16, %v3762_v14 }
 0xaad   :  { %5368 = vmatprep.subr.bf16.mxu1 %v5367_v41  ;;  %v3761_v41 = vld [vmem:[#allocation17 + $0x2a0] sm:$0xff] }
 0xaae   :  { %v5417_v30 = vpack.c.bf16 %v3763_v31, %v3761_v41 }
 0xab0   :  { %5370 = vmatpush1.bf16.msra.mxu1 %v5369_v38  ;;  %v5419_v38 = vpack.c.bf16 %v3768_v42, %v3766_v34 }
 0xab1   :  { %5372 = vmatprep.subr.bf16.mxu1 %v5371_v33  ;;  %v3765_v33 = vld [vmem:[#allocation17 + $0x2c0] sm:$0xff] }
 0xab2   :  { %v5421_v27 = vpack.c.bf16 %v3767_v35, %v3765_v33  ;;  %v3504_v35 = vld [vmem:[#allocation16] sm:$0xff] }
 0xab4   :  { %5374 = vmatpush1.bf16.msra.mxu1 %v5373_v18  ;;  %v5423_v18 = vpack.c.bf16 %v3772_v39, %v3770_v37  ;;  %v3505_v37 = vld [vmem:[#allocation16 + $0x8] sm:$0xff]  ;;  %v3655_v39 = vld [vmem:[#allocation16 + $0x10] sm:$0xff] }
 0xab5   :  { %5376 = vmatprep.subr.bf16.mxu1 %v5375_v46  ;;  %v3769_v46 = vld [vmem:[#allocation17 + $0x2e0] sm:$0xff] }
 0xab6   :  { %v5425_v24 = vpack.c.bf16 %v3771_v21, %v3769_v46  ;;  %v3961_v46 = vld [vmem:[#allocation16 + $0x28] sm:$0xff]  ;;  %v3798_v21 = vld [vmem:[#allocation17 + $0x3c8] sm:$0xff] }
 0xab8   :  { %5378 = vmatpush1.bf16.msra.mxu1 %v5377_v45  ;;  %v5427_v45 = vpack.c.bf16 %v3776_v56, %v3774_v47  ;;  %v3800_v47 = vld [vmem:[#allocation17 + $0x3d8] sm:$0xff] }
 0xab9   :  { %5380 = vmatprep.subr.bf16.mxu1 %v5379_v48  ;;  %v3773_v48 = vld [vmem:[#allocation17 + $0x300] sm:$0xff]  ;;  %v5451_v56 = vpack.c.bf16 %v3800_v47, %v3798_v21 }
 0xaba   :  { %v5429_v55 = vpack.c.bf16 %v3775_v50, %v3773_v48  ;;  %v3802_v50 = vld [vmem:[#allocation17 + $0x3e8] sm:$0xff]  ;;  %v3614_v47 = vld [vmem:[#allocation17 + $0xc0] sm:$0xff] }
 0xabc   :  { %5382 = vmatpush1.bf16.msra.mxu1 %v5381_v2  ;;  %v5431_v2 = vpack.c.bf16 %v3780_v54, %v3778_v51  ;;  %v3804_v51 = vld [vmem:[#allocation17 + $0x3f8] sm:$0xff] }
 0xabd   :  { %5384 = vmatprep.subr.bf16.mxu1 %v5383_v20  ;;  %v3777_v20 = vld [vmem:[#allocation17 + $0x320] sm:$0xff]  ;;  %v5455_v54 = vpack.c.bf16 %v3804_v51, %v3802_v50 }
 0xabe   :  { %v5433_v0 = vpack.c.bf16 %v3779_v49, %v3777_v20  ;;  %v3591_v49 = vld [vmem:[#allocation17 + $0x8] sm:$0xff]  ;;  %v3618_v51 = vld [vmem:[#allocation17 + $0xe0] sm:$0xff] }
 0xac0   :  { %5386 = vmatpush1.bf16.msra.mxu1 %v5385_v61  ;;  %v3784_v61 = vld [vmem:[#allocation17 + $0x358] sm:$0xff] }
 0xac1   :  { %5396 = vmatprep.subr.bf16.mxu1 %v5395_v62  ;;  %v5435_v26 = vpack.c.bf16 %v3784_v61, %v3782_v28  ;;  %v3783_v62 = vld [vmem:[#allocation17 + $0x350] sm:$0xff]  ;;  %v3593_v28 = vld [vmem:[#allocation17 + $0x18] sm:$0xff] }
 0xac2   :  { %v5437_v6 = vpack.c.bf16 %v3783_v62, %v3781_v29  ;;  %v5459_v61 = vpack.c.bf16 %v3593_v28, %v3591_v49  ;;  %v3590_v62 = vld [vmem:[#allocation17] sm:$0xff] }
 0xac3   :  { %3468 = vmatmul.mubr.f32.vlgmr.msra.gmra.mrb[32].mxu1 %v6932_v40  ;;  %v5401_v40 = vpack.c.bf16 %v3747_v43, %v3745_v4  ;;  %v3787_v4 = vld [vmem:[#allocation17 + $0x370] sm:$0xff]  ;;  %v3790_v43 = vld [vmem:[#allocation17 + $0x388] sm:$0xff]  ;;  %v3622_v28 = vld [vmem:[#allocation17 + $0x100] sm:$0xff] }
 0xac4   :  { %3473 = vmatprep.mubr.f32.mxu1 %v6936_v7  ;;  %5398 = vmatpush1.bf16.msra.mxu1 %v5397_v53  ;;  %v5403_v7 = vpack.c.bf16 %v3752_v57, %v3750_v44  ;;  %v5439_v53 = vpack.c.bf16 %v3788_v52, %v3786_v3  ;;  %v3792_v44 = vld [vmem:[#allocation17 + $0x398] sm:$0xff]  ;;  %v3592_v3 = vld [vmem:[#allocation17 + $0x10] sm:$0xff]  ;;  %v3595_v52 = vld [vmem:[#allocation17 + $0x28] sm:$0xff] }
 0xac5   :  { %5400 = vmatprep.subr.bf16.mxu1 %v5399_v60  ;;  %v3785_v60 = vld [vmem:[#allocation17 + $0x360] sm:$0xff] }
 0xac6   :  { %v5441_v57 = vpack.c.bf16 %v3787_v4, %v3785_v60  ;;  %v5461_v60 = vpack.c.bf16 %v3592_v3, %v3590_v62  ;;  %v3629_v62 = vld [vmem:[#allocation17 + $0x138] sm:$0xff] }
 0xac7   :  { %3474 = vmatmul.mubr.f32.gmra.mrb[34].mxu1 %v6934_v1  ;;  %v3751_v1 = vld [vmem:[#allocation17 + $0x250] sm:$0xff] }
 0xac8   :  { %5402 = vmatpush1.bf16.msra.mxu1 %v5401_v40  ;;  %v5405_v15 = vpack.c.bf16 %v3751_v1, %v3749_v59  ;;  %v5443_v40 = vpack.c.bf16 %v3792_v44, %v3790_v43  ;;  %v3791_v59 = vld [vmem:[#allocation17 + $0x390] sm:$0xff]  ;;  %v3794_v1 = vld [vmem:[#allocation17 + $0x3a8] sm:$0xff]  ;;  %v3594_v44 = vld [vmem:[#allocation17 + $0x20] sm:$0xff] }
 0xac9   :  { %5404 = vmatprep.subr.bf16.mxu1 %v5403_v7  ;;  %v3789_v7 = vld [vmem:[#allocation17 + $0x380] sm:$0xff] }
 0xaca   :  { %v5445_v19 = vpack.c.bf16 %v3791_v59, %v3789_v7  ;;  %v3601_v7 = vld [vmem:[#allocation17 + $0x58] sm:$0xff] }
 0xacc   :  { %5406 = vmatpush1.bf16.msra.mxu1 %v5405_v15  ;;  %v5447_v15 = vpack.c.bf16 %v3796_v63, %v3794_v1 }
 0xacd   :  { %5408 = vmatprep.subr.bf16.mxu1 %v5407_v22  ;;  %v3793_v22 = vld [vmem:[#allocation17 + $0x3a0] sm:$0xff] }
 0xace   :  { %v5449_v5 = vpack.c.bf16 %v3795_v58, %v3793_v22  ;;  %v3600_v22 = vld [vmem:[#allocation17 + $0x50] sm:$0xff]  ;;  %v3603_v58 = vld [vmem:[#allocation17 + $0x68] sm:$0xff] }
 0xad0   :  { %5410 = vmatpush1.bf16.msra.mxu1 %v5409_v10 }
 0xad1   :  { %5412 = vmatprep.subr.bf16.mxu1 %v5411_v11  ;;  %v3493_v11 = vrot.slane %v3484_v8, %v6457_v23 }
 0xad4   :  { %5414 = vmatpush1.bf16.msra.mxu1 %v5413_v17 }
 0xad5   :  { %5416 = vmatprep.subr.bf16.mxu1 %v5415_v32 }
 0xad8   :  { %5418 = vmatpush1.bf16.msra.mxu1 %v5417_v30 }
 0xad9   :  { %5420 = vmatprep.subr.bf16.mxu1 %v5419_v38 }
 0xadc   :  { %5422 = vmatpush1.bf16.msra.mxu1 %v5421_v27  ;;  %v3656_v27 = vld [vmem:[#allocation16 + $0x18] sm:$0xff] }
 0xadd   :  { %5424 = vmatprep.subr.bf16.mxu1 %v5423_v18  ;;  %v3960_v18 = vld [vmem:[#allocation16 + $0x20] sm:$0xff] }
 0xae0   :  { %5426 = vmatpush1.bf16.msra.mxu1 %v5425_v24  ;;  %v3797_v24 = vld [vmem:[#allocation17 + $0x3c0] sm:$0xff] }
 0xae1   :  { %5428 = vmatprep.subr.bf16.mxu1 %v5427_v45  ;;  %v3799_v45 = vld [vmem:[#allocation17 + $0x3d0] sm:$0xff] }
 0xae2   :  { %v5453_v48 = vpack.c.bf16 %v3799_v45, %v3797_v24  ;;  %v3619_v24 = vld [vmem:[#allocation17 + $0xe8] sm:$0xff]  ;;  %v3621_v45 = vld [vmem:[#allocation17 + $0xf8] sm:$0xff] }
 0xae3   :  { %v5487_v50 = vpack.c.bf16 %v3621_v45, %v3619_v24  ;;  %v4049_v24 = vld [vmem:[#allocation17 + $0x418] sm:$0xff] }
 0xae4   :  { %5430 = vmatpush1.bf16.msra.mxu1 %v5429_v55  ;;  %v3801_v55 = vld [vmem:[#allocation17 + $0x3e0] sm:$0xff] }
 0xae5   :  { %5432 = vmatprep.subr.bf16.mxu1 %v5431_v2  ;;  %v3803_v2 = vld [vmem:[#allocation17 + $0x3f0] sm:$0xff] }
 0xae6   :  { %v5457_v20 = vpack.c.bf16 %v3803_v2, %v3801_v55  ;;  %v3623_v55 = vld [vmem:[#allocation17 + $0x108] sm:$0xff]  ;;  %v3625_v2 = vld [vmem:[#allocation17 + $0x118] sm:$0xff] }
 0xae7   :  { %v5491_v49 = vpack.c.bf16 %v3625_v2, %v3623_v55  ;;  %v4053_v55 = vld [vmem:[#allocation17 + $0x438] sm:$0xff] }
 0xae8   :  { %5434 = vmatpush1.bf16.msra.mxu1 %v5433_v0 }
 0xae9   :  { %5436 = vmatprep.subr.bf16.mxu1 %v5435_v26 }
 0xaec   :  { %5438 = vmatpush1.bf16.msra.mxu1 %v5437_v6  ;;  %v3597_v6 = vld [vmem:[#allocation17 + $0x38] sm:$0xff] }
 0xaed   :  { %5440 = vmatprep.subr.bf16.mxu1 %v5439_v53  ;;  %v5463_v43 = vpack.c.bf16 %v3597_v6, %v3595_v52  ;;  %v3626_v6 = vld [vmem:[#allocation17 + $0x120] sm:$0xff] }
 0xaf0   :  { %5442 = vmatpush1.bf16.msra.mxu1 %v5441_v57  ;;  %v3596_v57 = vld [vmem:[#allocation17 + $0x30] sm:$0xff] }
 0xaf1   :  { %5444 = vmatprep.subr.bf16.mxu1 %v5443_v40  ;;  %v3599_v40 = vld [vmem:[#allocation17 + $0x48] sm:$0xff]  ;;  %v5465_v1 = vpack.c.bf16 %v3596_v57, %v3594_v44  ;;  %v3630_v57 = vld [vmem:[#allocation17 + $0x140] sm:$0xff] }
 0xaf4   :  { %5446 = vmatpush1.bf16.msra.mxu1 %v5445_v19  ;;  %v5467_v19 = vpack.c.bf16 %v3601_v7, %v3599_v40  ;;  %v3632_v40 = vld [vmem:[#allocation17 + $0x150] sm:$0xff]  ;;  %v3635_v7 = vld [vmem:[#allocation17 + $0x168] sm:$0xff] }
 0xaf5   :  { %5448 = vmatprep.subr.bf16.mxu1 %v5447_v15  ;;  %v3598_v15 = vld [vmem:[#allocation17 + $0x40] sm:$0xff] }
 0xaf6   :  { %v5469_v8 = vpack.c.bf16 %v3600_v22, %v3598_v15  ;;  %v3636_v15 = vld [vmem:[#allocation17 + $0x170] sm:$0xff]  ;;  %v3639_v22 = vld [vmem:[#allocation17 + $0x188] sm:$0xff] }
 0xaf8   :  { %5450 = vmatpush1.bf16.msra.mxu1 %v5449_v5  ;;  %v3605_v5 = vld [vmem:[#allocation17 + $0x78] sm:$0xff] }
 0xaf9   :  { %5452 = vmatprep.subr.bf16.mxu1 %v5451_v56  ;;  %v3616_v56 = vld [vmem:[#allocation17 + $0xd0] sm:$0xff] }
 0xafc   :  { %5454 = vmatpush1.bf16.msra.mxu1 %v5453_v48  ;;  %v5485_v48 = vpack.c.bf16 %v3616_v56, %v3614_v47  ;;  %v3652_v47 = vld [vmem:[#allocation17 + $0x1f0] sm:$0xff]  ;;  %v4047_v56 = vld [vmem:[#allocation17 + $0x408] sm:$0xff] }
 0xafd   :  { %5456 = vmatprep.subr.bf16.mxu1 %v5455_v54  ;;  %v3620_v54 = vld [vmem:[#allocation17 + $0xf0] sm:$0xff] }
 0xb00   :  { %5458 = vmatpush1.bf16.msra.mxu1 %v5457_v20  ;;  %v5489_v20 = vpack.c.bf16 %v3620_v54, %v3618_v51  ;;  %v4048_v51 = vld [vmem:[#allocation17 + $0x410] sm:$0xff]  ;;  %v4051_v54 = vld [vmem:[#allocation17 + $0x428] sm:$0xff] }
 0xb01   :  { %5460 = vmatprep.subr.bf16.mxu1 %v5459_v61  ;;  %v3624_v61 = vld [vmem:[#allocation17 + $0x110] sm:$0xff] }
 0xb02   :  { %v5493_v3 = vpack.c.bf16 %v3624_v61, %v3622_v28  ;;  %v4052_v28 = vld [vmem:[#allocation17 + $0x430] sm:$0xff]  ;;  %v4055_v61 = vld [vmem:[#allocation17 + $0x448] sm:$0xff] }
 0xb96   :  { %v3469_v10 = vpop.f32.mrb[32].mxu1 }
 0xb97   :  { %v3471_v12 = vpop.f32.mrb[33].mxu1  ;;  %v3496_v13 = vadd.f32 %v3489_v9, %v3469_v10  ;;  %v5471_v10 = vpack.c.bf16 %v3605_v5, %v3603_v58  ;;  %v3641_v58 = vld [vmem:[#allocation17 + $0x198] sm:$0xff] }
 0xb98   :  { %v3497_v14 = vadd.f32 %v3493_v11, %v3471_v12  ;;  %v3604_v12 = vld [vmem:[#allocation17 + $0x70] sm:$0xff] }
 0xb99   :  { %v3500_v31 = vmax.f32 %v3496_v13, 0.0 }
 0xb9a   :  { %v3475_v16 = vpop.f32.mrb[34].mxu1  ;;  %v3501_v42 = vmax.f32 %v3497_v14, 0.0  ;;  %v3607_v14 = vld [vmem:[#allocation17 + $0x88] sm:$0xff] }
 0xb9b   :  { %v3498_v17 = vadd.f32 %v3489_v9, %v3475_v16  ;;  %v3477_v32 = vpop.f32.mrb[35].mxu1  ;;  %v3609_v16 = vld [vmem:[#allocation17 + $0x98] sm:$0xff] }
 0xb9c   :  { %v3499_v41 = vadd.f32 %v3493_v11, %v3477_v32  ;;  %v3602_v11 = vld [vmem:[#allocation17 + $0x60] sm:$0xff] }
 0xb9d   :  { %v3502_v34 = vmax.f32 %v3498_v17, 0.0  ;;  %v5473_v17 = vpack.c.bf16 %v3604_v12, %v3602_v11  ;;  %v3640_v11 = vld [vmem:[#allocation17 + $0x190] sm:$0xff]  ;;  %v3643_v12 = vld [vmem:[#allocation17 + $0x1a8] sm:$0xff] }
 0xb9e   :  { %v3503_v30 = vmax.f32 %v3499_v41, 0.0  ;;  %v5475_v41 = vpack.c.bf16 %v3609_v16, %v3607_v14  ;;  %v3645_v14 = vld [vmem:[#allocation17 + $0x1b8] sm:$0xff] }
 0xb9f   :  { %v5389_v38 = vpack.c.bf16 %v3502_v34, %v3500_v31  ;;  %v3606_v31 = vld [vmem:[#allocation17 + $0x80] sm:$0xff]  ;;  %v3608_v34 = vld [vmem:[#allocation17 + $0x90] sm:$0xff] }
 0xba0   :  { %v5387_v33 = vpack.c.bf16 %v3503_v30, %v3501_v42  ;;  %v3611_v30 = vld [vmem:[#allocation17 + $0xa8] sm:$0xff] }
 0xba2   :  { %5388 = vmatprep.subr.bf16.mxu0 %v5387_v33 }
 0xba3   :  { %5390 = vmatpush1.bf16.msra.mxu0 %v5389_v38 }
 0xba4   :  { %5392 = vmatprep.subr.bf16.mxu0 %v5387_v33 }
 0xba6   :  { %4498 = vmatmul.mubr.msk.f32.vlgmr.msra.gmra.mrb[80].mxu0 %vm3506_vm2, %v3504_v35 }
 0xba7   :  { %5394 = vmatpush1.bf16.msra.mxu0 %v5389_v38  ;;  %3583 = vmatprep.mubr.f32.mxu0 %v6063_v36 }
 0xba8   :  { %5524 = vmatprep.subr.bf16.mxu0 %v5387_v33  ;;  %v5477_v33 = vpack.c.bf16 %v3608_v34, %v3606_v31  ;;  %v3644_v31 = vld [vmem:[#allocation17 + $0x1b0] sm:$0xff]  ;;  %v3647_v34 = vld [vmem:[#allocation17 + $0x1c8] sm:$0xff] }
 0xbaa   :  { %4499 = vmatmul.mubr.msk.f32.gmra.mrb[82].mxu0 %vm3506_vm2, %v3505_v37  ;;  %v3610_v37 = vld [vmem:[#allocation17 + $0xa0] sm:$0xff] }
 0xbab   :  { %3727 = vmatprep.mubr.f32.mxu0 %v6063_v36 }
 0xbae   :  { %4500 = vmatmul.mubr.msk.f32.vlgmr.msra.gmra.mrb[84].mxu0 %vm3506_vm2, %v3655_v39  ;;  %v3612_v39 = vld [vmem:[#allocation17 + $0xb0] sm:$0xff] }
 0xbaf   :  { %5526 = vmatpush1.bf16.msra.mxu0 %v5389_v38  ;;  %3733 = vmatprep.mubr.f32.mxu0 %v6063_v36  ;;  %v3613_v38 = vld [vmem:[#allocation17 + $0xb8] sm:$0xff] }
 0xbb0   :  { %v5479_v35 = vpack.c.bf16 %v3613_v38, %v3611_v30  ;;  %v3649_v30 = vld [vmem:[#allocation17 + $0x1d8] sm:$0xff] }
 0xbb2   :  { %4501 = vmatmul.mubr.msk.f32.gmra.mrb[86].mxu0 %vm3506_vm2, %v3656_v27  ;;  %v3615_v27 = vld [vmem:[#allocation17 + $0xc8] sm:$0xff] }
 0xbb3   :  { %4032 = vmatprep.mubr.f32.mxu0 %v6063_v36 }
 0xbb6   :  { %4502 = vmatmul.mubr.msk.f32.vlgmr.msra.gmra.mrb[88].mxu0 %vm3506_vm2, %v3960_v18  ;;  %v3617_v18 = vld [vmem:[#allocation17 + $0xd8] sm:$0xff] }
 0xbb7   :  { %4038 = vmatprep.mubr.f32.mxu0 %v6063_v36  ;;  %v5483_v21 = vpack.c.bf16 %v3617_v18, %v3615_v27  ;;  %v3653_v27 = vld [vmem:[#allocation17 + $0x1f8] sm:$0xff] }
 0xbba   :  { %4503 = vmatmul.mubr.msk.f32.gmra.mrb[90].mxu0 %vm3506_vm2, %v3961_v46  ;;  %v5481_v46 = vpack.c.bf16 %v3612_v39, %v3610_v37  ;;  %v3648_v37 = vld [vmem:[#allocation17 + $0x1d0] sm:$0xff]  ;;  %v3651_v39 = vld [vmem:[#allocation17 + $0x1e8] sm:$0xff] }
 0xbbb   :  { %4283 = vmatprep.mubr.f32.mxu0 %v6063_v36 }
 0xc79   :  { %v6955_v36 = vpop.f32.mrb[80].mxu0 }
 0xc7a   :  { %v3581_v0 = vpop.f32.mrb[81].mxu0 }
 0xc7d   :  { %v6957_v26 = vpop.f32.mrb[82].mxu0 }
 0xc7e   :  { %v6959_v29 = vpop.f32.mrb[83].mxu0 }
 0xc81   :  { %v3729_v53 = vpop.f32.mrb[84].mxu0 }
 0xc82   :  { %v3731_v4 = vpop.f32.mrb[85].mxu0 }
 0xc83   :  { %3869 = vmatprep.mubr.f32.mxu1 %v3731_v4  ;;  %v3633_v4 = vld [vmem:[#allocation17 + $0x158] sm:$0xff] }
 0xc84   :  { %3870 = vmatmul.mubr.f32.vlgmr.msra.gmra.mrb[24].mxu1 %v3729_v53  ;;  %v3628_v53 = vld [vmem:[#allocation17 + $0x130] sm:$0xff] }
 0xc85   :  { %5462 = vmatpush1.bf16.msra.mxu1 %v5461_v60  ;;  %v3735_v59 = vpop.f32.mrb[86].mxu0  ;;  %v3631_v60 = vld [vmem:[#allocation17 + $0x148] sm:$0xff] }
 0xc86   :  { %v3737_v63 = vpop.f32.mrb[87].mxu0  ;;  %5464 = vmatprep.subr.bf16.mxu1 %v5463_v43  ;;  %v5497_v43 = vpack.c.bf16 %v3628_v53, %v3626_v6  ;;  %v5499_v44 = vpack.c.bf16 %v3633_v4, %v3631_v60  ;;  %v4056_v6 = vld [vmem:[#allocation17 + $0x450] sm:$0xff]  ;;  %v4059_v53 = vld [vmem:[#allocation17 + $0x468] sm:$0xff]  ;;  %v4061_v60 = vld [vmem:[#allocation17 + $0x478] sm:$0xff] }
 0xc87   :  { %3875 = vmatprep.mubr.f32.mxu1 %v3737_v63 }
 0xc88   :  { %3876 = vmatmul.mubr.f32.gmra.mrb[26].mxu1 %v3735_v59  ;;  %v3637_v59 = vld [vmem:[#allocation17 + $0x178] sm:$0xff] }
 0xc89   :  { %5466 = vmatpush1.bf16.msra.mxu1 %v5465_v1  ;;  %3946 = vmatprep.mubr.f32.mxu1 %v3581_v0  ;;  %v6961_v9 = vpop.f32.mrb[88].mxu0  ;;  %v3627_v0 = vld [vmem:[#allocation17 + $0x128] sm:$0xff]  ;;  %v5501_v1 = vpack.c.bf16 %v3632_v40, %v3630_v57  ;;  %v5503_v63 = vpack.c.bf16 %v3637_v59, %v3635_v7  ;;  %v4062_v59 = vld [vmem:[#allocation17 + $0x480] sm:$0xff] }
 0xc8a   :  { %5468 = vmatprep.subr.bf16.mxu1 %v5467_v19  ;;  %v6963_v13 = vpop.f32.mrb[89].mxu0  ;;  %v5495_v52 = vpack.c.bf16 %v3629_v62, %v3627_v0  ;;  %v3634_v19 = vld [vmem:[#allocation17 + $0x160] sm:$0xff]  ;;  %v4057_v0 = vld [vmem:[#allocation17 + $0x458] sm:$0xff]  ;;  %v4063_v57 = vld [vmem:[#allocation17 + $0x488] sm:$0xff] }
 0xc8b   :  { %v5505_v5 = vpack.c.bf16 %v3636_v15, %v3634_v19  ;;  %v4069_v19 = vld [vmem:[#allocation17 + $0x4b8] sm:$0xff] }
 0xc8d   :  { %5470 = vmatpush1.bf16.msra.mxu1 %v5469_v8  ;;  %v6965_v32 = vpop.f32.mrb[90].mxu0  ;;  %v5507_v8 = vpack.c.bf16 %v3641_v58, %v3639_v22  ;;  %v4066_v22 = vld [vmem:[#allocation17 + $0x4a0] sm:$0xff]  ;;  %v4071_v58 = vld [vmem:[#allocation17 + $0x4c8] sm:$0xff] }
 0xc8e   :  { %5472 = vmatprep.subr.bf16.mxu1 %v5471_v10  ;;  %v6967_v42 = vpop.f32.mrb[91].mxu0  ;;  %v3638_v10 = vld [vmem:[#allocation17 + $0x180] sm:$0xff] }
 0xc8f   :  { %v5509_v16 = vpack.c.bf16 %v3640_v11, %v3638_v10  ;;  %v4070_v11 = vld [vmem:[#allocation17 + $0x4c0] sm:$0xff] }
 0xc91   :  { %5474 = vmatpush1.bf16.msra.mxu1 %v5473_v17  ;;  %v5511_v17 = vpack.c.bf16 %v3645_v14, %v3643_v12  ;;  %v4072_v12 = vld [vmem:[#allocation17 + $0x4d0] sm:$0xff]  ;;  %v4075_v14 = vld [vmem:[#allocation17 + $0x4e8] sm:$0xff] }
 0xc92   :  { %5476 = vmatprep.subr.bf16.mxu1 %v5475_v41  ;;  %v3642_v41 = vld [vmem:[#allocation17 + $0x1a0] sm:$0xff] }
 0xc93   :  { %v5513_v38 = vpack.c.bf16 %v3644_v31, %v3642_v41  ;;  %v4074_v31 = vld [vmem:[#allocation17 + $0x4e0] sm:$0xff] }
 0xc95   :  { %5478 = vmatpush1.bf16.msra.mxu1 %v5477_v33  ;;  %v5515_v33 = vpack.c.bf16 %v3649_v30, %v3647_v34  ;;  %v4076_v34 = vld [vmem:[#allocation17 + $0x4f0] sm:$0xff]  ;;  %v4079_v30 = vld [vmem:[#allocation17 + $0x508] sm:$0xff] }
 0xc96   :  { %5480 = vmatprep.subr.bf16.mxu1 %v5479_v35  ;;  %v3646_v35 = vld [vmem:[#allocation17 + $0x1c0] sm:$0xff] }
 0xc97   :  { %v5517_v18 = vpack.c.bf16 %v3648_v37, %v3646_v35  ;;  %v4078_v37 = vld [vmem:[#allocation17 + $0x500] sm:$0xff] }
 0xc99   :  { %5482 = vmatpush1.bf16.msra.mxu1 %v5481_v46  ;;  %v5519_v46 = vpack.c.bf16 %v3653_v27, %v3651_v39  ;;  %v4080_v39 = vld [vmem:[#allocation17 + $0x510] sm:$0xff]  ;;  %v4083_v27 = vld [vmem:[#allocation17 + $0x528] sm:$0xff] }
 0xc9a   :  { %5484 = vmatprep.subr.bf16.mxu1 %v5483_v21  ;;  %v3650_v21 = vld [vmem:[#allocation17 + $0x1e0] sm:$0xff] }
 0xc9b   :  { %v5521_v45 = vpack.c.bf16 %v3652_v47, %v3650_v21  ;;  %v4082_v47 = vld [vmem:[#allocation17 + $0x520] sm:$0xff] }
 0xc9d   :  { %5486 = vmatpush1.bf16.msra.mxu1 %v5485_v48  ;;  %v5527_v48 = vpack.c.bf16 %v4049_v24, %v4047_v56  ;;  %v4084_v56 = vld [vmem:[#allocation17 + $0x530] sm:$0xff]  ;;  %v4087_v24 = vld [vmem:[#allocation17 + $0x548] sm:$0xff] }
 0xc9e   :  { %5488 = vmatprep.subr.bf16.mxu1 %v5487_v50  ;;  %v4046_v50 = vld [vmem:[#allocation17 + $0x400] sm:$0xff] }
 0xc9f   :  { %v5529_v2 = vpack.c.bf16 %v4048_v51, %v4046_v50  ;;  %v4086_v51 = vld [vmem:[#allocation17 + $0x540] sm:$0xff] }
 0xca1   :  { %5490 = vmatpush1.bf16.msra.mxu1 %v5489_v20  ;;  %v5531_v20 = vpack.c.bf16 %v4053_v55, %v4051_v54  ;;  %v4088_v54 = vld [vmem:[#allocation17 + $0x550] sm:$0xff]  ;;  %v4091_v55 = vld [vmem:[#allocation17 + $0x568] sm:$0xff] }
 0xca2   :  { %5492 = vmatprep.subr.bf16.mxu1 %v5491_v49  ;;  %v4050_v49 = vld [vmem:[#allocation17 + $0x420] sm:$0xff] }
 0xca3   :  { %v5533_v62 = vpack.c.bf16 %v4052_v28, %v4050_v49  ;;  %v4090_v28 = vld [vmem:[#allocation17 + $0x560] sm:$0xff] }
 0xca5   :  { %5494 = vmatpush1.bf16.msra.mxu1 %v5493_v3  ;;  %v5535_v3 = vpack.c.bf16 %v4057_v0, %v4055_v61  ;;  %v4092_v61 = vld [vmem:[#allocation17 + $0x570] sm:$0xff]  ;;  %v4095_v0 = vld [vmem:[#allocation17 + $0x588] sm:$0xff] }
 0xca6   :  { %5496 = vmatprep.subr.bf16.mxu1 %v5495_v52  ;;  %v4054_v52 = vld [vmem:[#allocation17 + $0x440] sm:$0xff] }
 0xca7   :  { %v5537_v4 = vpack.c.bf16 %v4056_v6, %v4054_v52  ;;  %v4094_v6 = vld [vmem:[#allocation17 + $0x580] sm:$0xff] }
 0xca9   :  { %5498 = vmatpush1.bf16.msra.mxu1 %v5497_v43  ;;  %v5539_v43 = vpack.c.bf16 %v4061_v60, %v4059_v53  ;;  %v4096_v53 = vld [vmem:[#allocation17 + $0x590] sm:$0xff]  ;;  %v4099_v60 = vld [vmem:[#allocation17 + $0x5a8] sm:$0xff] }
 0xcaa   :  { %5500 = vmatprep.subr.bf16.mxu1 %v5499_v44  ;;  %v4058_v44 = vld [vmem:[#allocation17 + $0x460] sm:$0xff] }
 0xcad   :  { %5502 = vmatpush1.bf16.msra.mxu1 %v5501_v1  ;;  %v4064_v1 = vld [vmem:[#allocation17 + $0x490] sm:$0xff] }
 0xcae   :  { %5504 = vmatprep.subr.bf16.mxu1 %v5503_v63  ;;  %v4067_v63 = vld [vmem:[#allocation17 + $0x4a8] sm:$0xff] }
 0xcaf   :  { %v5547_v15 = vpack.c.bf16 %v4069_v19, %v4067_v63  ;;  %v4104_v63 = vld [vmem:[#allocation17 + $0x5d0] sm:$0xff]  ;;  %v4107_v19 = vld [vmem:[#allocation17 + $0x5e8] sm:$0xff] }
 0xcb1   :  { %5506 = vmatpush1.bf16.msra.mxu1 %v5505_v5  ;;  %v4073_v5 = vld [vmem:[#allocation17 + $0x4d8] sm:$0xff] }
 0xcb2   :  { %5508 = vmatprep.subr.bf16.mxu1 %v5507_v8  ;;  %v5551_v10 = vpack.c.bf16 %v4073_v5, %v4071_v58  ;;  %v4108_v58 = vld [vmem:[#allocation17 + $0x5f0] sm:$0xff] }
 0xcb5   :  { %5510 = vmatpush1.bf16.msra.mxu1 %v5509_v16  ;;  %v4077_v16 = vld [vmem:[#allocation17 + $0x4f8] sm:$0xff] }
 0xcb6   :  { %5512 = vmatprep.subr.bf16.mxu1 %v5511_v17  ;;  %v5553_v17 = vpack.c.bf16 %v4072_v12, %v4070_v11  ;;  %v5555_v41 = vpack.c.bf16 %v4077_v16, %v4075_v14  ;;  %v4191_v11 = vld [vmem:[#allocation19] sm:$0x3] }
 0xcb7   :  { %v4196_v16 = vrot.slane %v4191_v11, %v6462_v25 }
 0xcb9   :  { %5514 = vmatpush1.bf16.msra.mxu1 %v5513_v38  ;;  %v4081_v38 = vld [vmem:[#allocation17 + $0x518] sm:$0xff] }
 0xcba   :  { %5516 = vmatprep.subr.bf16.mxu1 %v5515_v33  ;;  %v5557_v33 = vpack.c.bf16 %v4076_v34, %v4074_v31  ;;  %v5559_v35 = vpack.c.bf16 %v4081_v38, %v4079_v30  ;;  %v4200_v31 = vrot.slane %v4191_v11, %v6457_v23  ;;  %v4320_v11 = vld [vmem:[%s7109_s20 + $0xf0] sm:$0xff] }
 0xcbd   :  { %5518 = vmatpush1.bf16.msra.mxu1 %v5517_v18  ;;  %v4085_v18 = vld [vmem:[#allocation17 + $0x538] sm:$0xff] }
 0xcbe   :  { %5520 = vmatprep.subr.bf16.mxu1 %v5519_v46  ;;  %v5561_v46 = vpack.c.bf16 %v4080_v39, %v4078_v37  ;;  %v5563_v21 = vpack.c.bf16 %v4085_v18, %v4083_v27  ;;  %v4306_v18 = vld [vmem:[%s7109_s20 + $0x80] sm:$0xff] }
 0xcc1   :  { %5522 = vmatpush1.bf16.msra.mxu1 %v5521_v45  ;;  %v4089_v45 = vld [vmem:[#allocation17 + $0x558] sm:$0xff] }
 0xcc2   :  { %5528 = vmatprep.subr.bf16.mxu1 %v5527_v48  ;;  %v5565_v48 = vpack.c.bf16 %v4084_v56, %v4082_v47  ;;  %v5567_v50 = vpack.c.bf16 %v4089_v45, %v4087_v24  ;;  %v4290_v24 = vld [vmem:[%s7109_s20] sm:$0xff]  ;;  %v4291_v45 = vld [vmem:[%s7109_s20 + $0x8] sm:$0xff] }
 0xcc4   :  { %3947 = vmatmul.mubr.f32.vlgmr.msra.gmra.mrb[24].mxu1 %v6955_v36  ;;  %v4060_v36 = vld [vmem:[#allocation17 + $0x470] sm:$0xff] }
 0xcc5   :  { %3952 = vmatprep.mubr.f32.mxu1 %v6959_v29  ;;  %5530 = vmatpush1.bf16.msra.mxu1 %v5529_v2  ;;  %v4065_v29 = vld [vmem:[#allocation17 + $0x498] sm:$0xff]  ;;  %v5541_v40 = vpack.c.bf16 %v4060_v36, %v4058_v44  ;;  %v4098_v36 = vld [vmem:[#allocation17 + $0x5a0] sm:$0xff] }
 0xcc6   :  { %5532 = vmatprep.subr.bf16.mxu1 %v5531_v20  ;;  %v5543_v7 = vpack.c.bf16 %v4065_v29, %v4063_v57  ;;  %v4093_v2 = vld [vmem:[#allocation17 + $0x578] sm:$0xff]  ;;  %v5569_v20 = vpack.c.bf16 %v4088_v54, %v4086_v51  ;;  %v4100_v57 = vld [vmem:[#allocation17 + $0x5b0] sm:$0xff]  ;;  %v4103_v29 = vld [vmem:[#allocation17 + $0x5c8] sm:$0xff]  ;;  %v5597_v54 = vpack.c.bf16 %v4291_v45, %v4290_v24 }
 0xcc7   :  { %v5571_v49 = vpack.c.bf16 %v4093_v2, %v4091_v55  ;;  %v4215_v51 = vld [vmem:[#allocation20] sm:$0x3]  ;;  %v4292_v2 = vld [vmem:[%s7109_s20 + $0x10] sm:$0xff] }
 0xcc8   :  { %3953 = vmatmul.mubr.f32.gmra.mrb[26].mxu1 %v6957_v26  ;;  %v5545_v26 = vpack.c.bf16 %v4064_v1, %v4062_v59  ;;  %v4102_v1 = vld [vmem:[#allocation17 + $0x5c0] sm:$0xff] }
 0xcc9   :  { %5534 = vmatpush1.bf16.msra.mxu1 %v5533_v62  ;;  %4174 = vmatprep.mubr.f32.mxu1 %v6963_v13  ;;  %v4068_v13 = vld [vmem:[#allocation17 + $0x4b0] sm:$0xff]  ;;  %v4097_v62 = vld [vmem:[#allocation17 + $0x598] sm:$0xff] }
 0xcca   :  { %5536 = vmatprep.subr.bf16.mxu1 %v5535_v3  ;;  %v5549_v8 = vpack.c.bf16 %v4068_v13, %v4066_v22  ;;  %v5573_v3 = vpack.c.bf16 %v4092_v61, %v4090_v28  ;;  %v5575_v52 = vpack.c.bf16 %v4097_v62, %v4095_v0  ;;  %v4106_v13 = vld [vmem:[#allocation17 + $0x5e0] sm:$0xff]  ;;  %v4311_v28 = vld [vmem:[%s7109_s20 + $0xa8] sm:$0xff]  ;;  %v4294_v62 = vld [vmem:[%s7109_s20 + $0x20] sm:$0xff] }
 0xccb   :  { %v5589_v5 = vpack.c.bf16 %v4108_v58, %v4106_v13  ;;  %v4319_v13 = vld [vmem:[%s7109_s20 + $0xe8] sm:$0xff] }
 0xccd   :  { %5538 = vmatpush1.bf16.msra.mxu1 %v5537_v4  ;;  %v4101_v4 = vld [vmem:[#allocation17 + $0x5b8] sm:$0xff] }
 0xcce   :  { %5540 = vmatprep.subr.bf16.mxu1 %v5539_v43  ;;  %v5577_v43 = vpack.c.bf16 %v4096_v53, %v4094_v6  ;;  %v5579_v44 = vpack.c.bf16 %v4101_v4, %v4099_v60  ;;  %v4313_v6 = vld [vmem:[%s7109_s20 + $0xb8] sm:$0xff]  ;;  %v4296_v4 = vld [vmem:[%s7109_s20 + $0x30] sm:$0xff] }
 0xcd1   :  { %5542 = vmatpush1.bf16.msra.mxu1 %v5541_v40  ;;  %v4105_v40 = vld [vmem:[#allocation17 + $0x5d8] sm:$0xff] }
 0xcd2   :  { %5544 = vmatprep.subr.bf16.mxu1 %v5543_v7  ;;  %v5581_v7 = vpack.c.bf16 %v4100_v57, %v4098_v36  ;;  %v5583_v59 = vpack.c.bf16 %v4105_v40, %v4103_v29  ;;  %v4315_v36 = vld [vmem:[%s7109_s20 + $0xc8] sm:$0xff]  ;;  %v4298_v40 = vld [vmem:[%s7109_s20 + $0x40] sm:$0xff] }
 0xcd5   :  { %5546 = vmatpush1.bf16.msra.mxu1 %v5545_v26  ;;  %v4109_v26 = vld [vmem:[#allocation17 + $0x5f8] sm:$0xff] }
 0xcd6   :  { %5548 = vmatprep.subr.bf16.mxu1 %v5547_v15  ;;  %v5585_v15 = vpack.c.bf16 %v4104_v63, %v4102_v1  ;;  %v5587_v22 = vpack.c.bf16 %v4109_v26, %v4107_v19  ;;  %v4317_v1 = vld [vmem:[%s7109_s20 + $0xd8] sm:$0xff]  ;;  %v4300_v26 = vld [vmem:[%s7109_s20 + $0x50] sm:$0xff] }
 0xcd9   :  { %5550 = vmatpush1.bf16.msra.mxu1 %v5549_v8  ;;  %v2709_v8 = vld [vmem:[#allocation14] sm:$0x3] }
 0xcda   :  { %5552 = vmatprep.subr.bf16.mxu1 %v5551_v10  ;;  %v2714_v10 = vrot.slane %v2709_v8, %v6462_v25  ;;  %v2718_v12 = vrot.slane %v2709_v8, %v6457_v23  ;;  %v4307_v25 = vld [vmem:[%s7109_s20 + $0x88] sm:$0xff]  ;;  %v4302_v8 = vld [vmem:[%s7109_s20 + $0x60] sm:$0xff] }
 0xcdb   :  { %v5595_v56 = vpack.c.bf16 %v4307_v25, %v4306_v18 }
 0xcdd   :  { %5554 = vmatpush1.bf16.msra.mxu1 %v5553_v17 }
 0xcde   :  { %5556 = vmatprep.subr.bf16.mxu1 %v5555_v41 }
 0xce1   :  { %5558 = vmatpush1.bf16.msra.mxu1 %v5557_v33 }
 0xce2   :  { %5560 = vmatprep.subr.bf16.mxu1 %v5559_v35 }
 0xce5   :  { %5562 = vmatpush1.bf16.msra.mxu1 %v5561_v46 }
 0xce6   :  { %5564 = vmatprep.subr.bf16.mxu1 %v5563_v21 }
 0xce9   :  { %5566 = vmatpush1.bf16.msra.mxu1 %v5565_v48  ;;  %v4308_v48 = vld [vmem:[%s7109_s20 + $0x90] sm:$0xff] }
 0xcea   :  { %5568 = vmatprep.subr.bf16.mxu1 %v5567_v50  ;;  %v4309_v50 = vld [vmem:[%s7109_s20 + $0x98] sm:$0xff] }
 0xceb   :  { %v5599_v55 = vpack.c.bf16 %v4309_v50, %v4308_v48 }
 0xced   :  { %5570 = vmatpush1.bf16.msra.mxu1 %v5569_v20  ;;  %v4293_v20 = vld [vmem:[%s7109_s20 + $0x18] sm:$0xff] }
 0xcee   :  { %5572 = vmatprep.subr.bf16.mxu1 %v5571_v49  ;;  %v4310_v49 = vld [vmem:[%s7109_s20 + $0xa0] sm:$0xff]  ;;  %v5601_v61 = vpack.c.bf16 %v4293_v20, %v4292_v2 }
 0xcef   :  { %v5603_v0 = vpack.c.bf16 %v4311_v28, %v4310_v49 }
 0xcf1   :  { %5574 = vmatpush1.bf16.msra.mxu1 %v5573_v3  ;;  %v4295_v3 = vld [vmem:[%s7109_s20 + $0x28] sm:$0xff] }
 0xcf2   :  { %5576 = vmatprep.subr.bf16.mxu1 %v5575_v52  ;;  %v4312_v52 = vld [vmem:[%s7109_s20 + $0xb0] sm:$0xff]  ;;  %v5605_v53 = vpack.c.bf16 %v4295_v3, %v4294_v62 }
 0xcf3   :  { %v5607_v60 = vpack.c.bf16 %v4313_v6, %v4312_v52 }
 0xcf5   :  { %5578 = vmatpush1.bf16.msra.mxu1 %v5577_v43  ;;  %v4297_v43 = vld [vmem:[%s7109_s20 + $0x38] sm:$0xff] }
 0xcf6   :  { %5580 = vmatprep.subr.bf16.mxu1 %v5579_v44  ;;  %v4314_v44 = vld [vmem:[%s7109_s20 + $0xc0] sm:$0xff]  ;;  %v5609_v57 = vpack.c.bf16 %v4297_v43, %v4296_v4 }
 0xcf7   :  { %v5611_v29 = vpack.c.bf16 %v4315_v36, %v4314_v44 }
 0xcf9   :  { %5582 = vmatpush1.bf16.msra.mxu1 %v5581_v7  ;;  %v4299_v7 = vld [vmem:[%s7109_s20 + $0x48] sm:$0xff] }
 0xcfa   :  { %5584 = vmatprep.subr.bf16.mxu1 %v5583_v59  ;;  %v4316_v59 = vld [vmem:[%s7109_s20 + $0xd0] sm:$0xff]  ;;  %v5613_v63 = vpack.c.bf16 %v4299_v7, %v4298_v40 }
 0xcfb   :  { %v5615_v19 = vpack.c.bf16 %v4317_v1, %v4316_v59 }
 0xcfd   :  { %5586 = vmatpush1.bf16.msra.mxu1 %v5585_v15  ;;  %v4301_v15 = vld [vmem:[%s7109_s20 + $0x58] sm:$0xff] }
 0xcfe   :  { %5588 = vmatprep.subr.bf16.mxu1 %v5587_v22  ;;  %v4318_v22 = vld [vmem:[%s7109_s20 + $0xe0] sm:$0xff]  ;;  %v5617_v58 = vpack.c.bf16 %v4301_v15, %v4300_v26 }
 0xd01   :  { %5590 = vmatpush1.bf16.msra.mxu1 %v5589_v5  ;;  %v5619_v5 = vpack.c.bf16 %v4319_v13, %v4318_v22 }
 0xd04   :  { %4175 = vmatmul.mubr.f32.vlgmr.msra.gmra.mrb[24].mxu1 %v6961_v9 }
 0xd05   :  { %4180 = vmatprep.mubr.f32.mxu1 %v6967_v42 }
 0xd08   :  { %4181 = vmatmul.mubr.f32.gmra.mrb[26].mxu1 %v6965_v32 }
 0xdd7   :  { %v4176_v14 = vpop.f32.mrb[24].mxu1 }
 0xdd8   :  { %v5635_v17 = vadd.f32 %v4176_v14, %v2714_v10  ;;  %v4178_v41 = vpop.f32.mrb[25].mxu1 }
 0xdd9   :  { %v5637_v34 = vadd.f32 %v4178_v41, %v2718_v12  ;;  %v4305_v41 = vld [vmem:[%s7109_s20 + $0x78] sm:$0xff] }
 0xdda   :  { %v5636_v9 = vadd.f32 %v5635_v17, %v4196_v16  ;;  %v4304_v17 = vld [vmem:[%s7109_s20 + $0x70] sm:$0xff] }
 0xddb   :  { %v4182_v30 = vpop.f32.mrb[26].mxu1  ;;  %v5638_v33 = vadd.f32 %v5637_v34, %v4200_v31 }
 0xddc   :  { %v5639_v38 = vadd.f32 %v4182_v30, %v2714_v10  ;;  %v4184_v42 = vpop.f32.mrb[27].mxu1  ;;  %v4211_v39 = vmax.f32 %v5636_v9, 0.0  ;;  %v4303_v10 = vld [vmem:[%s7109_s20 + $0x68] sm:$0xff] }
 0xddd   :  { %v5641_v32 = vadd.f32 %v4184_v42, %v2718_v12  ;;  %v4212_v23 = vmax.f32 %v5638_v33, 0.0  ;;  %v4321_v12 = vld [vmem:[%s7109_s20 + $0xf8] sm:$0xff]  ;;  %v5621_v14 = vpack.c.bf16 %v4303_v10, %v4302_v8 }
 0xdde   :  { %v5640_v35 = vadd.f32 %v5639_v38, %v4196_v16  ;;  %v5623_v16 = vpack.c.bf16 %v4321_v12, %v4320_v11  ;;  %v4505_v38 = vld [vmem:[#allocation22] ss:$0 sm:$0xff] }
 0xddf   :  { %v5642_v37 = vadd.f32 %v5641_v32, %v4200_v31  ;;  %v5625_v31 = vpack.c.bf16 %v4305_v41, %v4304_v17 }
 0xde0   :  { %v4213_v27 = vmax.f32 %v5640_v35, 0.0 }
 0xde1   :  { %v4214_v46 = vmax.f32 %v5642_v37, 0.0 }
 0xde2   :  { %v5593_v21 = vpack.c.bf16 %v4213_v27, %v4211_v39 }
 0xde3   :  { %v5591_v47 = vpack.c.bf16 %v4214_v46, %v4212_v23 }
 0xde5   :  { %5592 = vmatprep.subr.bf16.mxu0 %v5591_v47 }
 0xde6   :  { %5594 = vmatpush1.bf16.msra.mxu0 %v5593_v21 }
 0xde7   :  { %5596 = vmatprep.subr.bf16.mxu0 %v5595_v56 }
 0xde9   :  { %4504 = vmatmul.mubr.msk.f32.vlgmr.msra.gmra.mrb[92].mxu0 %vm3506_vm2, %v4215_v51 }
 0xdea   :  { %5598 = vmatpush3.bf16.msra.mxu0 %v5597_v54 }
 0xdeb   :  { %5600 = vmatprep.subr.bf16.mxu0 %v5599_v55 }
 0xdee   :  { %5602 = vmatpush3.bf16.msra.mxu0 %v5601_v61 }
 0xdef   :  { %5604 = vmatprep.subr.bf16.mxu0 %v5603_v0 }
 0xdf2   :  { %5606 = vmatpush3.bf16.msra.mxu0 %v5605_v53 }
 0xdf3   :  { %5608 = vmatprep.subr.bf16.mxu0 %v5607_v60 }
 0xdf6   :  { %5610 = vmatpush3.bf16.msra.mxu0 %v5609_v57 }
 0xdf7   :  { %5612 = vmatprep.subr.bf16.mxu0 %v5611_v29 }
 0xdfa   :  { %5614 = vmatpush3.bf16.msra.mxu0 %v5613_v63 }
 0xdfb   :  { %5616 = vmatprep.subr.bf16.mxu0 %v5615_v19 }
 0xdfe   :  { %5618 = vmatpush3.bf16.msra.mxu0 %v5617_v58 }
 0xdff   :  { %5620 = vmatprep.subr.bf16.mxu0 %v5619_v5 }
 0xe02   :  { %5622 = vmatpush3.bf16.msra.mxu0 %v5621_v14 }
 0xe03   :  { %5624 = vmatprep.subr.bf16.mxu0 %v5623_v16 }
 0xe06   :  { %5626 = vmatpush3.bf16.msra.mxu0 %v5625_v31 }
 0xebc   :  { %v4285_v34 = vpop.f32.mrb[92].mxu0 }
 0xebd   :  { %v4287_v30 = vpop.f32.mrb[93].mxu0 }
 0xebe   :  { %4393 = vmatprep.mubr.f32.mxu0 %v4287_v30 }
 0xebf   :  { %4394 = vmatmul.mubr.f32.vlgmr.msra.gmra.mrb[94].mxu0 %v4285_v34 }
 0xf92   :  { %v4562_v9 = vpop.f32.mrb[94].mxu0 }
 0xf93   :  { %v4563_v42 = vpop.f32.mrb[95].mxu0 }
 0xf94   :  { %v4564_v33 = vadd.f32 %v4563_v42, %v4562_v9 }
 0xf96   :  { %v4396_v32 = vadd.f32 %v4564_v33, %v4505_v38 }
 0xf98   :  { %4400 = vst.msk [vmem:[#allocation23] sm:$0x3] %vm4399_vm3, %v4396_v32 }
 0xf99   :  { %6019 = shalt.err (!%p6016_p10)
}
 0xf9a   :  { %s7133_s28 = sld [smem:[#allocation39_spill]] }
 0xfa0   :  { %s6020_s22 = scalar_lea.hbm %s7133_s28, 32 }
 0xfa1   :  { %p6021_p11 = scmp.ne.s32.totalorder %s7133_s28, %s6020_s22  ;;  %p6024_p12 = scmp.lt.u32.totalorder %s6020_s22, %s7133_s28 }
 0xfa3   :  { %p6026_p13 = pnand %p6024_p12, %p6021_p11 }
 0xfa5   :  { %6029 = shalt.err (!%p6026_p13)
}
 0xfa6   :  { %4410 = dma.vmem_to_hbm [thread:$0]  %s4408_s5, 32, %s7133_s28, [#allocation4]  }
 0xfa7   :  { %6044 = dma.done.wait [#allocation4], 32  }
 0xfa8   :  { %6045 = vsyncadd [#allocation4], 4294967264 }
 0xfa9   :  { %4414 = vsyncpa [#allocation3], 1 }
 0xfaa   :  { %4415 = vsyncpa [#allocation6], 1 }
 0xfab   :  { %4416 = vsyncpa [#allocation9], 1 }
 0xfac   :  { %4417 = vsyncpa [#allocation12], 1 }
 0xfad   :  { %4418 = vsyncpa [#allocation15], 1 }
 0xfae   :  { %4419 = vsyncpa [#allocation18], 1 }
 0xfaf   :  { %4420 = vsyncpa [#allocation21], 1 }
 0xfb0   :  { %4421 = vsyncpa [#allocation4], 1 }

</bundles_post_ra>
